<compile_context>
chip_gen: v5e
topology: v5e:2x2
jax: 0.10.0
libtpu: 0.0.40
codegen_flags: <defaults>
</compile_context>

<pallas_src>
import jax
import jax.numpy as jnp
from jax.experimental import pallas as pl
from jax.experimental.pallas import tpu as pltpu

NUM_CLASSES = 10
IN_FEATURES = 28 * 28    # 784 (K of layer 1; kept un-padded, see header note)
H1_PAD = 1024            # 1000 -> 1024
H2_PAD = 512             # 500  -> 512
H3_PAD = 256             # 200  -> 256
CLASS_PAD = 128          # 10   -> 128 (lane-dense output)


def _cdiv(a, b):
    return -(-a // b)


def _round_up(n, m):
    return ((n + m - 1) // m) * m


def _tpu_config():
    """Per-generation tiling / VMEM knobs."""
    kind = ""
    try:
        kind = jax.devices()[0].device_kind.lower()
    except Exception:
        pass
    if "v7" in kind or "7x" in kind:
        # 2 TensorCores, 64 MiB VMEM/TC: force >=2 parallel grid steps so both
        # cores get work, keep tiles modest, single-buffer the (never
        # re-fetched) weights to preserve VMEM headroom.
        return dict(batch_tile=512, vmem_limit=48 << 20, min_parallel_steps=2,
                    weight_buffering=pl.Buffered(1))
    if "v6" in kind:
        # Single TC, 128 MiB VMEM, 918 TF/s MXU: big tiles amortize the
        # ~0.35 us fixed per-grid-step overhead.
        return dict(batch_tile=1024, vmem_limit=64 << 20, min_parallel_steps=1,
                    weight_buffering=None)
    # v5e / unknown: 197 TF/s MXU -> a 512-row step is already ~7 us of MXU
    # work, per-step overhead <5%; bigger tiles buy little.
    return dict(batch_tile=512, vmem_limit=64 << 20, min_parallel_steps=1,
                weight_buffering=None)


def mlp_kernel(x_ref,
               w1_ref, b1_ref,
               w2_ref, b2_ref,
               w3_ref, b3_ref,
               w4_ref, b4_ref,
               out_ref):
    # Whole MLP fused per batch tile.  Weights (bf16, ~3.2 MB total) are
    # resident in VMEM via constant-index BlockSpecs.  Matmuls: bf16 operands,
    # f32 accumulation; bias/ReLU/log-softmax in f32 (VPU/EUP).
    x = x_ref[...].astype(jnp.bfloat16)          # f32 tile -> bf16 in-kernel

    h = jnp.dot(x, w1_ref[...], preferred_element_type=jnp.float32) + b1_ref[...]
    h = jnp.maximum(h, 0.0)

    h = jnp.dot(h.astype(jnp.bfloat16), w2_ref[...],
                preferred_element_type=jnp.float32) + b2_ref[...]
    h = jnp.maximum(h, 0.0)

    h = jnp.dot(h.astype(jnp.bfloat16), w3_ref[...],
                preferred_element_type=jnp.float32) + b3_ref[...]
    h = jnp.maximum(h, 0.0)

    logits = jnp.dot(h.astype(jnp.bfloat16), w4_ref[...],
                     preferred_element_type=jnp.float32) + b4_ref[...]

    # Padded classes carry a -1e30 f32 bias and zero weight columns: their
    # exp underflows to exactly 0, so log_softmax over 128 lanes equals
    # log_softmax over the real 10 classes on those columns.
    m = jnp.max(logits, axis=-1, keepdims=True)
    shifted = logits - m
    lse = jnp.log(jnp.sum(jnp.exp(shifted), axis=-1, keepdims=True))
    out_ref[...] = shifted - lse


def prepare_params(params):
    """One-time weight prep (hoisted out of the forward pass).

    Input: torch-Linear-equivalent params stored (in, out) / (1, out), f32.
    Output: bf16 weights zero-padded to lane-dense shapes, f32 biases padded
    to match (fake logit classes get a -1e30 bias -- kept in f32, never cast).
    """
    w1, b1, w2, b2, w3, b3, w4, b4 = params

    def pad_wb(w, b, k_pad, n_pad, pad_bias_value=0.0):
        din, dout = w.shape
        wp = jnp.zeros((k_pad, n_pad), jnp.bfloat16)
        wp = wp.at[:din, :dout].set(w.astype(jnp.bfloat16))
        bp = jnp.full((1, n_pad), pad_bias_value, jnp.float32)
        bp = bp.at[:, :dout].set(b.reshape(1, dout).astype(jnp.float32))
        return wp, bp

    w1p, b1p = pad_wb(w1, b1, IN_FEATURES, H1_PAD)                 # (784, 1024)
    w2p, b2p = pad_wb(w2, b2, H1_PAD, H2_PAD)                      # (1024, 512)
    w3p, b3p = pad_wb(w3, b3, H2_PAD, H3_PAD)                      # (512, 256)
    w4p, b4p = pad_wb(w4, b4, H3_PAD, CLASS_PAD, pad_bias_value=-1e30)  # (256,128)
    return (w1p, b1p, w2p, b2p, w3p, b3p, w4p, b4p)


def net_forward(x_nchw, prepared_params, *, batch_tile=None, config=None):
    """x_nchw: (B, 1, 28, 28) f32 -> (B, 10) f32 log-probabilities.

    `prepared_params` must come from prepare_params() (call it once at init).
    """
    cfg = config or _tpu_config()
    if batch_tile is None:
        batch_tile = cfg["batch_tile"]

    B = x_nchw.shape[0]
    # Same semantics as torch .view(-1, 784); stays f32, cast happens in-kernel.
    x = x_nchw.reshape(B, IN_FEATURES)

    # --- batch tile: multiple of 16 rows, minimal padding, >=2 steps on v7x --
    n_steps = max(cfg["min_parallel_steps"], _cdiv(B, batch_tile))
    tb = _round_up(_cdiv(B, n_steps), 16)
    B_pad = _round_up(B, tb)
    if B_pad != B:
        x = jnp.pad(x, ((0, B_pad - B), (0, 0)))

    w1p, b1p, w2p, b2p, w3p, b3p, w4p, b4p = prepared_params

    def repl(shape):
        # Full-array block, constant index -> fetched once, resident in VMEM.
        if cfg["weight_buffering"] is not None:
            return pl.BlockSpec(shape, lambda i: (0, 0),
                                pipeline_mode=cfg["weight_buffering"])
        return pl.BlockSpec(shape, lambda i: (0, 0))

    grid_spec = pltpu.PrefetchScalarGridSpec(
        num_scalar_prefetch=0,
        grid=(B_pad // tb,),
        in_specs=[
            pl.BlockSpec((tb, IN_FEATURES), lambda i: (i, 0)),   # x tile (f32)
            repl(w1p.shape), repl(b1p.shape),
            repl(w2p.shape), repl(b2p.shape),
            repl(w3p.shape), repl(b3p.shape),
            repl(w4p.shape), repl(b4p.shape),
        ],
        out_specs=pl.BlockSpec((tb, CLASS_PAD), lambda i: (i, 0)),
    )

    out_padded = pl.pallas_call(
        mlp_kernel,
        out_shape=jax.ShapeDtypeStruct((B_pad, CLASS_PAD), jnp.float32),
        grid_spec=grid_spec,
        compiler_params=pltpu.CompilerParams(
            dimension_semantics=("parallel",),
            vmem_limit_bytes=cfg["vmem_limit"],
        ),
    )(x, w1p, b1p, w2p, b2p, w3p, b3p, w4p, b4p)

    return out_padded[:B, :NUM_CLASSES]


def init_params(key):
    """Deterministic synthetic parameters with the nn.Linear shapes.

    Weights stored (in, out) f32; biases stored (1, out) f32.
    """
    dims = [(784, 1000), (1000, 500), (500, 200), (200, 10)]
    params = []
    for (din, dout) in dims:
        key, kw, kb = jax.random.split(key, 3)
        scale = 1.0 / jnp.sqrt(jnp.float32(din))  # torch Linear U(-1/sqrt(in), 1/sqrt(in))
        w = jax.random.uniform(kw, (din, dout), jnp.float32, -scale, scale)
        b = jax.random.uniform(kb, (1, dout), jnp.float32, -scale, scale)
        params += [w, b]
    return tuple(params)


def reference_forward(x_nchw, params):
    """Plain-JAX reference with matching bf16-operand / f32-accumulate matmuls."""
    w1, b1, w2, b2, w3, b3, w4, b4 = params
    x = x_nchw.reshape(x_nchw.shape[0], IN_FEATURES)

    def dense(h, w, b):
        return jnp.dot(h.astype(jnp.bfloat16), w.astype(jnp.bfloat16),
                       preferred_element_type=jnp.float32) + b

    h = jnp.maximum(dense(x, w1, b1), 0.0)
    h = jnp.maximum(dense(h, w2, b2), 0.0)
    h = jnp.maximum(dense(h, w3, b3), 0.0)
    logits = dense(h, w4, b4)
    return jax.nn.log_softmax(logits, axis=1)


if __name__ == "__main__":
    key = jax.random.PRNGKey(0)
    key_x, key_p = jax.random.split(key)

    B = 8
    x = jax.random.normal(key_x, (B, 1, 28, 28), jnp.float32)  # NCHW like torch
    params = init_params(key_p)

    # One-time weight prep (hoisted out of the per-call forward path).
    prepared = jax.block_until_ready(prepare_params(params))

    out = net_forward(x, prepared)
    out = jax.block_until_ready(out)

    ref = reference_forward(x, params)
    assert out.shape == (B, NUM_CLASSES)
    assert jnp.allclose(out, ref, atol=2e-2, rtol=2e-2), "mismatch vs reference"
    # log-probabilities must exponentiate-sum to 1
    assert jnp.allclose(jnp.sum(jnp.exp(out), axis=1), 1.0, atol=1e-3)

    print("KERNEL_OK")
</pallas_src>

<mosaic_0001>
module attributes {stable_mosaic.version = 11 : i64} {
  func.func @mlp_kernel(%arg0: i32, %arg1: memref<16x784xf32, #tpu.memory_space<vmem>>, %arg2: memref<784x1024xbf16, #tpu.memory_space<vmem>>, %arg3: memref<1x1024xf32, #tpu.memory_space<vmem>>, %arg4: memref<1024x512xbf16, #tpu.memory_space<vmem>>, %arg5: memref<1x512xf32, #tpu.memory_space<vmem>>, %arg6: memref<512x256xbf16, #tpu.memory_space<vmem>>, %arg7: memref<1x256xf32, #tpu.memory_space<vmem>>, %arg8: memref<256x128xbf16, #tpu.memory_space<vmem>>, %arg9: memref<1x128xf32, #tpu.memory_space<vmem>>, %arg10: memref<16x128xf32, #tpu.memory_space<vmem>>) attributes {dimension_semantics = [#tpu.dimension_semantics<parallel>], iteration_bounds = array<i64: 1>, scalar_prefetch = 0 : i64, scratch_operands = 0 : i64, tpu.core_type = #tpu.core_type<tc>, window_params = [{transform_indices = @transform_0, window_bounds = array<i64: 16, 784>}, {pipeline_mode = #tpu.pipeline_mode<synchronous>, transform_indices = @transform_1, window_bounds = array<i64: 784, 1024>}, {pipeline_mode = #tpu.pipeline_mode<synchronous>, transform_indices = @transform_2, window_bounds = array<i64: 1, 1024>}, {pipeline_mode = #tpu.pipeline_mode<synchronous>, transform_indices = @transform_3, window_bounds = array<i64: 1024, 512>}, {pipeline_mode = #tpu.pipeline_mode<synchronous>, transform_indices = @transform_4, window_bounds = array<i64: 1, 512>}, {pipeline_mode = #tpu.pipeline_mode<synchronous>, transform_indices = @transform_5, window_bounds = array<i64: 512, 256>}, {pipeline_mode = #tpu.pipeline_mode<synchronous>, transform_indices = @transform_6, window_bounds = array<i64: 1, 256>}, {pipeline_mode = #tpu.pipeline_mode<synchronous>, transform_indices = @transform_7, window_bounds = array<i64: 256, 128>}, {pipeline_mode = #tpu.pipeline_mode<synchronous>, transform_indices = @transform_8, window_bounds = array<i64: 1, 128>}, {transform_indices = @transform_9, window_bounds = array<i64: 16, 128>}]} {
    %c0 = arith.constant 0 : index
    %c0_0 = arith.constant 0 : index
    %0 = vector.load %arg1[%c0, %c0_0] : memref<16x784xf32, #tpu.memory_space<vmem>>, vector<16x784xf32>
    %1 = arith.truncf %0 : vector<16x784xf32> to vector<16x784xbf16>
    %c0_1 = arith.constant 0 : index
    %c0_2 = arith.constant 0 : index
    %2 = vector.load %arg2[%c0_1, %c0_2] : memref<784x1024xbf16, #tpu.memory_space<vmem>>, vector<784x1024xbf16>
    %cst = arith.constant dense<0.000000e+00> : vector<16x1024xf32>
    %3 = tpu.matmul %1, %2, %cst {dimension_numbers = #tpu.dot_dimension_numbers<[1], [0], [0], [1], [0, 0, 1, 1], [], []>} : vector<16x784xbf16>, vector<784x1024xbf16>, vector<16x1024xf32> -> vector<16x1024xf32>
    %c0_3 = arith.constant 0 : index
    %c0_4 = arith.constant 0 : index
    %4 = vector.load %arg3[%c0_3, %c0_4] : memref<1x1024xf32, #tpu.memory_space<vmem>>, vector<1x1024xf32>
    %5 = vector.broadcast %4 : vector<1x1024xf32> to vector<16x1024xf32>
    %6 = arith.addf %3, %5 : vector<16x1024xf32>
    %cst_5 = arith.constant 0.000000e+00 : f32
    %7 = vector.broadcast %cst_5 : f32 to vector<16x1024xf32>
    %8 = arith.maximumf %6, %7 : vector<16x1024xf32>
    %9 = arith.truncf %8 : vector<16x1024xf32> to vector<16x1024xbf16>
    %c0_6 = arith.constant 0 : index
    %c0_7 = arith.constant 0 : index
    %10 = vector.load %arg4[%c0_6, %c0_7] : memref<1024x512xbf16, #tpu.memory_space<vmem>>, vector<1024x512xbf16>
    %cst_8 = arith.constant dense<0.000000e+00> : vector<16x512xf32>
    %11 = tpu.matmul %9, %10, %cst_8 {dimension_numbers = #tpu.dot_dimension_numbers<[1], [0], [0], [1], [0, 0, 1, 1], [], []>} : vector<16x1024xbf16>, vector<1024x512xbf16>, vector<16x512xf32> -> vector<16x512xf32>
    %c0_9 = arith.constant 0 : index
    %c0_10 = arith.constant 0 : index
    %12 = vector.load %arg5[%c0_9, %c0_10] : memref<1x512xf32, #tpu.memory_space<vmem>>, vector<1x512xf32>
    %13 = vector.broadcast %12 : vector<1x512xf32> to vector<16x512xf32>
    %14 = arith.addf %11, %13 : vector<16x512xf32>
    %cst_11 = arith.constant 0.000000e+00 : f32
    %15 = vector.broadcast %cst_11 : f32 to vector<16x512xf32>
    %16 = arith.maximumf %14, %15 : vector<16x512xf32>
    %17 = arith.truncf %16 : vector<16x512xf32> to vector<16x512xbf16>
    %c0_12 = arith.constant 0 : index
    %c0_13 = arith.constant 0 : index
    %18 = vector.load %arg6[%c0_12, %c0_13] : memref<512x256xbf16, #tpu.memory_space<vmem>>, vector<512x256xbf16>
    %cst_14 = arith.constant dense<0.000000e+00> : vector<16x256xf32>
    %19 = tpu.matmul %17, %18, %cst_14 {dimension_numbers = #tpu.dot_dimension_numbers<[1], [0], [0], [1], [0, 0, 1, 1], [], []>} : vector<16x512xbf16>, vector<512x256xbf16>, vector<16x256xf32> -> vector<16x256xf32>
    %c0_15 = arith.constant 0 : index
    %c0_16 = arith.constant 0 : index
    %20 = vector.load %arg7[%c0_15, %c0_16] : memref<1x256xf32, #tpu.memory_space<vmem>>, vector<1x256xf32>
    %21 = vector.broadcast %20 : vector<1x256xf32> to vector<16x256xf32>
    %22 = arith.addf %19, %21 : vector<16x256xf32>
    %cst_17 = arith.constant 0.000000e+00 : f32
    %23 = vector.broadcast %cst_17 : f32 to vector<16x256xf32>
    %24 = arith.maximumf %22, %23 : vector<16x256xf32>
    %25 = arith.truncf %24 : vector<16x256xf32> to vector<16x256xbf16>
    %c0_18 = arith.constant 0 : index
    %c0_19 = arith.constant 0 : index
    %26 = vector.load %arg8[%c0_18, %c0_19] : memref<256x128xbf16, #tpu.memory_space<vmem>>, vector<256x128xbf16>
    %cst_20 = arith.constant dense<0.000000e+00> : vector<16x128xf32>
    %27 = tpu.matmul %25, %26, %cst_20 {dimension_numbers = #tpu.dot_dimension_numbers<[1], [0], [0], [1], [0, 0, 1, 1], [], []>} : vector<16x256xbf16>, vector<256x128xbf16>, vector<16x128xf32> -> vector<16x128xf32>
    %c0_21 = arith.constant 0 : index
    %c0_22 = arith.constant 0 : index
    %28 = vector.load %arg9[%c0_21, %c0_22] : memref<1x128xf32, #tpu.memory_space<vmem>>, vector<1x128xf32>
    %29 = vector.broadcast %28 : vector<1x128xf32> to vector<16x128xf32>
    %30 = arith.addf %27, %29 : vector<16x128xf32>
    %cst_23 = arith.constant dense<0xFF800000> : vector<16xf32>
    %31 = vector.multi_reduction <maximumf>, %30, %cst_23 [1] : vector<16x128xf32> to vector<16xf32>
    %32 = vector.shape_cast %31 : vector<16xf32> to vector<16x1xf32>
    %33 = vector.broadcast %32 : vector<16x1xf32> to vector<16x128xf32>
    %34 = arith.subf %30, %33 : vector<16x128xf32>
    %35 = math.exp %34 : vector<16x128xf32>
    %cst_24 = arith.constant dense<0.000000e+00> : vector<16xf32>
    %36 = vector.multi_reduction <add>, %35, %cst_24 [1] : vector<16x128xf32> to vector<16xf32>
    %37 = vector.shape_cast %36 : vector<16xf32> to vector<16x1xf32>
    %38 = math.log %37 : vector<16x1xf32>
    %39 = vector.broadcast %38 : vector<16x1xf32> to vector<16x128xf32>
    %40 = arith.subf %34, %39 : vector<16x128xf32>
    %c0_25 = arith.constant 0 : index
    %c0_26 = arith.constant 0 : index
    %41 = vector.load %arg10[%c0_25, %c0_26] : memref<16x128xf32, #tpu.memory_space<vmem>>, vector<16x128xf32>
    tpu.vector_store %arg10[%c0_25, %c0_26], %40 {strides = array<i32>} : memref<16x128xf32, #tpu.memory_space<vmem>>, vector<16x128xf32>,
    return
  }
  func.func @transform_0(%arg0: i32) -> (i32, i32) {
    %c0_i32 = arith.constant 0 : i32
    %c0_i32_0 = arith.constant 0 : i32
    return %arg0, %c0_i32 : i32, i32
  }
  func.func @transform_1(%arg0: i32) -> (i32, i32) {
    %c0_i32 = arith.constant 0 : i32
    %c0_i32_0 = arith.constant 0 : i32
    %c0_i32_1 = arith.constant 0 : i32
    return %c0_i32, %c0_i32_0 : i32, i32
  }
  func.func @transform_2(%arg0: i32) -> (i32, i32) {
    %c0_i32 = arith.constant 0 : i32
    %c0_i32_0 = arith.constant 0 : i32
    %c0_i32_1 = arith.constant 0 : i32
    return %c0_i32, %c0_i32_0 : i32, i32
  }
  func.func @transform_3(%arg0: i32) -> (i32, i32) {
    %c0_i32 = arith.constant 0 : i32
    %c0_i32_0 = arith.constant 0 : i32
    %c0_i32_1 = arith.constant 0 : i32
    return %c0_i32, %c0_i32_0 : i32, i32
  }
  func.func @transform_4(%arg0: i32) -> (i32, i32) {
    %c0_i32 = arith.constant 0 : i32
    %c0_i32_0 = arith.constant 0 : i32
    %c0_i32_1 = arith.constant 0 : i32
    return %c0_i32, %c0_i32_0 : i32, i32
  }
  func.func @transform_5(%arg0: i32) -> (i32, i32) {
    %c0_i32 = arith.constant 0 : i32
    %c0_i32_0 = arith.constant 0 : i32
    %c0_i32_1 = arith.constant 0 : i32
    return %c0_i32, %c0_i32_0 : i32, i32
  }
  func.func @transform_6(%arg0: i32) -> (i32, i32) {
    %c0_i32 = arith.constant 0 : i32
    %c0_i32_0 = arith.constant 0 : i32
    %c0_i32_1 = arith.constant 0 : i32
    return %c0_i32, %c0_i32_0 : i32, i32
  }
  func.func @transform_7(%arg0: i32) -> (i32, i32) {
    %c0_i32 = arith.constant 0 : i32
    %c0_i32_0 = arith.constant 0 : i32
    %c0_i32_1 = arith.constant 0 : i32
    return %c0_i32, %c0_i32_0 : i32, i32
  }
  func.func @transform_8(%arg0: i32) -> (i32, i32) {
    %c0_i32 = arith.constant 0 : i32
    %c0_i32_0 = arith.constant 0 : i32
    %c0_i32_1 = arith.constant 0 : i32
    return %c0_i32, %c0_i32_0 : i32, i32
  }
  func.func @transform_9(%arg0: i32) -> (i32, i32) {
    %c0_i32 = arith.constant 0 : i32
    %c0_i32_0 = arith.constant 0 : i32
    return %arg0, %c0_i32 : i32, i32
  }
}

</mosaic_0001>

<bundles_post_ra>
// kernel: tpu_custom_call.1
= control target key start
LH: loop header
LB: loop body
LE: loop exit
PB: predicated region body
PF: predicated region fallthrough
CT: control target
= control target key end

     0   :  { %14 = vsyncpa [#allocation3], 0  ;;  %s10502_s0 = inlined_call_operand.hbm [shape: f32[16,784], index: 0, kind: input, shape index: {}]   ;;  %s10503_s1 = inlined_call_operand.hbm [shape: bf16[784,1024], index: 1, kind: input, shape index: {}]   ;;  %s10504_s2 = inlined_call_operand.hbm [shape: f32[1,1024], index: 2, kind: input, shape index: {}]   ;;  %s10505_s3 = inlined_call_operand.hbm [shape: bf16[1024,512], index: 3, kind: input, shape index: {}]   ;;  %s10506_s4 = inlined_call_operand.hbm [shape: f32[1,512], index: 4, kind: input, shape index: {}]   ;;  %s10507_s5 = inlined_call_operand.hbm [shape: bf16[512,256], index: 5, kind: input, shape index: {}]   ;;  %s10508_s6 = inlined_call_operand.hbm [shape: f32[1,256], index: 6, kind: input, shape index: {}]   ;;  %s10509_s7 = inlined_call_operand.hbm [shape: bf16[256,128], index: 7, kind: input, shape index: {}]   ;;  %s10510_s8 = inlined_call_operand.hbm [shape: f32[1,128], index: 8, kind: input, shape index: {}]   ;;  %s10511_s9 = inlined_call_operand.hbm [shape: f32[16,128], index: 9, kind: output, shape index: {}]  }
   0x1   :  { %15 = vsyncpa [#allocation6], 0 }
   0x2   :  { %16 = vsyncpa [#allocation9], 0 }
   0x3   :  { %17 = vsyncpa [#allocation12], 0 }
   0x4   :  { %18 = vsyncpa [#allocation15], 0  ;;  %s37_s11 = sshll.u32 %s10503_s1, 4  ;;  %s38_s11 = int_to_ptr.hbm [resolvable:$true] %s37_s11 }
   0x5   :  { %19 = vsyncpa [#allocation4], 0  ;;  %s10019_s12 = smov [#allocation5]   ;;  %s61_s16 = sshll.u32 %s10505_s3, 4  ;;  %s62_s16 = int_to_ptr.hbm [resolvable:$true] %s61_s16 }
   0x6   :  { %s39_s13 = sshll.u32 %s10019_s12, 4  ;;  %s10020_s17 = smov 512   ;;  %s40_s13 = int_to_ptr.vmem [resolvable:$true] %s39_s13 }
   0x7   :  { %s10021_s18 = smov 32   ;;  %s10022_s19 = smov [#allocation8]  }
   0x8   :  { %45 = dma.hbm_to_vmem [thread:$0]  %s38_s11, 50176, %s40_s13, [#allocation6], %s10020_s17, %s10020_s17, %s10021_s18  }
   0x9   :  { %s63_s20 = sshll.u32 %s10022_s19, 4  ;;  %s10023_s21 = smov 256   ;;  %s64_s20 = int_to_ptr.vmem [resolvable:$true] %s63_s20 }
   0xa   :  { %s10024_s22 = smov 16   ;;  %s85_s24 = sshll.u32 %s10507_s5, 4  ;;  %s86_s24 = int_to_ptr.hbm [resolvable:$true] %s85_s24 }
   0xb   :  { %69 = dma.hbm_to_vmem [thread:$0]  %s62_s16, 32768, %s64_s20, [#allocation9], %s10023_s21, %s10023_s21, %s10024_s22  }
   0xc   :  { %s10025_s25 = smov [#allocation11]   ;;  %s109_s28 = sshll.u32 %s10509_s7, 4  ;;  %s110_s28 = int_to_ptr.hbm [resolvable:$true] %s109_s28 }
   0xd   :  { %s87_s26 = sshll.u32 %s10025_s25, 4  ;;  %s10026_s29 = smov 128   ;;  %s88_s26 = int_to_ptr.vmem [resolvable:$true] %s87_s26 }
   0xe   :  { %s10027_s30 = smov 8   ;;  %s10028_s10 = smov [#allocation14]  }
   0xf   :  { %93 = dma.hbm_to_vmem [thread:$0]  %s86_s24, 8192, %s88_s26, [#allocation12], %s10026_s29, %s10026_s29, %s10027_s30  }
  0x10   :  { %s111_s11 = sshll.u32 %s10028_s10, 4  ;;  %s10029_s12 = smov 64   ;;  %s112_s11 = int_to_ptr.vmem [resolvable:$true] %s111_s11 }
  0x11   :  { %s10030_s5 = smov 4   ;;  %s24_s15 = sshll.u32 %s10502_s0, 4  ;;  %s25_s15 = int_to_ptr.hbm [resolvable:$true] %s24_s15 }
  0x12   :  { %117 = dma.hbm_to_vmem [thread:$0]  %s110_s28, 2048, %s112_s11, [#allocation15], %s10029_s12, %s10029_s12, %s10030_s5  }
  0x13   :  { %s10031_s16 = smov [#allocation2]   ;;  %s51_s19 = sshll.u32 %s10504_s2, 4  ;;  %s52_s19 = int_to_ptr.hbm [resolvable:$true] %s51_s19 }
  0x14   :  { %s26_s7 = sshll.u32 %s10031_s16, 4  ;;  %s10032_s20 = smov 896   ;;  %s27_s7 = int_to_ptr.vmem [resolvable:$true] %s26_s7 }
  0x15   :  { %s10033_s21 = smov 56   ;;  %s10034_s22 = smov [#allocation7]  }
  0x16   :  { %32 = dma.hbm_to_vmem [thread:$0]  %s25_s15, 1792, %s27_s7, [#allocation3], %s10032_s20, %s10032_s20, %s10033_s21  }
  0x17   :  { %s53_s1 = sshll.u32 %s10034_s22, 4  ;;  %s75_s25 = sshll.u32 %s10506_s4, 4  ;;  %s54_s1 = int_to_ptr.vmem [resolvable:$true] %s53_s1  ;;  %s76_s25 = int_to_ptr.hbm [resolvable:$true] %s75_s25 }
  0x18   :  { %56 = dma.hbm_to_vmem [thread:$0]  %s52_s19, 128, %s54_s1, [#allocation6]  }
  0x19   :  { %s99_s27 = sshll.u32 %s10508_s6, 4  ;;  %s10035_s3 = smov [#allocation10]   ;;  %s100_s27 = int_to_ptr.hbm [resolvable:$true] %s99_s27 }
  0x1a   :  { %s77_s28 = sshll.u32 %s10035_s3, 4  ;;  %s10036_s2 = smov [#allocation13]   ;;  %s78_s28 = int_to_ptr.vmem [resolvable:$true] %s77_s28 }
  0x1b   :  { %80 = dma.hbm_to_vmem [thread:$0]  %s76_s25, 64, %s78_s28, [#allocation9]  }
  0x1c   :  { %s101_s10 = sshll.u32 %s10036_s2, 4  ;;  %s123_s5 = sshll.u32 %s10510_s8, 4  ;;  %s102_s10 = int_to_ptr.vmem [resolvable:$true] %s101_s10  ;;  %s124_s5 = int_to_ptr.hbm [resolvable:$true] %s123_s5 }
  0x1d   :  { %104 = dma.hbm_to_vmem [thread:$0]  %s100_s27, 32, %s102_s10, [#allocation12]  }
  0x1e   :  { %s10037_s4 = smov [#allocation16]  }
  0x1f   :  { %s125_s13 = sshll.u32 %s10037_s4, 4  ;;  %s126_s13 = int_to_ptr.vmem [resolvable:$true] %s125_s13 }
  0x20   :  { %128 = dma.hbm_to_vmem [thread:$0]  %s124_s5, 16, %s126_s13, [#allocation15]  }
  0x21   :  { %10007 = dma.done.wait [#allocation3], 1792  }
  0x22   :  { %10008 = vsyncadd [#allocation3], 4294965504 }
  0x23   :  { %10009 = dma.done.wait [#allocation6], 50304  }
  0x24   :  { %10010 = vsyncadd [#allocation6], 4294916992 }
  0x25   :  { %10011 = dma.done.wait [#allocation9], 32832  }
  0x26   :  { %10012 = vsyncadd [#allocation9], 4294934464 }
  0x27   :  { %10013 = dma.done.wait [#allocation12], 8224  }
  0x28   :  { %10014 = vsyncadd [#allocation12], 4294959072 }
  0x29   :  { %10015 = dma.done.wait [#allocation15], 2064  }
  0x2a   :  { %10016 = vsyncadd [#allocation15], 4294965232  ;;  %v6314_v0 = vld [vmem:[#allocation5 + $0x1c0] sm:$0xf]  ;;  %vm2557_vm0 = vcmask 130048   ;;  %s10038_s6 = smov [#allocation17]  }
  0x2b   :  { %v9068_v1 = vld [vmem:[#allocation5 + $0x1dc] sm:$0xf0]  ;;  %s6069_s8 = sshll.u32 %s10038_s6, 4  ;;  %s6071_s16 = sshll.u32 %s10511_s9, 4  ;;  %s6070_s8 = int_to_ptr.vmem [resolvable:$true] %s6069_s8  ;;  %s6072_s16 = int_to_ptr.hbm [resolvable:$true] %s6071_s16 }
  0x2c   :  { %v6570_v2 = vld [vmem:[#allocation5 + $0x3c0] sm:$0xf]  ;;  %v6315_v3 = vor.u32 %v9068_v1, %v6314_v0 }
  0x2d   :  { %v9132_v4 = vld [vmem:[#allocation5 + $0x3dc] sm:$0xf0] }
  0x2e   :  { %v6826_v5 = vld [vmem:[#allocation5 + $0x5c0] sm:$0xf]  ;;  %v6571_v7 = vor.u32 %v9132_v4, %v6570_v2  ;;  %2561 = vmatpush.bf16.msra.mxu0 %v6315_v3 }
  0x2f   :  { %v9196_v6 = vld [vmem:[#allocation5 + $0x5dc] sm:$0xf0] }
  0x30   :  { %v6827_v8 = vor.u32 %v9196_v6, %v6826_v5  ;;  %v7082_v9 = vld [vmem:[#allocation5 + $0x7c0] sm:$0xf]  ;;  %2575 = vmatpush.bf16.msra.mxu1 %v6571_v7 }
  0x31   :  { %v9260_v10 = vld [vmem:[#allocation5 + $0x7dc] sm:$0xf0] }
  0x32   :  { %v6282_v11 = vld [vmem:[#allocation5 + $0x180] sm:$0xf]  ;;  %v7083_v12 = vor.u32 %v9260_v10, %v7082_v9  ;;  %2589 = vmatpush.bf16.msra.mxu2 %v6827_v8 }
  0x33   :  { %v9060_v13 = vld [vmem:[#allocation5 + $0x19c] sm:$0xf0] }
  0x34   :  { %v6538_v14 = vld [vmem:[#allocation5 + $0x380] sm:$0xf]  ;;  %v6283_v16 = vor.u32 %v9060_v13, %v6282_v11  ;;  %2603 = vmatpush.bf16.msra.mxu3 %v7083_v12 }
  0x35   :  { %v9124_v15 = vld [vmem:[#allocation5 + $0x39c] sm:$0xf0] }
  0x36   :  { %v6539_v17 = vor.u32 %v9124_v15, %v6538_v14  ;;  %v6794_v18 = vld [vmem:[#allocation5 + $0x580] sm:$0xf]  ;;  %2562 = vmatpush.bf16.msra.mxu0 %v6283_v16 }
  0x37   :  { %v9188_v19 = vld [vmem:[#allocation5 + $0x59c] sm:$0xf0] }
  0x38   :  { %v7050_v20 = vld [vmem:[#allocation5 + $0x780] sm:$0xf]  ;;  %v6795_v21 = vor.u32 %v9188_v19, %v6794_v18  ;;  %2576 = vmatpush.bf16.msra.mxu1 %v6539_v17 }
  0x39   :  { %v9252_v22 = vld [vmem:[#allocation5 + $0x79c] sm:$0xf0] }
  0x3a   :  { %v6250_v23 = vld [vmem:[#allocation5 + $0x140] sm:$0xf]  ;;  %v7051_v25 = vor.u32 %v9252_v22, %v7050_v20  ;;  %2590 = vmatpush.bf16.msra.mxu2 %v6795_v21 }
  0x3b   :  { %v9052_v24 = vld [vmem:[#allocation5 + $0x15c] sm:$0xf0] }
  0x3c   :  { %v6506_v26 = vld [vmem:[#allocation5 + $0x340] sm:$0xf]  ;;  %v6251_v29 = vor.u32 %v9052_v24, %v6250_v23  ;;  %2604 = vmatpush.bf16.msra.mxu3 %v7051_v25 }
  0x3d   :  { %v9116_v27 = vld [vmem:[#allocation5 + $0x35c] sm:$0xf0] }
  0x3e   :  { %v6762_v28 = vld [vmem:[#allocation5 + $0x540] sm:$0xf]  ;;  %v6507_v33 = vor.u32 %v9116_v27, %v6506_v26  ;;  %2563 = vmatpush.bf16.msra.mxu0 %v6251_v29 }
  0x3f   :  { %v9180_v30 = vld [vmem:[#allocation5 + $0x55c] sm:$0xf0] }
  0x40   :  { %v7018_v31 = vld [vmem:[#allocation5 + $0x740] sm:$0xf]  ;;  %v6763_v34 = vor.u32 %v9180_v30, %v6762_v28  ;;  %2577 = vmatpush.bf16.msra.mxu1 %v6507_v33  ;;  %v6316_v33 = vld [vmem:[#allocation5 + $0x1e0] sm:$0xf0] }
  0x41   :  { %v9244_v32 = vld [vmem:[#allocation5 + $0x75c] sm:$0xf0] }
  0x42   :  { %v6218_v35 = vld [vmem:[#allocation5 + $0x100] sm:$0xf]  ;;  %v7019_v38 = vor.u32 %v9244_v32, %v7018_v31  ;;  %2591 = vmatpush.bf16.msra.mxu2 %v6763_v34  ;;  %v9064_v32 = vld [vmem:[#allocation5 + $0x1c4] sm:$0xf] }
  0x43   :  { %v9044_v36 = vld [vmem:[#allocation5 + $0x11c] sm:$0xf0] }
  0x44   :  { %v6474_v37 = vld [vmem:[#allocation5 + $0x300] sm:$0xf]  ;;  %v6219_v44 = vor.u32 %v9044_v36, %v6218_v35  ;;  %2605 = vmatpush.bf16.msra.mxu3 %v7019_v38  ;;  %v175_v36 = vld [vmem:[#allocation2 + $0x48] sm:$0xff] }
  0x45   :  { %v9108_v39 = vld [vmem:[#allocation5 + $0x31c] sm:$0xf0] }
  0x46   :  { %v6730_v40 = vld [vmem:[#allocation5 + $0x500] sm:$0xf]  ;;  %v6475_v45 = vor.u32 %v9108_v39, %v6474_v37  ;;  %2564 = vmatpush.bf16.msra.mxu0 %v6219_v44 }
  0x47   :  { %v9172_v41 = vld [vmem:[#allocation5 + $0x51c] sm:$0xf0] }
  0x48   :  { %v6986_v42 = vld [vmem:[#allocation5 + $0x700] sm:$0xf]  ;;  %v6731_v46 = vor.u32 %v9172_v41, %v6730_v40  ;;  %2578 = vmatpush.bf16.msra.mxu1 %v6475_v45  ;;  %v9128_v41 = vld [vmem:[#allocation5 + $0x3c4] sm:$0xf] }
  0x49   :  { %v9236_v43 = vld [vmem:[#allocation5 + $0x71c] sm:$0xf0] }
  0x4a   :  { %v6186_v47 = vld [vmem:[#allocation5 + $0xc0] sm:$0xf]  ;;  %v6987_v50 = vor.u32 %v9236_v43, %v6986_v42  ;;  %2592 = vmatpush.bf16.msra.mxu2 %v6731_v46  ;;  %v166_v42 = vld [vmem:[#allocation2] sm:$0xff]  ;;  %v173_v43 = vld [vmem:[#allocation2 + $0x38] sm:$0xff] }
  0x4b   :  { %v9036_v48 = vld [vmem:[#allocation5 + $0xdc] sm:$0xf0]  ;;  %v6572_v46 = vld [vmem:[#allocation5 + $0x3e0] sm:$0xf0] }
  0x4c   :  { %v6442_v49 = vld [vmem:[#allocation5 + $0x2c0] sm:$0xf]  ;;  %v6187_v56 = vor.u32 %v9036_v48, %v6186_v47  ;;  %2606 = vmatpush.bf16.msra.mxu3 %v6987_v50  ;;  %v169_v47 = vld [vmem:[#allocation2 + $0x18] sm:$0xff]  ;;  %v6319_v50 = vor.u32 %v9064_v32, %v6316_v33 }
  0x4d   :  { %v9100_v51 = vld [vmem:[#allocation5 + $0x2dc] sm:$0xf0] }
  0x4e   :  { %v6698_v52 = vld [vmem:[#allocation5 + $0x4c0] sm:$0xf]  ;;  %v6443_v57 = vor.u32 %v9100_v51, %v6442_v49  ;;  %2565 = vmatpush.bf16.msra.mxu0 %v6187_v56 }
  0x4f   :  { %v9164_v53 = vld [vmem:[#allocation5 + $0x4dc] sm:$0xf0] }
  0x50   :  { %v6954_v54 = vld [vmem:[#allocation5 + $0x6c0] sm:$0xf]  ;;  %v6699_v58 = vor.u32 %v9164_v53, %v6698_v52  ;;  %2579 = vmatpush.bf16.msra.mxu1 %v6443_v57  ;;  %v9056_v57 = vld [vmem:[#allocation5 + $0x184] sm:$0xf] }
  0x51   :  { %v9228_v55 = vld [vmem:[#allocation5 + $0x6dc] sm:$0xf0] }
  0x52   :  { %v6154_v59 = vld [vmem:[#allocation5 + $0x80] sm:$0xf]  ;;  %v6955_v62 = vor.u32 %v9228_v55, %v6954_v54  ;;  %2593 = vmatpush.bf16.msra.mxu2 %v6699_v58  ;;  %v10121_v55 = vpack.c.bf16 %v173_v43, %v166_v42  ;;  %v6284_v58 = vld [vmem:[#allocation5 + $0x1a0] sm:$0xf0] }
  0x53   :  { %v9028_v60 = vld [vmem:[#allocation5 + $0x9c] sm:$0xf0] }
  0x54   :  { %v6410_v61 = vld [vmem:[#allocation5 + $0x280] sm:$0xf]  ;;  %v6155_v4 = vor.u32 %v9028_v60, %v6154_v59  ;;  %2607 = vmatpush.bf16.msra.mxu3 %v6955_v62  ;;  %v174_v62 = vld [vmem:[#allocation2 + $0x40] sm:$0xff] }
  0x55   :  { %v9092_v63 = vld [vmem:[#allocation5 + $0x29c] sm:$0xf0] }
  0x56   :  { %v6666_v0 = vld [vmem:[#allocation5 + $0x480] sm:$0xf]  ;;  %v6411_v6 = vor.u32 %v9092_v63, %v6410_v61  ;;  %2566 = vmatpush.bf16.msra.mxu0 %v6155_v4  ;;  %v167_v61 = vld [vmem:[#allocation2 + $0x8] sm:$0xff]  ;;  %v6575_v63 = vor.u32 %v9128_v41, %v6572_v46  ;;  %v6287_v4 = vor.u32 %v9056_v57, %v6284_v58  ;;  %v6444_v41 = vld [vmem:[#allocation5 + $0x2e0] sm:$0xf0] }
  0x57   :  { %v9156_v1 = vld [vmem:[#allocation5 + $0x49c] sm:$0xf0] }
  0x58   :  { %v6922_v2 = vld [vmem:[#allocation5 + $0x680] sm:$0xf]  ;;  %v6667_v7 = vor.u32 %v9156_v1, %v6666_v0  ;;  %2580 = vmatpush.bf16.msra.mxu1 %v6411_v6  ;;  %v9120_v1 = vld [vmem:[#allocation5 + $0x384] sm:$0xf] }
  0x59   :  { %v9220_v3 = vld [vmem:[#allocation5 + $0x69c] sm:$0xf0] }
  0x5a   :  { %v6122_v5 = vld [vmem:[#allocation5 + $0x40] sm:$0xf]  ;;  %v6923_v11 = vor.u32 %v9220_v3, %v6922_v2  ;;  %2594 = vmatpush.bf16.msra.mxu2 %v6667_v7  ;;  %v6540_v2 = vld [vmem:[#allocation5 + $0x3a0] sm:$0xf0] }
  0x5b   :  { %v9020_v8 = vld [vmem:[#allocation5 + $0x5c] sm:$0xf0] }
  0x5c   :  { %v6378_v9 = vld [vmem:[#allocation5 + $0x240] sm:$0xf]  ;;  %v6123_v18 = vor.u32 %v9020_v8, %v6122_v5  ;;  %2608 = vmatpush.bf16.msra.mxu3 %v6923_v11  ;;  %v10127_v8 = vpack.c.bf16 %v174_v62, %v167_v61  ;;  %v6252_v11 = vld [vmem:[#allocation5 + $0x160] sm:$0xf0] }
  0x5d   :  { %v9084_v10 = vld [vmem:[#allocation5 + $0x25c] sm:$0xf0] }
  0x5e   :  { %v6634_v12 = vld [vmem:[#allocation5 + $0x440] sm:$0xf]  ;;  %v6379_v23 = vor.u32 %v9084_v10, %v6378_v9  ;;  %2567 = vmatpush.bf16.msra.mxu0 %v6123_v18  ;;  %v9048_v10 = vld [vmem:[#allocation5 + $0x144] sm:$0xf] }
  0x5f   :  { %v9148_v13 = vld [vmem:[#allocation5 + $0x45c] sm:$0xf0] }
  0x60   :  { %v6890_v14 = vld [vmem:[#allocation5 + $0x640] sm:$0xf]  ;;  %v6635_v24 = vor.u32 %v9148_v13, %v6634_v12  ;;  %2581 = vmatpush.bf16.msra.mxu1 %v6379_v23  ;;  %v6543_v12 = vor.u32 %v9120_v1, %v6540_v2  ;;  %v6220_v23 = vld [vmem:[#allocation5 + $0x120] sm:$0xf0] }
  0x61   :  { %v9212_v15 = vld [vmem:[#allocation5 + $0x65c] sm:$0xf0]  ;;  %v6124_v1 = vld [vmem:[#allocation5 + $0x60] sm:$0xf0] }
  0x62   :  { %v6090_v16 = vld [vmem:[#allocation5] sm:$0xf]  ;;  %v6891_v28 = vor.u32 %v9212_v15, %v6890_v14  ;;  %2595 = vmatpush.bf16.msra.mxu2 %v6635_v24  ;;  %v9112_v14 = vld [vmem:[#allocation5 + $0x344] sm:$0xf] }
  0x63   :  { %v9012_v17 = vld [vmem:[#allocation5 + $0x1c] sm:$0xf0]  ;;  %v6508_v15 = vld [vmem:[#allocation5 + $0x360] sm:$0xf0] }
  0x64   :  { %v6346_v19 = vld [vmem:[#allocation5 + $0x200] sm:$0xf]  ;;  %v6091_v35 = vor.u32 %v9012_v17, %v6090_v16  ;;  %2609 = vmatpush.bf16.msra.mxu3 %v6891_v28  ;;  %v6255_v17 = vor.u32 %v9048_v10, %v6252_v11  ;;  %v6511_v24 = vor.u32 %v9112_v14, %v6508_v15  ;;  %v9080_v2 = vld [vmem:[#allocation5 + $0x244] sm:$0xf] }
  0x65   :  { %v9076_v20 = vld [vmem:[#allocation5 + $0x21c] sm:$0xf0]  ;;  %v6092_v14 = vld [vmem:[#allocation5 + $0x20] sm:$0xf0] }
  0x66   :  { %v6602_v21 = vld [vmem:[#allocation5 + $0x400] sm:$0xf]  ;;  %v6347_v39 = vor.u32 %v9076_v20, %v6346_v19  ;;  %2568 = vmatpush.bf16.msra.mxu0 %v6091_v35  ;;  %v6188_v35 = vld [vmem:[#allocation5 + $0xe0] sm:$0xf0] }
  0x67   :  { %v9140_v22 = vld [vmem:[#allocation5 + $0x41c] sm:$0xf0]  ;;  %v9192_v15 = vld [vmem:[#allocation5 + $0x5c4] sm:$0xf] }
  0x68   :  { %v6858_v25 = vld [vmem:[#allocation5 + $0x600] sm:$0xf]  ;;  %v6603_v40 = vor.u32 %v9140_v22, %v6602_v21  ;;  %2582 = vmatpush.bf16.msra.mxu1 %v6347_v39  ;;  %v9040_v22 = vld [vmem:[#allocation5 + $0x104] sm:$0xf] }
  0x69   :  { %v9204_v26 = vld [vmem:[#allocation5 + $0x61c] sm:$0xf0]  ;;  %2569 = vmatmul.bf16.vlgmr.msra.gmra.mxu0 %v10121_v55 }
  0x6a   :  { %v7338_v27 = vld [vmem:[#allocation5 + $0x9c0] sm:$0xf]  ;;  %v6859_v44 = vor.u32 %v9204_v26, %v6858_v25  ;;  %2596 = vmatpush.bf16.msra.mxu2 %v6603_v40  ;;  %v9104_v26 = vld [vmem:[#allocation5 + $0x304] sm:$0xf] }
  0x6b   :  { %v9324_v29 = vld [vmem:[#allocation5 + $0x9dc] sm:$0xf0]  ;;  %2583 = vmatmul.bf16.vlgmr.msra.gmra.mxu1 %v10127_v8  ;;  %v9096_v40 = vld [vmem:[#allocation5 + $0x2c4] sm:$0xf] }
  0x6c   :  { %v7594_v30 = vld [vmem:[#allocation5 + $0xbc0] sm:$0xf]  ;;  %v7339_v45 = vor.u32 %v9324_v29, %v7338_v27  ;;  %2610 = vmatpush.bf16.msra.mxu3 %v6859_v44  ;;  %v6476_v27 = vld [vmem:[#allocation5 + $0x320] sm:$0xf0]  ;;  %v6223_v29 = vor.u32 %v9040_v22, %v6220_v23  ;;  %v170_v23 = vld [vmem:[#allocation2 + $0x20] sm:$0xff] }
  0x6d   :  { %v9388_v31 = vld [vmem:[#allocation5 + $0xbdc] sm:$0xf0] }
  0x6e   :  { %v168_v34 = vld [vmem:[#allocation2 + $0x10] sm:$0xff]  ;;  %v7595_v49 = vor.u32 %v9388_v31, %v7594_v30  ;;  %2617 = vmatpush.bf16.msrb.mxu0 %v7339_v45 }
  0x6f   :  { %v7626_v37 = vld [vmem:[#allocation5 + $0xc00] sm:$0xf]  ;;  %v10119_v54 = vpack.c.bf16 %v175_v36, %v168_v34  ;;  %v9032_v34 = vld [vmem:[#allocation5 + $0xc4] sm:$0xf] }
  0x70   :  { %v9396_v38 = vld [vmem:[#allocation5 + $0xc1c] sm:$0xf0]  ;;  %2631 = vmatpush.bf16.msrb.mxu1 %v7595_v49  ;;  %2659 = vmatpush.bf16.msrb.mxu3 %v6319_v50  ;;  %v6191_v43 = vor.u32 %v9032_v34, %v6188_v35  ;;  %v6156_v49 = vld [vmem:[#allocation5 + $0xa0] sm:$0xf0] }
  0x71   :  { %v176_v48 = vld [vmem:[#allocation2 + $0x50] sm:$0xff]  ;;  %v7627_v59 = vor.u32 %v9396_v38, %v7626_v37  ;;  %2597 = vmatmul.bf16.vlgmr.msra.gmra.mxu2 %v10119_v54  ;;  %v179_v37 = vld [vmem:[#allocation2 + $0x68] sm:$0xff]  ;;  %v6479_v38 = vor.u32 %v9104_v26, %v6476_v27 }
  0x72   :  { %v7306_v51 = vld [vmem:[#allocation5 + $0x980] sm:$0xf]  ;;  %v10123_v60 = vpack.c.bf16 %v176_v48, %v169_v47  ;;  %v9024_v48 = vld [vmem:[#allocation5 + $0x84] sm:$0xf] }
  0x73   :  { %v9316_v52 = vld [vmem:[#allocation5 + $0x99c] sm:$0xf0]  ;;  %2652 = vmatpush.bf16.msrb.mxu2 %v7627_v59  ;;  %v6159_v58 = vor.u32 %v9024_v48, %v6156_v49  ;;  %v7596_v34 = vld [vmem:[#allocation5 + $0xbe0] sm:$0xf0] }
  0x74   :  { %v7562_v53 = vld [vmem:[#allocation5 + $0xb80] sm:$0xf]  ;;  %v7307_v0 = vor.u32 %v9316_v52, %v7306_v51  ;;  %2611 = vmatmul.bf16.vlgmr.msra.gmra.mxu3 %v10123_v60  ;;  %v6447_v51 = vor.u32 %v9096_v40, %v6444_v41  ;;  %v9184_v35 = vld [vmem:[#allocation5 + $0x584] sm:$0xf] }
  0x75   :  { %v9380_v56 = vld [vmem:[#allocation5 + $0xb9c] sm:$0xf0]  ;;  %2660 = vmatpush.bf16.msrb.mxu3 %v6287_v4  ;;  %v7052_v40 = vld [vmem:[#allocation5 + $0x7a0] sm:$0xf0] }
  0x76   :  { %v7563_v3 = vor.u32 %v9380_v56, %v7562_v53  ;;  %v7274_v5 = vld [vmem:[#allocation5 + $0x940] sm:$0xf]  ;;  %2618 = vmatpush.bf16.msrb.mxu0 %v7307_v0  ;;  %v9088_v53 = vld [vmem:[#allocation5 + $0x284] sm:$0xf] }
  0x77   :  { %v9308_v6 = vld [vmem:[#allocation5 + $0x95c] sm:$0xf0]  ;;  %2673 = vmatpush.bf16.msra.mxu2 %v6575_v63  ;;  %v6412_v56 = vld [vmem:[#allocation5 + $0x2a0] sm:$0xf0] }
  0x78   :  { %v7530_v7 = vld [vmem:[#allocation5 + $0xb40] sm:$0xf]  ;;  %v7275_v13 = vor.u32 %v9308_v6, %v7274_v5  ;;  %2632 = vmatpush.bf16.msrb.mxu1 %v7563_v3  ;;  %v9016_v0 = vld [vmem:[#allocation5 + $0x44] sm:$0xf]  ;;  %v6415_v4 = vor.u32 %v9088_v53, %v6412_v56 }
  0x79   :  { %v9372_v9 = vld [vmem:[#allocation5 + $0xb5c] sm:$0xf0]  ;;  %2661 = vmatpush.bf16.msrb.mxu3 %v6255_v17  ;;  %v6380_v3 = vld [vmem:[#allocation5 + $0x260] sm:$0xf0]  ;;  %v6127_v11 = vor.u32 %v9016_v0, %v6124_v1 }
  0x7a   :  { %v7531_v16 = vor.u32 %v9372_v9, %v7530_v7  ;;  %v7242_v18 = vld [vmem:[#allocation5 + $0x900] sm:$0xf]  ;;  %2619 = vmatpush.bf16.msrb.mxu0 %v7275_v13  ;;  %v9008_v13 = vld [vmem:[#allocation5 + $0x4] sm:$0xf] }
  0x7b   :  { %v9300_v19 = vld [vmem:[#allocation5 + $0x91c] sm:$0xf0]  ;;  %2674 = vmatpush.bf16.msra.mxu2 %v6543_v12  ;;  %v9256_v17 = vld [vmem:[#allocation5 + $0x7c4] sm:$0xf]  ;;  %v6095_v27 = vor.u32 %v9008_v13, %v6092_v14 }
  0x7c   :  { %v7498_v20 = vld [vmem:[#allocation5 + $0xb00] sm:$0xf]  ;;  %v7243_v25 = vor.u32 %v9300_v19, %v7242_v18  ;;  %2633 = vmatpush.bf16.msrb.mxu1 %v7531_v16  ;;  %v6828_v16 = vld [vmem:[#allocation5 + $0x5e0] sm:$0xf0] }
  0x7d   :  { %v9364_v21 = vld [vmem:[#allocation5 + $0xb1c] sm:$0xf0]  ;;  %2662 = vmatpush.bf16.msrb.mxu3 %v6223_v29  ;;  %v7084_v18 = vld [vmem:[#allocation5 + $0x7e0] sm:$0xf0]  ;;  %v171_v29 = vld [vmem:[#allocation2 + $0x28] sm:$0xff] }
  0x7e   :  { %v7499_v28 = vor.u32 %v9364_v21, %v7498_v20  ;;  %v7210_v30 = vld [vmem:[#allocation5 + $0x8c0] sm:$0xf]  ;;  %2620 = vmatpush.bf16.msrb.mxu0 %v7243_v25  ;;  %v9320_v19 = vld [vmem:[#allocation5 + $0x9c4] sm:$0xf]  ;;  %v6383_v21 = vor.u32 %v9080_v2, %v6380_v3 }
  0x7f   :  { %v9292_v31 = vld [vmem:[#allocation5 + $0x8dc] sm:$0xf0]  ;;  %2675 = vmatpush.bf16.msra.mxu2 %v6511_v24  ;;  %v7340_v20 = vld [vmem:[#allocation5 + $0x9e0] sm:$0xf0]  ;;  %v177_v24 = vld [vmem:[#allocation2 + $0x58] sm:$0xff] }
  0x80   :  { %v7466_v32 = vld [vmem:[#allocation5 + $0xac0] sm:$0xf]  ;;  %v7211_v39 = vor.u32 %v9292_v31, %v7210_v30  ;;  %2634 = vmatpush.bf16.msrb.mxu1 %v7499_v28  ;;  %v9072_v25 = vld [vmem:[#allocation5 + $0x204] sm:$0xf]  ;;  %v178_v30 = vld [vmem:[#allocation2 + $0x60] sm:$0xff]  ;;  %v6831_v31 = vor.u32 %v9192_v15, %v6828_v16 }
  0x81   :  { %v9356_v33 = vld [vmem:[#allocation5 + $0xadc] sm:$0xf0]  ;;  %2663 = vmatpush.bf16.msrb.mxu3 %v6191_v43  ;;  %v6348_v28 = vld [vmem:[#allocation5 + $0x220] sm:$0xf0] }
  0x82   :  { %v172_v36 = vld [vmem:[#allocation2 + $0x30] sm:$0xff]  ;;  %v7467_v42 = vor.u32 %v9356_v33, %v7466_v32  ;;  %2621 = vmatpush.bf16.msrb.mxu0 %v7211_v39  ;;  %v7087_v32 = vor.u32 %v9256_v17, %v7084_v18  ;;  %v6351_v41 = vor.u32 %v9072_v25, %v6348_v28 }
  0x83   :  { %v7178_v44 = vld [vmem:[#allocation5 + $0x880] sm:$0xf]  ;;  %v10131_v50 = vpack.c.bf16 %v179_v37, %v172_v36  ;;  %2676 = vmatpush.bf16.msra.mxu2 %v6479_v38  ;;  %v9384_v33 = vld [vmem:[#allocation5 + $0xbc4] sm:$0xf]  ;;  %v7343_v36 = vor.u32 %v9320_v19, %v7340_v20  ;;  %v10135_v37 = vpack.c.bf16 %v177_v24, %v170_v23 }
  0x84   :  { %v9284_v45 = vld [vmem:[#allocation5 + $0x89c] sm:$0xf0]  ;;  %2635 = vmatpush.bf16.msrb.mxu1 %v7467_v42  ;;  %v6796_v38 = vld [vmem:[#allocation5 + $0x5a0] sm:$0xf0]  ;;  %v10137_v42 = vpack.c.bf16 %v178_v30, %v171_v29 }
  0x85   :  { %v7434_v46 = vld [vmem:[#allocation5 + $0xa80] sm:$0xf]  ;;  %v7179_v52 = vor.u32 %v9284_v45, %v7178_v44  ;;  %7656 = vmatmul.msk.bf16.vlgmr.msrb.gmra.mxu2 %vm2557_vm0, %v10131_v50  ;;  %2664 = vmatpush.bf16.msrb.mxu3 %v6159_v58  ;;  %v9248_v39 = vld [vmem:[#allocation5 + $0x784] sm:$0xf]  ;;  %v7599_v45 = vor.u32 %v9384_v33, %v7596_v34 }
  0x86   :  { %v9348_v47 = vld [vmem:[#allocation5 + $0xa9c] sm:$0xf0]  ;;  %v9312_v43 = vld [vmem:[#allocation5 + $0x984] sm:$0xf] }
  0x87   :  { %v7435_v57 = vor.u32 %v9348_v47, %v7434_v46  ;;  %v7146_v59 = vld [vmem:[#allocation5 + $0x840] sm:$0xf]  ;;  %2677 = vmatpush.bf16.msra.mxu2 %v6447_v51  ;;  %2622 = vmatpush.bf16.msrb.mxu0 %v7179_v52  ;;  %v7308_v44 = vld [vmem:[#allocation5 + $0x9a0] sm:$0xf0]  ;;  %v6799_v46 = vor.u32 %v9184_v35, %v6796_v38  ;;  %v7055_v47 = vor.u32 %v9248_v39, %v7052_v40 }
  0x88   :  { %v9276_v61 = vld [vmem:[#allocation5 + $0x85c] sm:$0xf0]  ;;  %v9376_v48 = vld [vmem:[#allocation5 + $0xb84] sm:$0xf]  ;;  %v7311_v52 = vor.u32 %v9312_v43, %v7308_v44 }
  0x89   :  { %v7402_v62 = vld [vmem:[#allocation5 + $0xa40] sm:$0xf]  ;;  %v7147_v5 = vor.u32 %v9276_v61, %v7146_v59  ;;  %2636 = vmatpush.bf16.msrb.mxu1 %v7435_v57  ;;  %2665 = vmatpush.bf16.msrb.mxu3 %v6127_v11  ;;  %v7564_v49 = vld [vmem:[#allocation5 + $0xba0] sm:$0xf0] }
  0x8a   :  { %v9340_v63 = vld [vmem:[#allocation5 + $0xa5c] sm:$0xf0]  ;;  %v9176_v51 = vld [vmem:[#allocation5 + $0x544] sm:$0xf]  ;;  %v7567_v61 = vor.u32 %v9376_v48, %v7564_v49 }
  0x8b   :  { %v7114_v6 = vld [vmem:[#allocation5 + $0x800] sm:$0xf]  ;;  %v7403_v10 = vor.u32 %v9340_v63, %v7402_v62  ;;  %2678 = vmatpush.bf16.msra.mxu2 %v6415_v4  ;;  %2623 = vmatpush.bf16.msrb.mxu0 %v7147_v5  ;;  %v6764_v53 = vld [vmem:[#allocation5 + $0x560] sm:$0xf0] }
  0x8c   :  { %v9268_v7 = vld [vmem:[#allocation5 + $0x81c] sm:$0xf0]  ;;  %v9240_v56 = vld [vmem:[#allocation5 + $0x744] sm:$0xf]  ;;  %v6767_v62 = vor.u32 %v9176_v51, %v6764_v53 }
  0x8d   :  { %v7370_v9 = vld [vmem:[#allocation5 + $0xa00] sm:$0xf]  ;;  %v7115_v22 = vor.u32 %v9268_v7, %v7114_v6  ;;  %2637 = vmatpush.bf16.msrb.mxu1 %v7403_v10  ;;  %2666 = vmatpush.bf16.msrb.mxu3 %v6095_v27  ;;  %v7020_v57 = vld [vmem:[#allocation5 + $0x760] sm:$0xf0] }
  0x8e   :  { %v9332_v12 = vld [vmem:[#allocation5 + $0xa1c] sm:$0xf0]  ;;  %v9304_v58 = vld [vmem:[#allocation5 + $0x944] sm:$0xf]  ;;  %v7023_v63 = vor.u32 %v9240_v56, %v7020_v57 }
  0x8f   :  { %v7371_v26 = vor.u32 %v9332_v12, %v7370_v9  ;;  %2679 = vmatpush.bf16.msra.mxu2 %v6383_v21  ;;  %2624 = vmatpush.bf16.msrb.mxu0 %v7115_v22  ;;  %v7276_v59 = vld [vmem:[#allocation5 + $0x960] sm:$0xf0] }
  0x90   :  { %2667 = vmatmul.bf16.vlgmr.msrb.gmra.mxu3 %v10121_v55  ;;  %v9368_v0 = vld [vmem:[#allocation5 + $0xb44] sm:$0xf]  ;;  %v7279_v3 = vor.u32 %v9304_v58, %v7276_v59 }
  0x91   :  { %2638 = vmatpush.bf16.msrb.mxu1 %v7371_v26  ;;  %2715 = vmatpush.bf16.msra.mxu3 %v7343_v36  ;;  %v7532_v1 = vld [vmem:[#allocation5 + $0xb60] sm:$0xf0] }
  0x92   :  { %2625 = vmatmul.bf16.vlgmr.msrb.gmra.mxu0 %v10135_v37  ;;  %v9168_v2 = vld [vmem:[#allocation5 + $0x504] sm:$0xf]  ;;  %v7535_v10 = vor.u32 %v9368_v0, %v7532_v1  ;;  %v6322_v0 = vld [vmem:[#allocation5 + $0x1c8] sm:$0xf] }
  0x93   :  { %2687 = vmatpush.bf16.msra.mxu0 %v6831_v31  ;;  %2680 = vmatpush.bf16.msra.mxu2 %v6351_v41  ;;  %v6732_v4 = vld [vmem:[#allocation5 + $0x520] sm:$0xf0]  ;;  %v9069_v1 = vld [vmem:[#allocation5 + $0x1e4] sm:$0xf0] }
  0x94   :  { %2639 = vmatmul.bf16.vlgmr.msrb.gmra.mxu1 %v10137_v42  ;;  %v9232_v5 = vld [vmem:[#allocation5 + $0x704] sm:$0xf]  ;;  %v6735_v11 = vor.u32 %v9168_v2, %v6732_v4  ;;  %v6578_v2 = vld [vmem:[#allocation5 + $0x3c8] sm:$0xf] }
  0x95   :  { %2701 = vmatpush.bf16.msra.mxu1 %v7087_v32  ;;  %2716 = vmatpush.bf16.msra.mxu3 %v7311_v52  ;;  %v6988_v6 = vld [vmem:[#allocation5 + $0x720] sm:$0xf0]  ;;  %v9133_v4 = vld [vmem:[#allocation5 + $0x3e4] sm:$0xf0] }
  0x96   :  { %2681 = vmatmul.bf16.vlgmr.msra.gmra.mxu2 %v10127_v8  ;;  %v9296_v7 = vld [vmem:[#allocation5 + $0x904] sm:$0xf]  ;;  %v6991_v12 = vor.u32 %v9232_v5, %v6988_v6 }
  0x97   :  { %2729 = vmatpush.bf16.msrb.mxu2 %v7599_v45  ;;  %2688 = vmatpush.bf16.msra.mxu0 %v6799_v46  ;;  %v7244_v9 = vld [vmem:[#allocation5 + $0x920] sm:$0xf0] }
  0x98   :  { %v9360_v13 = vld [vmem:[#allocation5 + $0xb04] sm:$0xf]  ;;  %v7247_v16 = vor.u32 %v9296_v7, %v7244_v9 }
  0x99   :  { %2702 = vmatpush.bf16.msra.mxu1 %v7055_v47  ;;  %v7500_v14 = vld [vmem:[#allocation5 + $0xb20] sm:$0xf0]  ;;  %2717 = vmatpush.bf16.msra.mxu3 %v7279_v3 }
  0x9a   :  { %v9160_v15 = vld [vmem:[#allocation5 + $0x4c4] sm:$0xf]  ;;  %v7503_v22 = vor.u32 %v9360_v13, %v7500_v14  ;;  %v6323_v13 = vor.u32 %v9069_v1, %v6322_v0  ;;  %v6834_v14 = vld [vmem:[#allocation5 + $0x5c8] sm:$0xf] }
  0x9b   :  { %2730 = vmatpush.bf16.msrb.mxu2 %v7567_v61  ;;  %2689 = vmatpush.bf16.msra.mxu0 %v6767_v62  ;;  %v6700_v17 = vld [vmem:[#allocation5 + $0x4e0] sm:$0xf0]  ;;  %v9037_v0 = vld [vmem:[#allocation5 + $0xe4] sm:$0xf0] }
  0x9c   :  { %v9224_v18 = vld [vmem:[#allocation5 + $0x6c4] sm:$0xf]  ;;  %v6703_v23 = vor.u32 %v9160_v15, %v6700_v17  ;;  %v9197_v15 = vld [vmem:[#allocation5 + $0x5e4] sm:$0xf0]  ;;  %v6579_v17 = vor.u32 %v9133_v4, %v6578_v2 }
  0x9d   :  { %2703 = vmatpush.bf16.msra.mxu1 %v7023_v63  ;;  %v6956_v19 = vld [vmem:[#allocation5 + $0x6e0] sm:$0xf0]  ;;  %2718 = vmatpush.bf16.msra.mxu3 %v7247_v16  ;;  %v7090_v16 = vld [vmem:[#allocation5 + $0x7c8] sm:$0xf] }
  0x9e   :  { %v9288_v20 = vld [vmem:[#allocation5 + $0x8c4] sm:$0xf]  ;;  %v6959_v24 = vor.u32 %v9224_v18, %v6956_v19  ;;  %v9261_v19 = vld [vmem:[#allocation5 + $0x7e4] sm:$0xf0] }
  0x9f   :  { %v7212_v21 = vld [vmem:[#allocation5 + $0x8e0] sm:$0xf0]  ;;  %2731 = vmatpush.bf16.msrb.mxu2 %v7535_v10  ;;  %2690 = vmatpush.bf16.msra.mxu0 %v6735_v11  ;;  %v6450_v1 = vld [vmem:[#allocation5 + $0x2c8] sm:$0xf] }
  0xa0   :  { %v9352_v25 = vld [vmem:[#allocation5 + $0xac4] sm:$0xf]  ;;  %v7215_v28 = vor.u32 %v9288_v20, %v7212_v21  ;;  %v6290_v20 = vld [vmem:[#allocation5 + $0x188] sm:$0xf] }
  0xa1   :  { %2704 = vmatpush.bf16.msra.mxu1 %v6991_v12  ;;  %v7468_v26 = vld [vmem:[#allocation5 + $0xae0] sm:$0xf0]  ;;  %v9061_v21 = vld [vmem:[#allocation5 + $0x1a4] sm:$0xf0] }
  0xa2   :  { %v9152_v27 = vld [vmem:[#allocation5 + $0x484] sm:$0xf]  ;;  %v7471_v34 = vor.u32 %v9352_v25, %v7468_v26  ;;  %2719 = vmatpush.bf16.msra.mxu3 %v7215_v28  ;;  %v6835_v25 = vor.u32 %v9197_v15, %v6834_v14  ;;  %v7091_v26 = vor.u32 %v9261_v19, %v7090_v16  ;;  %v6802_v28 = vld [vmem:[#allocation5 + $0x588] sm:$0xf] }
  0xa3   :  { %v6668_v29 = vld [vmem:[#allocation5 + $0x4a0] sm:$0xf0]  ;;  %2732 = vmatpush.bf16.msrb.mxu2 %v7503_v22  ;;  %2691 = vmatpush.bf16.msra.mxu0 %v6703_v23  ;;  %v6546_v23 = vld [vmem:[#allocation5 + $0x388] sm:$0xf] }
  0xa4   :  { %v9216_v30 = vld [vmem:[#allocation5 + $0x684] sm:$0xf]  ;;  %v6671_v35 = vor.u32 %v9152_v27, %v6668_v29  ;;  %v6291_v27 = vor.u32 %v9061_v21, %v6290_v20  ;;  %v9189_v29 = vld [vmem:[#allocation5 + $0x5a4] sm:$0xf0] }
  0xa5   :  { %v6924_v31 = vld [vmem:[#allocation5 + $0x6a0] sm:$0xf0]  ;;  %2705 = vmatpush.bf16.msra.mxu1 %v6959_v24  ;;  %v9125_v24 = vld [vmem:[#allocation5 + $0x3a4] sm:$0xf0] }
  0xa6   :  { %v9280_v32 = vld [vmem:[#allocation5 + $0x884] sm:$0xf]  ;;  %v6927_v36 = vor.u32 %v9216_v30, %v6924_v31  ;;  %v7058_v30 = vld [vmem:[#allocation5 + $0x788] sm:$0xf]  ;;  %v6547_v31 = vor.u32 %v9125_v24, %v6546_v23 }
  0xa7   :  { %v7180_v33 = vld [vmem:[#allocation5 + $0x8a0] sm:$0xf0]  ;;  %2733 = vmatpush.bf16.msrb.mxu2 %v7471_v34  ;;  %2692 = vmatpush.bf16.msra.mxu0 %v6671_v35  ;;  %v9053_v34 = vld [vmem:[#allocation5 + $0x164] sm:$0xf0] }
  0xa8   :  { %v9344_v38 = vld [vmem:[#allocation5 + $0xa84] sm:$0xf]  ;;  %v7183_v41 = vor.u32 %v9280_v32, %v7180_v33  ;;  %v9253_v32 = vld [vmem:[#allocation5 + $0x7a4] sm:$0xf0] }
  0xa9   :  { %v7436_v39 = vld [vmem:[#allocation5 + $0xaa0] sm:$0xf0]  ;;  %2706 = vmatpush.bf16.msra.mxu1 %v6927_v36  ;;  %v6258_v33 = vld [vmem:[#allocation5 + $0x148] sm:$0xf] }
  0xaa   :  { %v9144_v40 = vld [vmem:[#allocation5 + $0x444] sm:$0xf]  ;;  %v7439_v48 = vor.u32 %v9344_v38, %v7436_v39  ;;  %2720 = vmatpush.bf16.msra.mxu3 %v7183_v41  ;;  %v6514_v35 = vld [vmem:[#allocation5 + $0x348] sm:$0xf]  ;;  %v6803_v38 = vor.u32 %v9189_v29, %v6802_v28  ;;  %v7059_v39 = vor.u32 %v9253_v32, %v7058_v30 }
  0xab   :  { %v6636_v43 = vld [vmem:[#allocation5 + $0x460] sm:$0xf0]  ;;  %v9117_v36 = vld [vmem:[#allocation5 + $0x364] sm:$0xf0] }
  0xac   :  { %v9208_v44 = vld [vmem:[#allocation5 + $0x644] sm:$0xf]  ;;  %v6639_v52 = vor.u32 %v9144_v40, %v6636_v43  ;;  %2734 = vmatpush.bf16.msrb.mxu2 %v7439_v48  ;;  %v6259_v40 = vor.u32 %v9053_v34, %v6258_v33  ;;  %v6770_v41 = vld [vmem:[#allocation5 + $0x548] sm:$0xf] }
  0xad   :  { %v6892_v45 = vld [vmem:[#allocation5 + $0x660] sm:$0xf0]  ;;  %v9181_v43 = vld [vmem:[#allocation5 + $0x564] sm:$0xf0] }
  0xae   :  { %v9272_v46 = vld [vmem:[#allocation5 + $0x844] sm:$0xf]  ;;  %v6895_v53 = vor.u32 %v9208_v44, %v6892_v45  ;;  %2693 = vmatpush.bf16.msra.mxu0 %v6639_v52  ;;  %v7026_v44 = vld [vmem:[#allocation5 + $0x748] sm:$0xf]  ;;  %v6515_v45 = vor.u32 %v9117_v36, %v6514_v35  ;;  %v6771_v52 = vor.u32 %v9181_v43, %v6770_v41 }
  0xaf   :  { %v7148_v47 = vld [vmem:[#allocation5 + $0x860] sm:$0xf0]  ;;  %v9045_v48 = vld [vmem:[#allocation5 + $0x124] sm:$0xf0] }
  0xb0   :  { %v9336_v49 = vld [vmem:[#allocation5 + $0xa44] sm:$0xf]  ;;  %v7151_v59 = vor.u32 %v9272_v46, %v7148_v47  ;;  %2707 = vmatpush.bf16.msra.mxu1 %v6895_v53  ;;  %v9245_v46 = vld [vmem:[#allocation5 + $0x764] sm:$0xf0] }
  0xb1   :  { %v7404_v51 = vld [vmem:[#allocation5 + $0xa60] sm:$0xf0]  ;;  %v6226_v47 = vld [vmem:[#allocation5 + $0x108] sm:$0xf] }
  0xb2   :  { %v9136_v56 = vld [vmem:[#allocation5 + $0x404] sm:$0xf]  ;;  %v7407_v3 = vor.u32 %v9336_v49, %v7404_v51  ;;  %2721 = vmatpush.bf16.msra.mxu3 %v7151_v59  ;;  %v6482_v49 = vld [vmem:[#allocation5 + $0x308] sm:$0xf] }
  0xb3   :  { %v6604_v57 = vld [vmem:[#allocation5 + $0x420] sm:$0xf0]  ;;  %v9109_v51 = vld [vmem:[#allocation5 + $0x324] sm:$0xf0] }
  0xb4   :  { %v9200_v58 = vld [vmem:[#allocation5 + $0x604] sm:$0xf]  ;;  %v6607_v7 = vor.u32 %v9136_v56, %v6604_v57  ;;  %2735 = vmatpush.bf16.msrb.mxu2 %v7407_v3  ;;  %v6738_v53 = vld [vmem:[#allocation5 + $0x508] sm:$0xf]  ;;  %v7027_v56 = vor.u32 %v9245_v46, %v7026_v44  ;;  %v6227_v57 = vor.u32 %v9045_v48, %v6226_v47 }
  0xb5   :  { %v6860_v61 = vld [vmem:[#allocation5 + $0x620] sm:$0xf0]  ;;  %v6994_v59 = vld [vmem:[#allocation5 + $0x708] sm:$0xf] }
  0xb6   :  { %v9264_v62 = vld [vmem:[#allocation5 + $0x804] sm:$0xf]  ;;  %v6863_v9 = vor.u32 %v9200_v58, %v6860_v61  ;;  %2694 = vmatpush.bf16.msra.mxu0 %v6607_v7  ;;  %v9173_v58 = vld [vmem:[#allocation5 + $0x524] sm:$0xf0]  ;;  %v6483_v61 = vor.u32 %v9109_v51, %v6482_v49 }
  0xb7   :  { %v7116_v63 = vld [vmem:[#allocation5 + $0x820] sm:$0xf0]  ;;  %v9101_v2 = vld [vmem:[#allocation5 + $0x2e4] sm:$0xf0]  ;;  %v6739_v3 = vor.u32 %v9173_v58, %v6738_v53  ;;  %v9065_v58 = vld [vmem:[#allocation5 + $0x1cc] sm:$0xf] }
  0xb8   :  { %v9392_v5 = vld [vmem:[#allocation5 + $0xc04] sm:$0xf]  ;;  %v7119_v12 = vor.u32 %v9264_v62, %v7116_v63  ;;  %2708 = vmatpush.bf16.msra.mxu1 %v6863_v9  ;;  %v9237_v62 = vld [vmem:[#allocation5 + $0x724] sm:$0xf0] }
  0xb9   :  { %v7628_v6 = vld [vmem:[#allocation5 + $0xc20] sm:$0xf0]  ;;  %2695 = vmatmul.bf16.vlgmr.msra.gmra.mxu0 %v10119_v54  ;;  %v6194_v63 = vld [vmem:[#allocation5 + $0xc8] sm:$0xf]  ;;  %v6995_v4 = vor.u32 %v9237_v62, %v6994_v59  ;;  %v6324_v59 = vld [vmem:[#allocation5 + $0x1e8] sm:$0xf0] }
  0xba   :  { %v9328_v10 = vld [vmem:[#allocation5 + $0xa04] sm:$0xf]  ;;  %v7631_v18 = vor.u32 %v9392_v5, %v7628_v6  ;;  %2722 = vmatpush.bf16.msra.mxu3 %v7119_v12  ;;  %v6195_v5 = vor.u32 %v9037_v0, %v6194_v63  ;;  %v6706_v6 = vld [vmem:[#allocation5 + $0x4c8] sm:$0xf] }
  0xbb   :  { %v7372_v11 = vld [vmem:[#allocation5 + $0xa20] sm:$0xf0]  ;;  %2709 = vmatmul.bf16.vlgmr.msra.gmra.mxu1 %v10123_v60  ;;  %v9165_v7 = vld [vmem:[#allocation5 + $0x4e4] sm:$0xf0] }
  0xbc   :  { %v7375_v22 = vor.u32 %v9328_v10, %v7372_v11  ;;  %2757 = vmatpush.bf16.msrb.mxu1 %v6323_v13  ;;  %2750 = vmatpush.bf16.msrb.mxu0 %v7631_v18  ;;  %v6962_v9 = vld [vmem:[#allocation5 + $0x6c8] sm:$0xf]  ;;  %v6451_v10 = vor.u32 %v9101_v2, %v6450_v1  ;;  %v6707_v16 = vor.u32 %v9165_v7, %v6706_v6 }
  0xbd   :  { %2723 = vmatmul.bf16.vlgmr.msra.gmra.mxu3 %v10135_v37  ;;  %v9229_v11 = vld [vmem:[#allocation5 + $0x6e4] sm:$0xf0]  ;;  %v6327_v6 = vor.u32 %v9065_v58, %v6324_v59 }
  0xbe   :  { %2771 = vmatpush.bf16.msrb.mxu3 %v6579_v17  ;;  %2736 = vmatpush.bf16.msrb.mxu2 %v7375_v22  ;;  %v6162_v12 = vld [vmem:[#allocation5 + $0x88] sm:$0xf]  ;;  %v6963_v17 = vor.u32 %v9229_v11, %v6962_v9  ;;  %v9129_v9 = vld [vmem:[#allocation5 + $0x3cc] sm:$0xf] }
  0xbf   :  { %v9029_v13 = vld [vmem:[#allocation5 + $0xa4] sm:$0xf0]  ;;  %v9057_v11 = vld [vmem:[#allocation5 + $0x18c] sm:$0xf] }
  0xc0   :  { %2785 = vmatpush.bf16.msra.mxu0 %v6835_v25  ;;  %2758 = vmatpush.bf16.msrb.mxu1 %v6291_v27  ;;  %v6418_v14 = vld [vmem:[#allocation5 + $0x288] sm:$0xf]  ;;  %v6163_v18 = vor.u32 %v9029_v13, %v6162_v12 }
  0xc1   :  { %2737 = vmatmul.bf16.vlgmr.msrb.gmra.mxu2 %v10137_v42  ;;  %v9093_v15 = vld [vmem:[#allocation5 + $0x2a4] sm:$0xf0] }
  0xc2   :  { %2799 = vmatpush.bf16.msra.mxu2 %v7091_v26  ;;  %2772 = vmatpush.bf16.msrb.mxu3 %v6547_v31  ;;  %v6674_v19 = vld [vmem:[#allocation5 + $0x488] sm:$0xf]  ;;  %v6419_v22 = vor.u32 %v9093_v15, %v6418_v14  ;;  %v6292_v14 = vld [vmem:[#allocation5 + $0x1a8] sm:$0xf0] }
  0xc3   :  { %v9157_v20 = vld [vmem:[#allocation5 + $0x4a4] sm:$0xf0] }
  0xc4   :  { %2786 = vmatpush.bf16.msra.mxu0 %v6803_v38  ;;  %2759 = vmatpush.bf16.msrb.mxu1 %v6259_v40  ;;  %v6930_v21 = vld [vmem:[#allocation5 + $0x688] sm:$0xf]  ;;  %v6675_v28 = vor.u32 %v9157_v20, %v6674_v19  ;;  %v6295_v20 = vor.u32 %v9057_v11, %v6292_v14  ;;  %v9089_v11 = vld [vmem:[#allocation5 + $0x28c] sm:$0xf] }
  0xc5   :  { %v9221_v23 = vld [vmem:[#allocation5 + $0x6a4] sm:$0xf0]  ;;  %v6420_v14 = vld [vmem:[#allocation5 + $0x2a8] sm:$0xf0] }
  0xc6   :  { %2800 = vmatpush.bf16.msra.mxu2 %v7059_v39  ;;  %2773 = vmatpush.bf16.msrb.mxu3 %v6515_v45  ;;  %v6130_v24 = vld [vmem:[#allocation5 + $0x48] sm:$0xf]  ;;  %v6931_v30 = vor.u32 %v9221_v23, %v6930_v21  ;;  %v6548_v23 = vld [vmem:[#allocation5 + $0x3a8] sm:$0xf0] }
  0xc7   :  { %v9021_v25 = vld [vmem:[#allocation5 + $0x64] sm:$0xf0] }
  0xc8   :  { %2787 = vmatpush.bf16.msra.mxu0 %v6771_v52  ;;  %2760 = vmatpush.bf16.msrb.mxu1 %v6227_v57  ;;  %v6386_v26 = vld [vmem:[#allocation5 + $0x248] sm:$0xf]  ;;  %v6131_v31 = vor.u32 %v9021_v25, %v6130_v24  ;;  %v9049_v24 = vld [vmem:[#allocation5 + $0x14c] sm:$0xf] }
  0xc9   :  { %7657 = vmatmul.msk.bf16.vlgmr.msrb.gmra.mxu0 %vm2557_vm0, %v10131_v50  ;;  %v9085_v27 = vld [vmem:[#allocation5 + $0x264] sm:$0xf0] }
  0xca   :  { %2801 = vmatpush.bf16.msra.mxu2 %v7027_v56  ;;  %2774 = vmatpush.bf16.msrb.mxu3 %v6483_v61  ;;  %v6642_v29 = vld [vmem:[#allocation5 + $0x448] sm:$0xf]  ;;  %v6387_v35 = vor.u32 %v9085_v27, %v6386_v26  ;;  %v6260_v26 = vld [vmem:[#allocation5 + $0x168] sm:$0xf0] }
  0xcb   :  { %v9149_v32 = vld [vmem:[#allocation5 + $0x464] sm:$0xf0] }
  0xcc   :  { %2788 = vmatpush.bf16.msra.mxu0 %v6739_v3  ;;  %2761 = vmatpush.bf16.msrb.mxu1 %v6195_v5  ;;  %v6898_v33 = vld [vmem:[#allocation5 + $0x648] sm:$0xf]  ;;  %v6643_v44 = vor.u32 %v9149_v32, %v6642_v29  ;;  %v6263_v32 = vor.u32 %v9049_v24, %v6260_v26  ;;  %v6423_v24 = vor.u32 %v9089_v11, %v6420_v14  ;;  %v7092_v26 = vld [vmem:[#allocation5 + $0x7e8] sm:$0xf0] }
  0xcd   :  { %v9213_v34 = vld [vmem:[#allocation5 + $0x664] sm:$0xf0]  ;;  %v6740_v11 = vld [vmem:[#allocation5 + $0x528] sm:$0xf0] }
  0xce   :  { %2802 = vmatpush.bf16.msra.mxu2 %v6995_v4  ;;  %2775 = vmatpush.bf16.msrb.mxu3 %v6451_v10  ;;  %v6098_v36 = vld [vmem:[#allocation5 + $0x8] sm:$0xf]  ;;  %v6899_v47 = vor.u32 %v9213_v34, %v6898_v33  ;;  %v6580_v10 = vld [vmem:[#allocation5 + $0x3e8] sm:$0xf0] }
  0xcf   :  { %v9013_v38 = vld [vmem:[#allocation5 + $0x24] sm:$0xf0]  ;;  %v6583_v19 = vor.u32 %v9129_v9, %v6580_v10  ;;  %v9113_v34 = vld [vmem:[#allocation5 + $0x34c] sm:$0xf] }
  0xd0   :  { %2789 = vmatpush.bf16.msra.mxu0 %v6707_v16  ;;  %2762 = vmatpush.bf16.msrb.mxu1 %v6163_v18  ;;  %v6354_v39 = vld [vmem:[#allocation5 + $0x208] sm:$0xf]  ;;  %v6099_v48 = vor.u32 %v9013_v38, %v6098_v36  ;;  %v9041_v36 = vld [vmem:[#allocation5 + $0x10c] sm:$0xf] }
  0xd1   :  { %v9077_v40 = vld [vmem:[#allocation5 + $0x224] sm:$0xf0] }
  0xd2   :  { %2803 = vmatpush.bf16.msra.mxu2 %v6963_v17  ;;  %2776 = vmatpush.bf16.msrb.mxu3 %v6419_v22  ;;  %v7346_v41 = vld [vmem:[#allocation5 + $0x9c8] sm:$0xf]  ;;  %v6355_v53 = vor.u32 %v9077_v40, %v6354_v39  ;;  %v9121_v22 = vld [vmem:[#allocation5 + $0x38c] sm:$0xf] }
  0xd3   :  { %v9325_v43 = vld [vmem:[#allocation5 + $0x9e4] sm:$0xf0]  ;;  %v6228_v39 = vld [vmem:[#allocation5 + $0x128] sm:$0xf0] }
  0xd4   :  { %2790 = vmatpush.bf16.msra.mxu0 %v6675_v28  ;;  %v7602_v45 = vld [vmem:[#allocation5 + $0xbc8] sm:$0xf]  ;;  %2763 = vmatpush.bf16.msrb.mxu1 %v6131_v31  ;;  %v7347_v56 = vor.u32 %v9325_v43, %v7346_v41  ;;  %v6551_v31 = vor.u32 %v9121_v22, %v6548_v23  ;;  %v9193_v22 = vld [vmem:[#allocation5 + $0x5cc] sm:$0xf] }
  0xd5   :  { %v9389_v46 = vld [vmem:[#allocation5 + $0xbe4] sm:$0xf0]  ;;  %v6836_v23 = vld [vmem:[#allocation5 + $0x5e8] sm:$0xf0] }
  0xd6   :  { %2804 = vmatpush.bf16.msra.mxu2 %v6931_v30  ;;  %v6610_v49 = vld [vmem:[#allocation5 + $0x408] sm:$0xf]  ;;  %2777 = vmatpush.bf16.msrb.mxu3 %v6387_v35  ;;  %v7603_v61 = vor.u32 %v9389_v46, %v7602_v45  ;;  %v6516_v35 = vld [vmem:[#allocation5 + $0x368] sm:$0xf0]  ;;  %v6231_v46 = vor.u32 %v9041_v36, %v6228_v39 }
  0xd7   :  { %v9141_v51 = vld [vmem:[#allocation5 + $0x424] sm:$0xf0]  ;;  %v6519_v45 = vor.u32 %v9113_v34, %v6516_v35  ;;  %v6100_v34 = vld [vmem:[#allocation5 + $0x28] sm:$0xf0] }
  0xd8   :  { %v6866_v52 = vld [vmem:[#allocation5 + $0x608] sm:$0xf]  ;;  %2791 = vmatpush.bf16.msra.mxu0 %v6643_v44  ;;  %v6611_v1 = vor.u32 %v9141_v51, %v6610_v49  ;;  %2764 = vmatpush.bf16.msrb.mxu1 %v6099_v48  ;;  %v9105_v48 = vld [vmem:[#allocation5 + $0x30c] sm:$0xf] }
  0xd9   :  { %v9205_v57 = vld [vmem:[#allocation5 + $0x624] sm:$0xf0]  ;;  %v6484_v49 = vld [vmem:[#allocation5 + $0x328] sm:$0xf0] }
  0xda   :  { %v7314_v62 = vld [vmem:[#allocation5 + $0x988] sm:$0xf]  ;;  %2805 = vmatpush.bf16.msra.mxu2 %v6899_v47  ;;  %v6867_v5 = vor.u32 %v9205_v57, %v6866_v52  ;;  %2778 = vmatpush.bf16.msrb.mxu3 %v6355_v53  ;;  %v9033_v51 = vld [vmem:[#allocation5 + $0xcc] sm:$0xf] }
  0xdb   :  { %v9317_v63 = vld [vmem:[#allocation5 + $0x9a4] sm:$0xf0]  ;;  %2765 = vmatmul.bf16.vlgmr.msrb.gmra.mxu1 %v10121_v55  ;;  %v6196_v53 = vld [vmem:[#allocation5 + $0xe8] sm:$0xf0] }
  0xdc   :  { %v7570_v0 = vld [vmem:[#allocation5 + $0xb88] sm:$0xf]  ;;  %2813 = vmatpush.bf16.msra.mxu1 %v7347_v56  ;;  %v7315_v7 = vor.u32 %v9317_v63, %v7314_v62  ;;  %2792 = vmatpush.bf16.msra.mxu0 %v6611_v1  ;;  %v6199_v62 = vor.u32 %v9033_v51, %v6196_v53  ;;  %v6452_v1 = vld [vmem:[#allocation5 + $0x2e8] sm:$0xf0] }
  0xdd   :  { %v9381_v2 = vld [vmem:[#allocation5 + $0xba4] sm:$0xf0]  ;;  %2779 = vmatmul.bf16.vlgmr.msrb.gmra.mxu3 %v10127_v8  ;;  %v9321_v35 = vld [vmem:[#allocation5 + $0x9cc] sm:$0xf] }
  0xde   :  { %v7634_v3 = vld [vmem:[#allocation5 + $0xc08] sm:$0xf]  ;;  %2827 = vmatpush.bf16.msra.mxu3 %v7603_v61  ;;  %v7571_v12 = vor.u32 %v9381_v2, %v7570_v0  ;;  %2806 = vmatpush.bf16.msra.mxu2 %v6867_v5  ;;  %v6487_v61 = vor.u32 %v9105_v48, %v6484_v49  ;;  %v9097_v0 = vld [vmem:[#allocation5 + $0x2cc] sm:$0xf] }
  0xdf   :  { %v9397_v4 = vld [vmem:[#allocation5 + $0xc24] sm:$0xf0]  ;;  %2793 = vmatmul.bf16.vlgmr.msra.gmra.mxu0 %v10119_v54  ;;  %v9025_v2 = vld [vmem:[#allocation5 + $0x8c] sm:$0xf]  ;;  %v6455_v10 = vor.u32 %v9097_v0, %v6452_v1 }
  0xe0   :  { %v7635_v13 = vor.u32 %v9397_v4, %v7634_v3  ;;  %v7282_v15 = vld [vmem:[#allocation5 + $0x948] sm:$0xf]  ;;  %2814 = vmatpush.bf16.msra.mxu1 %v7315_v7  ;;  %v6164_v4 = vld [vmem:[#allocation5 + $0xa8] sm:$0xf0] }
  0xe1   :  { %v9309_v16 = vld [vmem:[#allocation5 + $0x964] sm:$0xf0]  ;;  %2807 = vmatmul.bf16.vlgmr.msra.gmra.mxu2 %v10123_v60  ;;  %v9185_v39 = vld [vmem:[#allocation5 + $0x58c] sm:$0xf] }
  0xe2   :  { %v7538_v17 = vld [vmem:[#allocation5 + $0xb48] sm:$0xf]  ;;  %2855 = vmatpush.bf16.msrb.mxu2 %v6327_v6  ;;  %v7283_v21 = vor.u32 %v9309_v16, %v7282_v15  ;;  %2828 = vmatpush.bf16.msra.mxu3 %v7571_v12  ;;  %v6167_v12 = vor.u32 %v9025_v2, %v6164_v4  ;;  %v9017_v15 = vld [vmem:[#allocation5 + $0x4c] sm:$0xf] }
  0xe3   :  { %v9373_v18 = vld [vmem:[#allocation5 + $0xb64] sm:$0xf0]  ;;  %2848 = vmatpush.bf16.msrb.mxu0 %v7635_v13  ;;  %v6132_v16 = vld [vmem:[#allocation5 + $0x68] sm:$0xf0] }
  0xe4   :  { %v7539_v25 = vor.u32 %v9373_v18, %v7538_v17  ;;  %v7250_v27 = vld [vmem:[#allocation5 + $0x908] sm:$0xf]  ;;  %2815 = vmatpush.bf16.msra.mxu1 %v7283_v21  ;;  %v9385_v51 = vld [vmem:[#allocation5 + $0xbcc] sm:$0xf] }
  0xe5   :  { %v9301_v28 = vld [vmem:[#allocation5 + $0x924] sm:$0xf0]  ;;  %v9313_v53 = vld [vmem:[#allocation5 + $0x98c] sm:$0xf] }
  0xe6   :  { %v7506_v29 = vld [vmem:[#allocation5 + $0xb08] sm:$0xf]  ;;  %2856 = vmatpush.bf16.msrb.mxu2 %v6295_v20  ;;  %v7251_v33 = vor.u32 %v9301_v28, %v7250_v27  ;;  %2829 = vmatpush.bf16.msra.mxu3 %v7539_v25  ;;  %v9257_v25 = vld [vmem:[#allocation5 + $0x7cc] sm:$0xf]  ;;  %v6135_v27 = vor.u32 %v9017_v15, %v6132_v16 }
  0xe7   :  { %v9365_v30 = vld [vmem:[#allocation5 + $0xb24] sm:$0xf0]  ;;  %2869 = vmatpush.bf16.msra.mxu0 %v6583_v19  ;;  %v7095_v36 = vor.u32 %v9257_v25, %v7092_v26  ;;  %v9377_v1 = vld [vmem:[#allocation5 + $0xb8c] sm:$0xf]  ;;  %v2570_v25 = vpop.f32.mrf.mxu0 }
  0xe8   :  { %v7507_v38 = vor.u32 %v9365_v30, %v7506_v29  ;;  %v7218_v40 = vld [vmem:[#allocation5 + $0x8c8] sm:$0xf]  ;;  %2816 = vmatpush.bf16.msra.mxu1 %v7251_v33  ;;  %v9081_v29 = vld [vmem:[#allocation5 + $0x24c] sm:$0xf] }
  0xe9   :  { %v9293_v41 = vld [vmem:[#allocation5 + $0x8e4] sm:$0xf0]  ;;  %v6388_v30 = vld [vmem:[#allocation5 + $0x268] sm:$0xf0] }
  0xea   :  { %v7474_v43 = vld [vmem:[#allocation5 + $0xac8] sm:$0xf]  ;;  %2857 = vmatpush.bf16.msrb.mxu2 %v6263_v32  ;;  %v7219_v47 = vor.u32 %v9293_v41, %v7218_v40  ;;  %2830 = vmatpush.bf16.msra.mxu3 %v7507_v38  ;;  %v6839_v32 = vor.u32 %v9193_v22, %v6836_v23  ;;  %v9009_v33 = vld [vmem:[#allocation5 + $0xc] sm:$0xf]  ;;  %v6391_v41 = vor.u32 %v9081_v29, %v6388_v30 }
  0xeb   :  { %v9357_v44 = vld [vmem:[#allocation5 + $0xae4] sm:$0xf0]  ;;  %2870 = vmatpush.bf16.msra.mxu0 %v6551_v31  ;;  %v7348_v38 = vld [vmem:[#allocation5 + $0x9e8] sm:$0xf0] }
  0xec   :  { %v7475_v52 = vor.u32 %v9357_v44, %v7474_v43  ;;  %v7186_v56 = vld [vmem:[#allocation5 + $0x888] sm:$0xf]  ;;  %2817 = vmatpush.bf16.msra.mxu1 %v7219_v47  ;;  %v6804_v40 = vld [vmem:[#allocation5 + $0x5a8] sm:$0xf0]  ;;  %v7351_v48 = vor.u32 %v9321_v35, %v7348_v38 }
  0xed   :  { %v9285_v57 = vld [vmem:[#allocation5 + $0x8a4] sm:$0xf0]  ;;  %v9249_v43 = vld [vmem:[#allocation5 + $0x78c] sm:$0xf]  ;;  %v6807_v49 = vor.u32 %v9185_v39, %v6804_v40  ;;  %v2584_v40 = vpop.f32.mrf.mxu1 }
  0xee   :  { %v7442_v58 = vld [vmem:[#allocation5 + $0xa88] sm:$0xf]  ;;  %2858 = vmatpush.bf16.msrb.mxu2 %v6231_v46  ;;  %v7187_v63 = vor.u32 %v9285_v57, %v7186_v56  ;;  %2831 = vmatpush.bf16.msra.mxu3 %v7475_v52  ;;  %v7060_v44 = vld [vmem:[#allocation5 + $0x7a8] sm:$0xf0] }
  0xef   :  { %v9349_v59 = vld [vmem:[#allocation5 + $0xaa4] sm:$0xf0]  ;;  %2871 = vmatpush.bf16.msra.mxu0 %v6519_v45  ;;  %v6103_v45 = vor.u32 %v9009_v33, %v6100_v34  ;;  %v9073_v46 = vld [vmem:[#allocation5 + $0x20c] sm:$0xf]  ;;  %v7063_v56 = vor.u32 %v9249_v43, %v7060_v44 }
  0xf0   :  { %v7443_v3 = vor.u32 %v9349_v59, %v7442_v58  ;;  %v7154_v5 = vld [vmem:[#allocation5 + $0x848] sm:$0xf]  ;;  %2818 = vmatpush.bf16.msra.mxu1 %v7187_v63  ;;  %7658 = vmatmul.msk.bf16.vlgmr.msrb.gmra.mxu0 %vm2557_vm0, %v10131_v50  ;;  %v6356_v47 = vld [vmem:[#allocation5 + $0x228] sm:$0xf0] }
  0xf1   :  { %v9277_v6 = vld [vmem:[#allocation5 + $0x864] sm:$0xf0]  ;;  %v7604_v52 = vld [vmem:[#allocation5 + $0xbe8] sm:$0xf0] }
  0xf2   :  { %v7410_v7 = vld [vmem:[#allocation5 + $0xa48] sm:$0xf]  ;;  %2859 = vmatpush.bf16.msrb.mxu2 %v6199_v62  ;;  %v7155_v13 = vor.u32 %v9277_v6, %v7154_v5  ;;  %2832 = vmatpush.bf16.msra.mxu3 %v7443_v3  ;;  %v7316_v57 = vld [vmem:[#allocation5 + $0x9a8] sm:$0xf0]  ;;  %v7607_v0 = vor.u32 %v9385_v51, %v7604_v52  ;;  %v10157_v6 = vld [vmem:[#allocation7] sm:$0xff] }
  0xf3   :  { %v9341_v9 = vld [vmem:[#allocation5 + $0xa64] sm:$0xf0]  ;;  %2872 = vmatpush.bf16.msra.mxu0 %v6487_v61  ;;  %v9177_v58 = vld [vmem:[#allocation5 + $0x54c] sm:$0xf]  ;;  %v6359_v61 = vor.u32 %v9073_v46, %v6356_v47  ;;  %v7319_v2 = vor.u32 %v9313_v53, %v7316_v57  ;;  %v10513_v15 = vperm.slane %v10157_v6, 0 }
  0xf4   :  { %v7411_v17 = vor.u32 %v9341_v9, %v7410_v7  ;;  %v7122_v18 = vld [vmem:[#allocation5 + $0x808] sm:$0xf]  ;;  %2819 = vmatpush.bf16.msra.mxu1 %v7155_v13  ;;  %v6772_v59 = vld [vmem:[#allocation5 + $0x568] sm:$0xf0]  ;;  %v2598_v46 = vpop.f32.mrf.mxu2 }
  0xf5   :  { %v9269_v19 = vld [vmem:[#allocation5 + $0x824] sm:$0xf0]  ;;  %v9241_v62 = vld [vmem:[#allocation5 + $0x74c] sm:$0xf]  ;;  %v6775_v3 = vor.u32 %v9177_v58, %v6772_v59 }
  0xf6   :  { %v7378_v20 = vld [vmem:[#allocation5 + $0xa08] sm:$0xf]  ;;  %2860 = vmatpush.bf16.msrb.mxu2 %v6167_v12  ;;  %v7123_v28 = vor.u32 %v9269_v19, %v7122_v18  ;;  %2833 = vmatpush.bf16.msra.mxu3 %v7411_v17  ;;  %v7028_v63 = vld [vmem:[#allocation5 + $0x768] sm:$0xf0] }
  0xf7   :  { %v9333_v21 = vld [vmem:[#allocation5 + $0xa24] sm:$0xf0]  ;;  %2873 = vmatpush.bf16.msra.mxu0 %v6455_v10  ;;  %v7572_v4 = vld [vmem:[#allocation5 + $0xba8] sm:$0xf0]  ;;  %v7031_v7 = vor.u32 %v9241_v62, %v7028_v63 }
  0xf8   :  { %v7379_v31 = vor.u32 %v9333_v21, %v7378_v20  ;;  %2820 = vmatpush.bf16.msra.mxu1 %v7123_v28  ;;  %v9305_v5 = vld [vmem:[#allocation5 + $0x94c] sm:$0xf]  ;;  %v7575_v14 = vor.u32 %v9377_v1, %v7572_v4  ;;  %v2571_v28 = vadd.f32 %v2570_v25, %v10513_v15  ;;  %v9323_v15 = vld [vmem:[#allocation5 + $0x9dc] sm:$0xf] }
  0xf9   :  { %v7284_v9 = vld [vmem:[#allocation5 + $0x968] sm:$0xf0] }
  0xfa   :  { %2861 = vmatpush.bf16.msrb.mxu2 %v6135_v27  ;;  %2834 = vmatpush.bf16.msra.mxu3 %v7379_v31  ;;  %v9169_v10 = vld [vmem:[#allocation5 + $0x50c] sm:$0xf]  ;;  %v7287_v16 = vor.u32 %v9305_v5, %v7284_v9  ;;  %v2585_v44 = vadd.f32 %v2584_v40, %v2571_v28 }
  0xfb   :  { %2874 = vmatpush.bf16.msra.mxu0 %v6423_v24  ;;  %2821 = vmatmul.bf16.vlgmr.msra.gmra.mxu1 %v10135_v37  ;;  %v9233_v12 = vld [vmem:[#allocation5 + $0x70c] sm:$0xf]  ;;  %v6743_v17 = vor.u32 %v9169_v10, %v6740_v11 }
  0xfc   :  { %2883 = vmatpush.bf16.msrb.mxu1 %v6839_v32  ;;  %v6996_v13 = vld [vmem:[#allocation5 + $0x728] sm:$0xf0]  ;;  %v2599_v53 = vadd.f32 %v2598_v46, %v2585_v44  ;;  %v9198_v46 = vld [vmem:[#allocation5 + $0x5ec] sm:$0xf0] }
  0xfd   :  { %2835 = vmatmul.bf16.vlgmr.msra.gmra.mxu3 %v10137_v42  ;;  %v9369_v18 = vld [vmem:[#allocation5 + $0xb4c] sm:$0xf]  ;;  %v6999_v21 = vor.u32 %v9233_v12, %v6996_v13 }
  0xfe   :  { %2897 = vmatpush.bf16.msrb.mxu3 %v7095_v36  ;;  %2862 = vmatpush.bf16.msrb.mxu2 %v6103_v45  ;;  %v7540_v19 = vld [vmem:[#allocation5 + $0xb68] sm:$0xf0] }
  0xff   :  { %2875 = vmatpush.bf16.msra.mxu0 %v6391_v41  ;;  %v9297_v20 = vld [vmem:[#allocation5 + $0x90c] sm:$0xf]  ;;  %v7543_v29 = vor.u32 %v9369_v18, %v7540_v19  ;;  %v6330_v19 = vld [vmem:[#allocation5 + $0x1d0] sm:$0xf] }
 0x100   :  { %2884 = vmatpush.bf16.msrb.mxu1 %v6807_v49  ;;  %v7252_v22 = vld [vmem:[#allocation5 + $0x928] sm:$0xf0] }
 0x101   :  { %2863 = vmatmul.bf16.vlgmr.msrb.gmra.mxu2 %v10121_v55  ;;  %v9161_v23 = vld [vmem:[#allocation5 + $0x4cc] sm:$0xf]  ;;  %v7255_v30 = vor.u32 %v9297_v20, %v7252_v22  ;;  %v9070_v20 = vld [vmem:[#allocation5 + $0x1ec] sm:$0xf0] }
 0x102   :  { %2911 = vmatpush.bf16.msra.mxu2 %v7351_v48  ;;  %2898 = vmatpush.bf16.msrb.mxu3 %v7063_v56  ;;  %v6708_v24 = vld [vmem:[#allocation5 + $0x4e8] sm:$0xf0]  ;;  %v2612_v56 = vpop.f32.mrf.mxu3 }
 0x103   :  { %2876 = vmatpush.bf16.msra.mxu0 %v6359_v61  ;;  %v9225_v26 = vld [vmem:[#allocation5 + $0x6cc] sm:$0xf]  ;;  %v6711_v31 = vor.u32 %v9161_v23, %v6708_v24 }
 0x104   :  { %2885 = vmatpush.bf16.msrb.mxu1 %v6775_v3  ;;  %v6964_v27 = vld [vmem:[#allocation5 + $0x6e8] sm:$0xf0] }
 0x105   :  { %v9361_v32 = vld [vmem:[#allocation5 + $0xb0c] sm:$0xf]  ;;  %v6967_v35 = vor.u32 %v9225_v26, %v6964_v27 }
 0x106   :  { %2912 = vmatpush.bf16.msra.mxu2 %v7319_v2  ;;  %2899 = vmatpush.bf16.msrb.mxu3 %v7031_v7  ;;  %v7508_v33 = vld [vmem:[#allocation5 + $0xb28] sm:$0xf0] }
 0x107   :  { %2925 = vmatpush.bf16.msrb.mxu0 %v7607_v0  ;;  %v9289_v34 = vld [vmem:[#allocation5 + $0x8cc] sm:$0xf]  ;;  %v7511_v45 = vor.u32 %v9361_v32, %v7508_v33  ;;  %v10164_v0 = vadd.f32 %v2612_v56, %v2599_v53  ;;  %v9126_v32 = vld [vmem:[#allocation5 + $0x3ac] sm:$0xf0]  ;;  %v10168_v53 = vpop.f32.mrf.mxu0 }
 0x108   :  { %2877 = vmatmul.bf16.vlgmr.msra.gmra.mxu0 %v10127_v8  ;;  %2886 = vmatpush.bf16.msrb.mxu1 %v6743_v17  ;;  %v7220_v36 = vld [vmem:[#allocation5 + $0x8e8] sm:$0xf0]  ;;  %v9134_v17 = vld [vmem:[#allocation5 + $0x3ec] sm:$0xf0] }
 0x109   :  { %v9153_v38 = vld [vmem:[#allocation5 + $0x48c] sm:$0xf]  ;;  %v7223_v47 = vor.u32 %v9289_v34, %v7220_v36  ;;  %v6298_v36 = vld [vmem:[#allocation5 + $0x190] sm:$0xf] }
 0x10a   :  { %2913 = vmatpush.bf16.msra.mxu2 %v7287_v16  ;;  %2900 = vmatpush.bf16.msrb.mxu3 %v6999_v21  ;;  %v6676_v39 = vld [vmem:[#allocation5 + $0x4a8] sm:$0xf0]  ;;  %v6586_v16 = vld [vmem:[#allocation5 + $0x3d0] sm:$0xf]  ;;  %v10166_v21 = vpop.f32.mrf.mxu2 }
 0x10b   :  { %2926 = vmatpush.bf16.msrb.mxu0 %v7575_v14  ;;  %v9217_v41 = vld [vmem:[#allocation5 + $0x68c] sm:$0xf]  ;;  %v6679_v48 = vor.u32 %v9153_v38, %v6676_v39  ;;  %v6587_v27 = vor.u32 %v9134_v17, %v6586_v16  ;;  %v9062_v38 = vld [vmem:[#allocation5 + $0x1ac] sm:$0xf0] }
 0x10c   :  { %v6932_v43 = vld [vmem:[#allocation5 + $0x6a8] sm:$0xf0]  ;;  %2887 = vmatpush.bf16.msrb.mxu1 %v6711_v31  ;;  %v6331_v31 = vor.u32 %v9070_v20, %v6330_v19  ;;  %v6778_v16 = vld [vmem:[#allocation5 + $0x550] sm:$0xf] }
 0x10d   :  { %v9353_v49 = vld [vmem:[#allocation5 + $0xacc] sm:$0xf]  ;;  %v6935_v57 = vor.u32 %v9217_v41, %v6932_v43  ;;  %v6842_v43 = vld [vmem:[#allocation5 + $0x5d0] sm:$0xf] }
 0x10e   :  { %2914 = vmatpush.bf16.msra.mxu2 %v7255_v30  ;;  %v7476_v51 = vld [vmem:[#allocation5 + $0xae8] sm:$0xf0]  ;;  %2901 = vmatpush.bf16.msrb.mxu3 %v6967_v35  ;;  %v6554_v30 = vld [vmem:[#allocation5 + $0x390] sm:$0xf] }
 0x10f   :  { %2927 = vmatpush.bf16.msrb.mxu0 %v7543_v29  ;;  %v9281_v52 = vld [vmem:[#allocation5 + $0x88c] sm:$0xf]  ;;  %v7479_v1 = vor.u32 %v9353_v49, %v7476_v51  ;;  %v6555_v44 = vor.u32 %v9126_v32, %v6554_v30  ;;  %v6299_v49 = vor.u32 %v9062_v38, %v6298_v36  ;;  %v6522_v51 = vld [vmem:[#allocation5 + $0x350] sm:$0xf] }
 0x110   :  { %v7188_v58 = vld [vmem:[#allocation5 + $0x8a8] sm:$0xf0]  ;;  %2888 = vmatpush.bf16.msrb.mxu1 %v6679_v48  ;;  %v9262_v48 = vld [vmem:[#allocation5 + $0x7ec] sm:$0xf0] }
 0x111   :  { %v9145_v59 = vld [vmem:[#allocation5 + $0x44c] sm:$0xf]  ;;  %v7191_v3 = vor.u32 %v9281_v52, %v7188_v58  ;;  %v9118_v52 = vld [vmem:[#allocation5 + $0x36c] sm:$0xf0] }
 0x112   :  { %v6644_v61 = vld [vmem:[#allocation5 + $0x468] sm:$0xf0]  ;;  %2915 = vmatpush.bf16.msra.mxu2 %v7223_v47  ;;  %2902 = vmatpush.bf16.msrb.mxu3 %v6935_v57  ;;  %v7098_v47 = vld [vmem:[#allocation5 + $0x7d0] sm:$0xf] }
 0x113   :  { %v9209_v62 = vld [vmem:[#allocation5 + $0x64c] sm:$0xf]  ;;  %2928 = vmatpush.bf16.msrb.mxu0 %v7511_v45  ;;  %v6647_v4 = vor.u32 %v9145_v59, %v6644_v61  ;;  %v6266_v57 = vld [vmem:[#allocation5 + $0x150] sm:$0xf]  ;;  %v10171_v59 = vpop.f32.mrf.mxu1  ;;  %v6843_v61 = vor.u32 %v9198_v46, %v6842_v43 }
 0x114   :  { %v6900_v63 = vld [vmem:[#allocation5 + $0x668] sm:$0xf0]  ;;  %v9054_v58 = vld [vmem:[#allocation5 + $0x16c] sm:$0xf0] }
 0x115   :  { %v9345_v2 = vld [vmem:[#allocation5 + $0xa8c] sm:$0xf]  ;;  %v6903_v10 = vor.u32 %v9209_v62, %v6900_v63  ;;  %2889 = vmatpush.bf16.msrb.mxu1 %v6647_v4  ;;  %v7099_v62 = vor.u32 %v9262_v48, %v7098_v47  ;;  %v2654_v63 = vpop.f32.mrf.mxu2  ;;  %v7066_v4 = vld [vmem:[#allocation5 + $0x790] sm:$0xf] }
 0x116   :  { %v7444_v5 = vld [vmem:[#allocation5 + $0xaa8] sm:$0xf0]  ;;  %2916 = vmatpush.bf16.msra.mxu2 %v7191_v3  ;;  %v9190_v3 = vld [vmem:[#allocation5 + $0x5ac] sm:$0xf0] }
 0x117   :  { %v9273_v7 = vld [vmem:[#allocation5 + $0x84c] sm:$0xf]  ;;  %2929 = vmatpush.bf16.msrb.mxu0 %v7479_v1  ;;  %v7447_v18 = vor.u32 %v9345_v2, %v7444_v5  ;;  %2903 = vmatpush.bf16.msrb.mxu3 %v6903_v10  ;;  %v6810_v1 = vld [vmem:[#allocation5 + $0x590] sm:$0xf]  ;;  %v6523_v2 = vor.u32 %v9118_v52, %v6522_v51  ;;  %v10512_v51 = vperm.slane %v10157_v6, 1 }
 0x118   :  { %v7156_v9 = vld [vmem:[#allocation5 + $0x868] sm:$0xf0]  ;;  %v9254_v5 = vld [vmem:[#allocation5 + $0x7ac] sm:$0xf0] }
 0x119   :  { %v9137_v11 = vld [vmem:[#allocation5 + $0x40c] sm:$0xf]  ;;  %v7159_v22 = vor.u32 %v9273_v7, %v7156_v9  ;;  %v6267_v7 = vor.u32 %v9054_v58, %v6266_v57  ;;  %v6490_v9 = vld [vmem:[#allocation5 + $0x310] sm:$0xf] }
 0x11a   :  { %v6612_v12 = vld [vmem:[#allocation5 + $0x428] sm:$0xf0]  ;;  %v9110_v10 = vld [vmem:[#allocation5 + $0x32c] sm:$0xf0] }
 0x11b   :  { %v9201_v13 = vld [vmem:[#allocation5 + $0x60c] sm:$0xf]  ;;  %v6615_v23 = vor.u32 %v9137_v11, %v6612_v12  ;;  %2930 = vmatpush.bf16.msrb.mxu0 %v7447_v18  ;;  %2917 = vmatpush.bf16.msra.mxu2 %v7159_v22  ;;  %v6234_v11 = vld [vmem:[#allocation5 + $0x110] sm:$0xf]  ;;  %v6491_v17 = vor.u32 %v9110_v10, %v6490_v9  ;;  %v2640_v30 = vpop.f32.mrf.mxu1 }
 0x11c   :  { %v6868_v14 = vld [vmem:[#allocation5 + $0x628] sm:$0xf0]  ;;  %v9046_v12 = vld [vmem:[#allocation5 + $0x12c] sm:$0xf0] }
 0x11d   :  { %v9337_v24 = vld [vmem:[#allocation5 + $0xa4c] sm:$0xf]  ;;  %v6871_v26 = vor.u32 %v9201_v13, %v6868_v14  ;;  %2890 = vmatpush.bf16.msrb.mxu1 %v6615_v23  ;;  %v6811_v13 = vor.u32 %v9190_v3, %v6810_v1  ;;  %v7067_v14 = vor.u32 %v9254_v5, %v7066_v4  ;;  %v9182_v18 = vld [vmem:[#allocation5 + $0x56c] sm:$0xf0]  ;;  %v6235_v22 = vor.u32 %v9046_v12, %v6234_v11 }
 0x11e   :  { %v7412_v25 = vld [vmem:[#allocation5 + $0xa68] sm:$0xf0]  ;;  %v7034_v19 = vld [vmem:[#allocation5 + $0x750] sm:$0xf] }
 0x11f   :  { %v9265_v28 = vld [vmem:[#allocation5 + $0x80c] sm:$0xf]  ;;  %v7415_v35 = vor.u32 %v9337_v24, %v7412_v25  ;;  %2904 = vmatpush.bf16.msrb.mxu3 %v6871_v26  ;;  %v9246_v20 = vld [vmem:[#allocation5 + $0x76c] sm:$0xf0]  ;;  %v10176_v25 = vpop.f32.mrf.mxu3  ;;  %v2626_v26 = vpop.f32.mrf.mxu0 }
 0x120   :  { %v7124_v29 = vld [vmem:[#allocation5 + $0x828] sm:$0xf0]  ;;  %2891 = vmatmul.bf16.vlgmr.msrb.gmra.mxu1 %v10119_v54  ;;  %v6458_v23 = vld [vmem:[#allocation5 + $0x2d0] sm:$0xf]  ;;  %v7035_v32 = vor.u32 %v9246_v20, %v7034_v19 }
 0x121   :  { %v9393_v33 = vld [vmem:[#allocation5 + $0xc0c] sm:$0xf]  ;;  %v7127_v39 = vor.u32 %v9265_v28, %v7124_v29  ;;  %2967 = vmatpush.bf16.msra.mxu1 %v6587_v27  ;;  %2931 = vmatpush.bf16.msrb.mxu0 %v7415_v35  ;;  %v9102_v24 = vld [vmem:[#allocation5 + $0x2ec] sm:$0xf0]  ;;  %v2627_v29 = vadd.f32 %v2626_v26, %v10164_v0  ;;  %v10179_v35 = vpop.f32.mrf.mxu2 }
 0x122   :  { %v7636_v34 = vld [vmem:[#allocation5 + $0xc28] sm:$0xf0]  ;;  %2905 = vmatmul.bf16.vlgmr.msrb.gmra.mxu3 %v10123_v60  ;;  %v6202_v27 = vld [vmem:[#allocation5 + $0xd0] sm:$0xf] }
 0x123   :  { %v9329_v40 = vld [vmem:[#allocation5 + $0xa0c] sm:$0xf]  ;;  %v7639_v45 = vor.u32 %v9393_v33, %v7636_v34  ;;  %2953 = vmatpush.bf16.msra.mxu3 %v6331_v31  ;;  %2918 = vmatpush.bf16.msra.mxu2 %v7127_v39  ;;  %v9038_v28 = vld [vmem:[#allocation5 + $0xec] sm:$0xf0]  ;;  %v6779_v31 = vor.u32 %v9182_v18, %v6778_v16  ;;  %v6459_v34 = vor.u32 %v9102_v24, %v6458_v23 }
 0x124   :  { %v7380_v41 = vld [vmem:[#allocation5 + $0xa28] sm:$0xf0]  ;;  %v6746_v33 = vld [vmem:[#allocation5 + $0x510] sm:$0xf] }
 0x125   :  { %v7383_v56 = vor.u32 %v9329_v40, %v7380_v41  ;;  %2968 = vmatpush.bf16.msra.mxu1 %v6555_v44  ;;  %v9174_v36 = vld [vmem:[#allocation5 + $0x52c] sm:$0xf0]  ;;  %v2641_v40 = vadd.f32 %v2640_v30, %v2627_v29  ;;  %v6203_v41 = vor.u32 %v9038_v28, %v6202_v27 }
 0x126   :  { %2919 = vmatmul.bf16.vlgmr.msra.gmra.mxu2 %v10135_v37  ;;  %v7002_v38 = vld [vmem:[#allocation5 + $0x710] sm:$0xf]  ;;  %v6747_v0 = vor.u32 %v9174_v36, %v6746_v33 }
 0x127   :  { %2946 = vmatpush.bf16.msrb.mxu2 %v7639_v45  ;;  %2954 = vmatpush.bf16.msra.mxu3 %v6299_v49  ;;  %v9238_v39 = vld [vmem:[#allocation5 + $0x72c] sm:$0xf0]  ;;  %v10181_v47 = vadd.f32 %v2654_v63, %v2641_v40  ;;  %v2668_v63 = vpop.f32.mrf.mxu3 }
 0x128   :  { %2932 = vmatpush.bf16.msrb.mxu0 %v7383_v56  ;;  %v6426_v43 = vld [vmem:[#allocation5 + $0x290] sm:$0xf]  ;;  %v7003_v48 = vor.u32 %v9238_v39, %v7002_v38  ;;  %v2669_v9 = vadd.f32 %v2668_v63, %v10512_v51  ;;  %v6372_v51 = vld [vmem:[#allocation5 + $0x238] sm:$0xf0] }
 0x129   :  { %2969 = vmatpush.bf16.msra.mxu1 %v6523_v2  ;;  %v9094_v44 = vld [vmem:[#allocation5 + $0x2ac] sm:$0xf0] }
 0x12a   :  { %v6170_v45 = vld [vmem:[#allocation5 + $0x90] sm:$0xf]  ;;  %v6427_v52 = vor.u32 %v9094_v44, %v6426_v43 }
 0x12b   :  { %2981 = vmatpush.bf16.msra.mxu2 %v6843_v61  ;;  %2955 = vmatpush.bf16.msra.mxu3 %v6267_v7  ;;  %v9030_v46 = vld [vmem:[#allocation5 + $0xac] sm:$0xf0] }
 0x12c   :  { %2995 = vmatpush.bf16.msra.mxu0 %v7099_v62  ;;  %v6714_v49 = vld [vmem:[#allocation5 + $0x4d0] sm:$0xf]  ;;  %v6171_v61 = vor.u32 %v9030_v46, %v6170_v45 }
 0x12d   :  { %2933 = vmatmul.bf16.vlgmr.msrb.gmra.mxu0 %v10137_v42  ;;  %2970 = vmatpush.bf16.msra.mxu1 %v6491_v17  ;;  %v9166_v56 = vld [vmem:[#allocation5 + $0x4ec] sm:$0xf0] }
 0x12e   :  { %v6970_v57 = vld [vmem:[#allocation5 + $0x6d0] sm:$0xf]  ;;  %v6715_v4 = vor.u32 %v9166_v56, %v6714_v49  ;;  %v9066_v56 = vld [vmem:[#allocation5 + $0x1d4] sm:$0xf] }
 0x12f   :  { %2982 = vmatpush.bf16.msra.mxu2 %v6811_v13  ;;  %2956 = vmatpush.bf16.msra.mxu3 %v6235_v22  ;;  %v9230_v58 = vld [vmem:[#allocation5 + $0x6ec] sm:$0xf0] }
 0x130   :  { %2996 = vmatpush.bf16.msra.mxu0 %v7067_v14  ;;  %v6394_v62 = vld [vmem:[#allocation5 + $0x250] sm:$0xf]  ;;  %v6971_v5 = vor.u32 %v9230_v58, %v6970_v57  ;;  %v2682_v14 = vpop.f32.mrf.mxu2  ;;  %v6332_v58 = vld [vmem:[#allocation5 + $0x1f0] sm:$0xf0] }
 0x131   :  { %2971 = vmatpush.bf16.msra.mxu1 %v6459_v34  ;;  %v9086_v1 = vld [vmem:[#allocation5 + $0x26c] sm:$0xf0]  ;;  %v10186_v20 = vadd.f32 %v2682_v14, %v2669_v9  ;;  %v10190_v9 = vpop.f32.mrf.mxu0 }
 0x132   :  { %v6138_v2 = vld [vmem:[#allocation5 + $0x50] sm:$0xf]  ;;  %v6395_v10 = vor.u32 %v9086_v1, %v6394_v62 }
 0x133   :  { %2983 = vmatpush.bf16.msra.mxu2 %v6779_v31  ;;  %2957 = vmatpush.bf16.msra.mxu3 %v6203_v41  ;;  %v9022_v3 = vld [vmem:[#allocation5 + $0x6c] sm:$0xf0] }
 0x134   :  { %2997 = vmatpush.bf16.msra.mxu0 %v7035_v32  ;;  %v6682_v7 = vld [vmem:[#allocation5 + $0x490] sm:$0xf]  ;;  %v6139_v16 = vor.u32 %v9022_v3, %v6138_v2 }
 0x135   :  { %2972 = vmatpush.bf16.msra.mxu1 %v6427_v52  ;;  %v9158_v11 = vld [vmem:[#allocation5 + $0x4ac] sm:$0xf0] }
 0x136   :  { %v6938_v12 = vld [vmem:[#allocation5 + $0x690] sm:$0xf]  ;;  %7659 = vmatmul.msk.bf16.vlgmr.msrb.gmra.mxu2 %vm2557_vm0, %v10131_v50  ;;  %v6683_v26 = vor.u32 %v9158_v11, %v6682_v7 }
 0x137   :  { %2984 = vmatpush.bf16.msra.mxu2 %v6747_v0  ;;  %v9222_v13 = vld [vmem:[#allocation5 + $0x6ac] sm:$0xf0]  ;;  %2958 = vmatpush.bf16.msra.mxu3 %v6171_v61 }
 0x138   :  { %2998 = vmatpush.bf16.msra.mxu0 %v7003_v48  ;;  %v6106_v17 = vld [vmem:[#allocation5 + $0x10] sm:$0xf]  ;;  %v6939_v27 = vor.u32 %v9222_v13, %v6938_v12  ;;  %v9130_v12 = vld [vmem:[#allocation5 + $0x3d4] sm:$0xf] }
 0x139   :  { %v6362_v18 = vld [vmem:[#allocation5 + $0x210] sm:$0xf]  ;;  %2973 = vmatpush.bf16.msra.mxu1 %v6395_v10  ;;  %v6335_v10 = vor.u32 %v9066_v56, %v6332_v58  ;;  %v6588_v13 = vld [vmem:[#allocation5 + $0x3f0] sm:$0xf0] }
 0x13a   :  { %v9078_v19 = vld [vmem:[#allocation5 + $0x22c] sm:$0xf0]  ;;  %v9042_v56 = vld [vmem:[#allocation5 + $0x114] sm:$0xf] }
 0x13b   :  { %v9014_v22 = vld [vmem:[#allocation5 + $0x2c] sm:$0xf0]  ;;  %2985 = vmatpush.bf16.msra.mxu2 %v6715_v4  ;;  %v6363_v31 = vor.u32 %v9078_v19, %v6362_v18  ;;  %2959 = vmatpush.bf16.msra.mxu3 %v6139_v16  ;;  %v9058_v16 = vld [vmem:[#allocation5 + $0x194] sm:$0xf] }
 0x13c   :  { %v7610_v23 = vld [vmem:[#allocation5 + $0xbd0] sm:$0xf]  ;;  %2999 = vmatpush.bf16.msra.mxu0 %v6971_v5  ;;  %v6107_v36 = vor.u32 %v9014_v22, %v6106_v17  ;;  %v6300_v17 = vld [vmem:[#allocation5 + $0x1b0] sm:$0xf0] }
 0x13d   :  { %v9390_v24 = vld [vmem:[#allocation5 + $0xbec] sm:$0xf0]  ;;  %2974 = vmatpush.bf16.msra.mxu1 %v6363_v31  ;;  %v10196_v31 = vpop.f32.mrf.mxu3 }
 0x13e   :  { %v7354_v28 = vld [vmem:[#allocation5 + $0x9d0] sm:$0xf]  ;;  %v7611_v38 = vor.u32 %v9390_v24, %v7610_v23  ;;  %v10194_v23 = vpop.f32.mrf.mxu1  ;;  %v6591_v24 = vor.u32 %v9130_v12, %v6588_v13  ;;  %v6204_v12 = vld [vmem:[#allocation5 + $0xf0] sm:$0xf0] }
 0x13f   :  { %v9326_v29 = vld [vmem:[#allocation5 + $0x9ec] sm:$0xf0]  ;;  %2986 = vmatpush.bf16.msra.mxu2 %v6683_v26  ;;  %2960 = vmatpush.bf16.msra.mxu3 %v6107_v36 }
 0x140   :  { %v6650_v30 = vld [vmem:[#allocation5 + $0x450] sm:$0xf]  ;;  %v7355_v39 = vor.u32 %v9326_v29, %v7354_v28  ;;  %3000 = vmatpush.bf16.msra.mxu0 %v6939_v27  ;;  %2975 = vmatmul.bf16.vlgmr.msra.gmra.mxu1 %v10127_v8  ;;  %v6303_v28 = vor.u32 %v9058_v16, %v6300_v17  ;;  %v9122_v29 = vld [vmem:[#allocation5 + $0x394] sm:$0xf] }
 0x141   :  { %v9150_v32 = vld [vmem:[#allocation5 + $0x46c] sm:$0xf0]  ;;  %3023 = vmatpush.bf16.msrb.mxu1 %v7611_v38 }
 0x142   :  { %v6906_v33 = vld [vmem:[#allocation5 + $0x650] sm:$0xf]  ;;  %v6651_v44 = vor.u32 %v9150_v32, %v6650_v30  ;;  %2961 = vmatmul.bf16.vlgmr.msra.gmra.mxu3 %v10121_v55  ;;  %v6556_v30 = vld [vmem:[#allocation5 + $0x3b0] sm:$0xf0] }
 0x143   :  { %v9214_v34 = vld [vmem:[#allocation5 + $0x66c] sm:$0xf0]  ;;  %3009 = vmatpush.bf16.msrb.mxu3 %v7355_v39 }
 0x144   :  { %v7322_v40 = vld [vmem:[#allocation5 + $0x990] sm:$0xf]  ;;  %v6907_v45 = vor.u32 %v9214_v34, %v6906_v33  ;;  %2987 = vmatpush.bf16.msra.mxu2 %v6651_v44  ;;  %v9050_v33 = vld [vmem:[#allocation5 + $0x154] sm:$0xf]  ;;  %v2696_v44 = vpop.f32.mrf.mxu0 }
 0x145   :  { %v7578_v41 = vld [vmem:[#allocation5 + $0xb90] sm:$0xf]  ;;  %v6268_v34 = vld [vmem:[#allocation5 + $0x170] sm:$0xf0]  ;;  %v2724_v17 = vpop.f32.mrf.mxu3 }
 0x146   :  { %v9382_v43 = vld [vmem:[#allocation5 + $0xbac] sm:$0xf0]  ;;  %3001 = vmatpush.bf16.msra.mxu0 %v6907_v45  ;;  %v10200_v45 = vpop.f32.mrf.mxu2 }
 0x147   :  { %v9318_v46 = vld [vmem:[#allocation5 + $0x9ac] sm:$0xf0]  ;;  %v7579_v57 = vor.u32 %v9382_v43, %v7578_v41 }
 0x148   :  { %v6618_v0 = vld [vmem:[#allocation5 + $0x410] sm:$0xf]  ;;  %v7323_v1 = vor.u32 %v9318_v46, %v7322_v40  ;;  %v6559_v40 = vor.u32 %v9122_v29, %v6556_v30  ;;  %v6271_v46 = vor.u32 %v9050_v33, %v6268_v34  ;;  %v6460_v29 = vld [vmem:[#allocation5 + $0x2f0] sm:$0xf0] }
 0x149   :  { %v9142_v48 = vld [vmem:[#allocation5 + $0x42c] sm:$0xf0]  ;;  %3024 = vmatpush.bf16.msrb.mxu1 %v7579_v57  ;;  %v6236_v57 = vld [vmem:[#allocation5 + $0x130] sm:$0xf0] }
 0x14a   :  { %v6874_v49 = vld [vmem:[#allocation5 + $0x610] sm:$0xf]  ;;  %v6619_v63 = vor.u32 %v9142_v48, %v6618_v0  ;;  %3010 = vmatpush.bf16.msrb.mxu3 %v7323_v1  ;;  %v9114_v0 = vld [vmem:[#allocation5 + $0x354] sm:$0xf]  ;;  %v2710_v1 = vpop.f32.mrf.mxu1 }
 0x14b   :  { %v9206_v52 = vld [vmem:[#allocation5 + $0x62c] sm:$0xf0]  ;;  %v6524_v48 = vld [vmem:[#allocation5 + $0x370] sm:$0xf0] }
 0x14c   :  { %v7642_v61 = vld [vmem:[#allocation5 + $0xc10] sm:$0xf]  ;;  %v6875_v4 = vor.u32 %v9206_v52, %v6874_v49  ;;  %2988 = vmatpush.bf16.msra.mxu2 %v6619_v63  ;;  %v2697_v49 = vadd.f32 %v2696_v44, %v10186_v20  ;;  %v6172_v33 = vld [vmem:[#allocation5 + $0xb0] sm:$0xf0] }
 0x14d   :  { %v9398_v62 = vld [vmem:[#allocation5 + $0xc2c] sm:$0xf0] }
 0x14e   :  { %v7546_v2 = vld [vmem:[#allocation5 + $0xb50] sm:$0xf]  ;;  %v7643_v11 = vor.u32 %v9398_v62, %v7642_v61  ;;  %3002 = vmatpush.bf16.msra.mxu0 %v6875_v4  ;;  %v2711_v4 = vadd.f32 %v2710_v1, %v2697_v49 }
 0x14f   :  { %v9374_v3 = vld [vmem:[#allocation5 + $0xb6c] sm:$0xf0]  ;;  %2989 = vmatmul.bf16.vlgmr.msra.gmra.mxu2 %v10119_v54 }
 0x150   :  { %v7290_v5 = vld [vmem:[#allocation5 + $0x950] sm:$0xf]  ;;  %v7547_v14 = vor.u32 %v9374_v3, %v7546_v2  ;;  %3044 = vmatpush.bf16.msrb.mxu2 %v7643_v11  ;;  %v6527_v2 = vor.u32 %v9114_v0, %v6524_v48  ;;  %v9034_v11 = vld [vmem:[#allocation5 + $0xd4] sm:$0xf] }
 0x151   :  { %v9310_v7 = vld [vmem:[#allocation5 + $0x96c] sm:$0xf0]  ;;  %3003 = vmatmul.bf16.vlgmr.msra.gmra.mxu0 %v10123_v60  ;;  %v9258_v0 = vld [vmem:[#allocation5 + $0x7d4] sm:$0xf] }
 0x152   :  { %v7291_v18 = vor.u32 %v9310_v7, %v7290_v5  ;;  %v7514_v19 = vld [vmem:[#allocation5 + $0xb10] sm:$0xf]  ;;  %3051 = vmatpush.bf16.msrb.mxu0 %v6335_v10  ;;  %3025 = vmatpush.bf16.msrb.mxu1 %v7547_v14  ;;  %v6239_v5 = vor.u32 %v9042_v56, %v6236_v57  ;;  %v9106_v7 = vld [vmem:[#allocation5 + $0x314] sm:$0xf] }
 0x153   :  { %v9366_v22 = vld [vmem:[#allocation5 + $0xb2c] sm:$0xf0]  ;;  %v6492_v10 = vld [vmem:[#allocation5 + $0x330] sm:$0xf0] }
 0x154   :  { %v7258_v26 = vld [vmem:[#allocation5 + $0x910] sm:$0xf]  ;;  %v7515_v32 = vor.u32 %v9366_v22, %v7514_v19  ;;  %3011 = vmatpush.bf16.msrb.mxu3 %v7291_v18  ;;  %3065 = vmatpush.bf16.msra.mxu2 %v6591_v24  ;;  %v6495_v18 = vor.u32 %v9106_v7, %v6492_v10  ;;  %v2725_v24 = vadd.f32 %v2724_v17, %v2711_v4  ;;  %v7100_v48 = vld [vmem:[#allocation5 + $0x7f0] sm:$0xf0] }
 0x155   :  { %v9302_v27 = vld [vmem:[#allocation5 + $0x92c] sm:$0xf0]  ;;  %v9194_v56 = vld [vmem:[#allocation5 + $0x5d4] sm:$0xf] }
 0x156   :  { %v7259_v36 = vor.u32 %v9302_v27, %v7258_v26  ;;  %v7482_v38 = vld [vmem:[#allocation5 + $0xad0] sm:$0xf]  ;;  %3052 = vmatpush.bf16.msrb.mxu0 %v6303_v28  ;;  %3026 = vmatpush.bf16.msrb.mxu1 %v7515_v32  ;;  %v10203_v26 = vpop.f32.mrf.mxu0  ;;  %v6207_v27 = vor.u32 %v9034_v11, %v6204_v12  ;;  %v9098_v28 = vld [vmem:[#allocation5 + $0x2d4] sm:$0xf] }
 0x157   :  { %v9358_v39 = vld [vmem:[#allocation5 + $0xaec] sm:$0xf0]  ;;  %v9026_v32 = vld [vmem:[#allocation5 + $0x94] sm:$0xf]  ;;  %v6463_v44 = vor.u32 %v9098_v28, %v6460_v29 }
 0x158   :  { %v7226_v41 = vld [vmem:[#allocation5 + $0x8d0] sm:$0xf]  ;;  %v7483_v52 = vor.u32 %v9358_v39, %v7482_v38  ;;  %3012 = vmatpush.bf16.msrb.mxu3 %v7259_v36  ;;  %3066 = vmatpush.bf16.msra.mxu2 %v6559_v40  ;;  %v2738_v36 = vpop.f32.mrf.mxu2  ;;  %v6175_v49 = vor.u32 %v9026_v32, %v6172_v33  ;;  %v6844_v57 = vld [vmem:[#allocation5 + $0x5f0] sm:$0xf0] }
 0x159   :  { %v9294_v43 = vld [vmem:[#allocation5 + $0x8ec] sm:$0xf0]  ;;  %v9082_v4 = vld [vmem:[#allocation5 + $0x254] sm:$0xf] }
 0x15a   :  { %v7227_v58 = vor.u32 %v9294_v43, %v7226_v41  ;;  %v7450_v61 = vld [vmem:[#allocation5 + $0xa90] sm:$0xf]  ;;  %3053 = vmatpush.bf16.msrb.mxu0 %v6271_v46  ;;  %3027 = vmatpush.bf16.msrb.mxu1 %v7483_v52  ;;  %v2739_v43 = vadd.f32 %v2738_v36, %v2725_v24  ;;  %v9090_v46 = vld [vmem:[#allocation5 + $0x294] sm:$0xf] }
 0x15b   :  { %v9350_v62 = vld [vmem:[#allocation5 + $0xaac] sm:$0xf0]  ;;  %v6428_v52 = vld [vmem:[#allocation5 + $0x2b0] sm:$0xf0] }
 0x15c   :  { %v7194_v3 = vld [vmem:[#allocation5 + $0x890] sm:$0xf]  ;;  %v7451_v20 = vor.u32 %v9350_v62, %v7450_v61  ;;  %3013 = vmatpush.bf16.msrb.mxu3 %v7227_v58  ;;  %3067 = vmatpush.bf16.msra.mxu2 %v6527_v2  ;;  %v9018_v61 = vld [vmem:[#allocation5 + $0x54] sm:$0xf]  ;;  %v7103_v2 = vor.u32 %v9258_v0, %v7100_v48 }
 0x15d   :  { %v9286_v63 = vld [vmem:[#allocation5 + $0x8ac] sm:$0xf0]  ;;  %v6140_v62 = vld [vmem:[#allocation5 + $0x70] sm:$0xf0] }
 0x15e   :  { %v7195_v13 = vor.u32 %v9286_v63, %v7194_v3  ;;  %v7418_v14 = vld [vmem:[#allocation5 + $0xa50] sm:$0xf]  ;;  %3054 = vmatpush.bf16.msrb.mxu0 %v6239_v5  ;;  %3028 = vmatpush.bf16.msrb.mxu1 %v7451_v20  ;;  %v6431_v3 = vor.u32 %v9090_v46, %v6428_v52  ;;  %v6847_v63 = vor.u32 %v9194_v56, %v6844_v57  ;;  %v9250_v5 = vld [vmem:[#allocation5 + $0x794] sm:$0xf]  ;;  %v2752_v10 = vpop.f32.mrf.mxu0 }
 0x15f   :  { %v9342_v16 = vld [vmem:[#allocation5 + $0xa6c] sm:$0xf0]  ;;  %7660 = vmatmul.msk.bf16.vlgmr.msrb.gmra.mxu2 %vm2557_vm0, %v10131_v50  ;;  %v7068_v7 = vld [vmem:[#allocation5 + $0x7b0] sm:$0xf0]  ;;  %v6143_v20 = vor.u32 %v9018_v61, %v6140_v62 }
 0x160   :  { %v7162_v19 = vld [vmem:[#allocation5 + $0x850] sm:$0xf]  ;;  %v7419_v30 = vor.u32 %v9342_v16, %v7418_v14  ;;  %3014 = vmatpush.bf16.msrb.mxu3 %v7195_v13  ;;  %3068 = vmatpush.bf16.msra.mxu2 %v6495_v18  ;;  %v6396_v11 = vld [vmem:[#allocation5 + $0x270] sm:$0xf0]  ;;  %v10207_v14 = vadd.f32 %v2752_v10, %v2739_v43  ;;  %v7071_v18 = vor.u32 %v9250_v5, %v7068_v7 }
 0x161   :  { %v9278_v22 = vld [vmem:[#allocation5 + $0x86c] sm:$0xf0]  ;;  %v9186_v12 = vld [vmem:[#allocation5 + $0x594] sm:$0xf]  ;;  %v6399_v24 = vor.u32 %v9082_v4, %v6396_v11 }
 0x162   :  { %v7130_v34 = vld [vmem:[#allocation5 + $0x810] sm:$0xf]  ;;  %v7163_v38 = vor.u32 %v9278_v22, %v7162_v19  ;;  %3055 = vmatpush.bf16.msrb.mxu0 %v6207_v27  ;;  %3029 = vmatpush.bf16.msrb.mxu1 %v7419_v30  ;;  %v6812_v13 = vld [vmem:[#allocation5 + $0x5b0] sm:$0xf0]  ;;  %10514 = vst [vmem:[#allocation24_spill] sm:$0xff] %v10207_v14 }
 0x163   :  { %v9270_v39 = vld [vmem:[#allocation5 + $0x82c] sm:$0xf0]  ;;  %v9010_v16 = vld [vmem:[#allocation5 + $0x14] sm:$0xf]  ;;  %v6815_v27 = vor.u32 %v9186_v12, %v6812_v13 }
 0x164   :  { %v7386_v40 = vld [vmem:[#allocation5 + $0xa10] sm:$0xf]  ;;  %3015 = vmatpush.bf16.msrb.mxu3 %v7163_v38  ;;  %v7131_v1 = vor.u32 %v9270_v39, %v7130_v34  ;;  %3069 = vmatpush.bf16.msra.mxu2 %v6463_v44  ;;  %v6108_v17 = vld [vmem:[#allocation5 + $0x30] sm:$0xf0] }
 0x165   :  { %v9334_v41 = vld [vmem:[#allocation5 + $0xa2c] sm:$0xf0]  ;;  %v9322_v19 = vld [vmem:[#allocation5 + $0x9d4] sm:$0xf]  ;;  %v6111_v32 = vor.u32 %v9010_v16, %v6108_v17 }
 0x166   :  { %v7387_v58 = vor.u32 %v9334_v41, %v7386_v40  ;;  %3056 = vmatpush.bf16.msrb.mxu0 %v6175_v49  ;;  %v7356_v22 = vld [vmem:[#allocation5 + $0x9f0] sm:$0xf0] }
 0x167   :  { %v9074_v28 = vld [vmem:[#allocation5 + $0x214] sm:$0xf]  ;;  %v7359_v38 = vor.u32 %v9322_v19, %v7356_v22 }
 0x168   :  { %3030 = vmatpush.bf16.msrb.mxu1 %v7387_v58  ;;  %3016 = vmatpush.bf16.msrb.mxu3 %v7131_v1  ;;  %v9242_v29 = vld [vmem:[#allocation5 + $0x754] sm:$0xf] }
 0x169   :  { %3070 = vmatpush.bf16.msra.mxu2 %v6431_v3  ;;  %v7036_v30 = vld [vmem:[#allocation5 + $0x770] sm:$0xf0] }
 0x16a   :  { %3057 = vmatpush.bf16.msrb.mxu0 %v6143_v20  ;;  %v6364_v33 = vld [vmem:[#allocation5 + $0x230] sm:$0xf0]  ;;  %v7039_v41 = vor.u32 %v9242_v29, %v7036_v30 }
 0x16b   :  { %v9178_v34 = vld [vmem:[#allocation5 + $0x554] sm:$0xf]  ;;  %3031 = vmatmul.bf16.vlgmr.msrb.gmra.mxu1 %v10137_v42  ;;  %3017 = vmatmul.bf16.vlgmr.msrb.gmra.mxu3 %v10135_v37  ;;  %v6367_v46 = vor.u32 %v9074_v28, %v6364_v33 }
 0x16c   :  { %3093 = vmatpush.bf16.msra.mxu1 %v7103_v2  ;;  %3079 = vmatpush.bf16.msra.mxu3 %v6847_v63  ;;  %v6780_v36 = vld [vmem:[#allocation5 + $0x570] sm:$0xf0] }
 0x16d   :  { %v9386_v39 = vld [vmem:[#allocation5 + $0xbd4] sm:$0xf]  ;;  %3071 = vmatpush.bf16.msra.mxu2 %v6399_v24  ;;  %v6783_v0 = vor.u32 %v9178_v34, %v6780_v36 }
 0x16e   :  { %v7612_v40 = vld [vmem:[#allocation5 + $0xbf0] sm:$0xf0]  ;;  %3058 = vmatpush.bf16.msrb.mxu0 %v6111_v32 }
 0x16f   :  { %v9314_v43 = vld [vmem:[#allocation5 + $0x994] sm:$0xf]  ;;  %v7615_v52 = vor.u32 %v9386_v39, %v7612_v40 }
 0x170   :  { %3094 = vmatpush.bf16.msra.mxu1 %v7071_v18  ;;  %v7324_v44 = vld [vmem:[#allocation5 + $0x9b0] sm:$0xf0]  ;;  %3080 = vmatpush.bf16.msra.mxu3 %v6815_v27 }
 0x171   :  { %v9234_v48 = vld [vmem:[#allocation5 + $0x714] sm:$0xf]  ;;  %v7327_v58 = vor.u32 %v9314_v43, %v7324_v44  ;;  %3072 = vmatpush.bf16.msra.mxu2 %v6367_v46  ;;  %3059 = vmatmul.bf16.vlgmr.msrb.gmra.mxu0 %v10121_v55 }
 0x172   :  { %v7004_v49 = vld [vmem:[#allocation5 + $0x730] sm:$0xf0]  ;;  %3107 = vmatpush.bf16.msra.mxu0 %v7359_v38 }
 0x173   :  { %v9170_v56 = vld [vmem:[#allocation5 + $0x514] sm:$0xf]  ;;  %v7007_v1 = vor.u32 %v9234_v48, %v7004_v49 }
 0x174   :  { %v6748_v57 = vld [vmem:[#allocation5 + $0x530] sm:$0xf0]  ;;  %3095 = vmatpush.bf16.msra.mxu1 %v7039_v41  ;;  %3081 = vmatpush.bf16.msra.mxu3 %v6783_v0 }
 0x175   :  { %v9378_v61 = vld [vmem:[#allocation5 + $0xb94] sm:$0xf]  ;;  %v6751_v63 = vor.u32 %v9170_v56, %v6748_v57  ;;  %3121 = vmatpush.bf16.msrb.mxu2 %v7615_v52 }
 0x176   :  { %v7580_v62 = vld [vmem:[#allocation5 + $0xbb0] sm:$0xf0]  ;;  %3108 = vmatpush.bf16.msra.mxu0 %v7327_v58  ;;  %3073 = vmatmul.bf16.vlgmr.msra.gmra.mxu2 %v10127_v8 }
 0x177   :  { %v9306_v2 = vld [vmem:[#allocation5 + $0x954] sm:$0xf]  ;;  %v7583_v7 = vor.u32 %v9378_v61, %v7580_v62 }
 0x178   :  { %v7292_v3 = vld [vmem:[#allocation5 + $0x970] sm:$0xf0]  ;;  %3096 = vmatpush.bf16.msra.mxu1 %v7007_v1  ;;  %3082 = vmatpush.bf16.msra.mxu3 %v6751_v63 }
 0x179   :  { %v9226_v4 = vld [vmem:[#allocation5 + $0x6d4] sm:$0xf]  ;;  %v7295_v11 = vor.u32 %v9306_v2, %v7292_v3  ;;  %3122 = vmatpush.bf16.msrb.mxu2 %v7583_v7 }
 0x17a   :  { %v6972_v5 = vld [vmem:[#allocation5 + $0x6f0] sm:$0xf0] }
 0x17b   :  { %v9162_v10 = vld [vmem:[#allocation5 + $0x4d4] sm:$0xf]  ;;  %v6975_v16 = vor.u32 %v9226_v4, %v6972_v5  ;;  %3109 = vmatpush.bf16.msra.mxu0 %v7295_v11  ;;  %v6338_v4 = vld [vmem:[#allocation5 + $0x1d8] sm:$0xf] }
 0x17c   :  { %v6716_v20 = vld [vmem:[#allocation5 + $0x4f0] sm:$0xf0]  ;;  %v9071_v5 = vld [vmem:[#allocation5 + $0x1f4] sm:$0xf0] }
 0x17d   :  { %v9370_v12 = vld [vmem:[#allocation5 + $0xb54] sm:$0xf]  ;;  %v6719_v19 = vor.u32 %v9162_v10, %v6716_v20  ;;  %3097 = vmatpush.bf16.msra.mxu1 %v6975_v16 }
 0x17e   :  { %v7548_v13 = vld [vmem:[#allocation5 + $0xb70] sm:$0xf0] }
 0x17f   :  { %v9298_v17 = vld [vmem:[#allocation5 + $0x914] sm:$0xf]  ;;  %v7551_v27 = vor.u32 %v9370_v12, %v7548_v13  ;;  %3083 = vmatpush.bf16.msra.mxu3 %v6719_v19  ;;  %v6594_v19 = vld [vmem:[#allocation5 + $0x3d8] sm:$0xf] }
 0x180   :  { %v7260_v18 = vld [vmem:[#allocation5 + $0x930] sm:$0xf0] }
 0x181   :  { %v9218_v22 = vld [vmem:[#allocation5 + $0x694] sm:$0xf]  ;;  %v7263_v30 = vor.u32 %v9298_v17, %v7260_v18  ;;  %3123 = vmatpush.bf16.msrb.mxu2 %v7551_v27  ;;  %v6339_v18 = vor.u32 %v9071_v5, %v6338_v4  ;;  %v9135_v27 = vld [vmem:[#allocation5 + $0x3f4] sm:$0xf0] }
 0x182   :  { %v6940_v24 = vld [vmem:[#allocation5 + $0x6b0] sm:$0xf0]  ;;  %v6530_v4 = vld [vmem:[#allocation5 + $0x358] sm:$0xf] }
 0x183   :  { %v9154_v28 = vld [vmem:[#allocation5 + $0x494] sm:$0xf]  ;;  %v6943_v34 = vor.u32 %v9218_v22, %v6940_v24  ;;  %3110 = vmatpush.bf16.msra.mxu0 %v7263_v30  ;;  %v9119_v5 = vld [vmem:[#allocation5 + $0x374] sm:$0xf0] }
 0x184   :  { %v6684_v29 = vld [vmem:[#allocation5 + $0x4b0] sm:$0xf0] }
 0x185   :  { %v9362_v32 = vld [vmem:[#allocation5 + $0xb14] sm:$0xf]  ;;  %v6687_v39 = vor.u32 %v9154_v28, %v6684_v29  ;;  %3098 = vmatpush.bf16.msra.mxu1 %v6943_v34  ;;  %v6306_v28 = vld [vmem:[#allocation5 + $0x198] sm:$0xf] }
 0x186   :  { %v7516_v33 = vld [vmem:[#allocation5 + $0xb30] sm:$0xf0]  ;;  %v9063_v29 = vld [vmem:[#allocation5 + $0x1b4] sm:$0xf0] }
 0x187   :  { %v9290_v36 = vld [vmem:[#allocation5 + $0x8d4] sm:$0xf]  ;;  %v7519_v43 = vor.u32 %v9362_v32, %v7516_v33  ;;  %3084 = vmatpush.bf16.msra.mxu3 %v6687_v39  ;;  %v6307_v39 = vor.u32 %v9063_v29, %v6306_v28  ;;  %v6210_v29 = vld [vmem:[#allocation5 + $0xd8] sm:$0xf] }
 0x188   :  { %v7228_v38 = vld [vmem:[#allocation5 + $0x8f0] sm:$0xf0] }
 0x189   :  { %v9210_v40 = vld [vmem:[#allocation5 + $0x654] sm:$0xf]  ;;  %v7231_v0 = vor.u32 %v9290_v36, %v7228_v38  ;;  %3124 = vmatpush.bf16.msrb.mxu2 %v7519_v43  ;;  %v6595_v38 = vor.u32 %v9135_v27, %v6594_v19  ;;  %v6562_v43 = vld [vmem:[#allocation5 + $0x398] sm:$0xf] }
 0x18a   :  { %v6908_v41 = vld [vmem:[#allocation5 + $0x670] sm:$0xf0]  ;;  %v9183_v19 = vld [vmem:[#allocation5 + $0x574] sm:$0xf0] }
 0x18b   :  { %v9146_v44 = vld [vmem:[#allocation5 + $0x454] sm:$0xf]  ;;  %v6911_v52 = vor.u32 %v9210_v40, %v6908_v41  ;;  %3111 = vmatpush.bf16.msra.mxu0 %v7231_v0  ;;  %v6850_v40 = vld [vmem:[#allocation5 + $0x5d8] sm:$0xf] }
 0x18c   :  { %v6652_v46 = vld [vmem:[#allocation5 + $0x470] sm:$0xf0]  ;;  %v9199_v41 = vld [vmem:[#allocation5 + $0x5f4] sm:$0xf0] }
 0x18d   :  { %v9354_v48 = vld [vmem:[#allocation5 + $0xad4] sm:$0xf]  ;;  %v6655_v61 = vor.u32 %v9146_v44, %v6652_v46  ;;  %3099 = vmatpush.bf16.msra.mxu1 %v6911_v52  ;;  %v9127_v46 = vld [vmem:[#allocation5 + $0x3b4] sm:$0xf0] }
 0x18e   :  { %v7484_v49 = vld [vmem:[#allocation5 + $0xaf0] sm:$0xf0]  ;;  %v6274_v0 = vld [vmem:[#allocation5 + $0x158] sm:$0xf] }
 0x18f   :  { %v9282_v56 = vld [vmem:[#allocation5 + $0x894] sm:$0xf]  ;;  %v7487_v3 = vor.u32 %v9354_v48, %v7484_v49  ;;  %3085 = vmatpush.bf16.msra.mxu3 %v6655_v61  ;;  %v9055_v48 = vld [vmem:[#allocation5 + $0x174] sm:$0xf0] }
 0x190   :  { %v7196_v57 = vld [vmem:[#allocation5 + $0x8b0] sm:$0xf0]  ;;  %v9263_v61 = vld [vmem:[#allocation5 + $0x7f4] sm:$0xf0] }
 0x191   :  { %v9138_v58 = vld [vmem:[#allocation5 + $0x414] sm:$0xf]  ;;  %v7199_v7 = vor.u32 %v9282_v56, %v7196_v57  ;;  %3125 = vmatpush.bf16.msrb.mxu2 %v7487_v3  ;;  %v6851_v57 = vor.u32 %v9199_v41, %v6850_v40  ;;  %v9191_v3 = vld [vmem:[#allocation5 + $0x5b4] sm:$0xf0] }
 0x192   :  { %v6620_v62 = vld [vmem:[#allocation5 + $0x430] sm:$0xf0]  ;;  %v9111_v27 = vld [vmem:[#allocation5 + $0x334] sm:$0xf0] }
 0x193   :  { %v9202_v1 = vld [vmem:[#allocation5 + $0x614] sm:$0xf]  ;;  %v6623_v17 = vor.u32 %v9138_v58, %v6620_v62  ;;  %3112 = vmatpush.bf16.msra.mxu0 %v7199_v7  ;;  %v7106_v58 = vld [vmem:[#allocation5 + $0x7d8] sm:$0xf]  ;;  %v6563_v62 = vor.u32 %v9127_v46, %v6562_v43  ;;  %v10215_v7 = vpop.f32.mrf.mxu2 }
 0x194   :  { %v6876_v2 = vld [vmem:[#allocation5 + $0x630] sm:$0xf0]  ;;  %v6466_v41 = vld [vmem:[#allocation5 + $0x2d8] sm:$0xf] }
 0x195   :  { %v9346_v63 = vld [vmem:[#allocation5 + $0xa94] sm:$0xf]  ;;  %v6879_v12 = vor.u32 %v9202_v1, %v6876_v2  ;;  %3086 = vmatpush.bf16.msra.mxu3 %v6623_v17  ;;  %v6275_v1 = vor.u32 %v9055_v48, %v6274_v0  ;;  %v6818_v2 = vld [vmem:[#allocation5 + $0x598] sm:$0xf]  ;;  %v6531_v17 = vor.u32 %v9119_v5, %v6530_v4 }
 0x196   :  { %v7452_v10 = vld [vmem:[#allocation5 + $0xab0] sm:$0xf0]  ;;  %v9103_v43 = vld [vmem:[#allocation5 + $0x2f4] sm:$0xf0] }
 0x197   :  { %v9394_v20 = vld [vmem:[#allocation5 + $0xc14] sm:$0xf]  ;;  %v7455_v22 = vor.u32 %v9346_v63, %v7452_v10  ;;  %3100 = vmatpush.bf16.msra.mxu1 %v6879_v12  ;;  %v7107_v10 = vor.u32 %v9263_v61, %v7106_v58  ;;  %v6819_v12 = vor.u32 %v9191_v3, %v6818_v2  ;;  %v6178_v0 = vld [vmem:[#allocation5 + $0x98] sm:$0xf] }
 0x198   :  { %v7644_v11 = vld [vmem:[#allocation5 + $0xc30] sm:$0xf0]  ;;  %3087 = vmatmul.bf16.vlgmr.msra.gmra.mxu3 %v10119_v54  ;;  %v9031_v48 = vld [vmem:[#allocation5 + $0xb4] sm:$0xf0] }
 0x199   :  { %v9274_v13 = vld [vmem:[#allocation5 + $0x854] sm:$0xf]  ;;  %v7647_v24 = vor.u32 %v9394_v20, %v7644_v11  ;;  %3126 = vmatpush.bf16.msrb.mxu2 %v7455_v22  ;;  %v6242_v20 = vld [vmem:[#allocation5 + $0x118] sm:$0xf] }
 0x19a   :  { %v7164_v16 = vld [vmem:[#allocation5 + $0x870] sm:$0xf0]  ;;  %3101 = vmatmul.bf16.vlgmr.msra.gmra.mxu1 %v10123_v60  ;;  %v9047_v11 = vld [vmem:[#allocation5 + $0x134] sm:$0xf0] }
 0x19b   :  { %v7167_v30 = vor.u32 %v9274_v13, %v7164_v16  ;;  %v9338_v32 = vld [vmem:[#allocation5 + $0xa54] sm:$0xf]  ;;  %3149 = vmatpush.bf16.msrb.mxu1 %v6339_v18  ;;  %3142 = vmatpush.bf16.msrb.mxu3 %v7647_v24  ;;  %v7074_v13 = vld [vmem:[#allocation5 + $0x798] sm:$0xf]  ;;  %v6243_v22 = vor.u32 %v9047_v11, %v6242_v20  ;;  %v10223_v11 = vpop.f32.mrf.mxu0 }
 0x19c   :  { %v7420_v33 = vld [vmem:[#allocation5 + $0xa70] sm:$0xf0]  ;;  %v9255_v16 = vld [vmem:[#allocation5 + $0x7b4] sm:$0xf0] }
 0x19d   :  { %v9266_v34 = vld [vmem:[#allocation5 + $0x814] sm:$0xf]  ;;  %v7423_v44 = vor.u32 %v9338_v32, %v7420_v33  ;;  %3113 = vmatpush.bf16.msra.mxu0 %v7167_v30  ;;  %v6786_v18 = vld [vmem:[#allocation5 + $0x558] sm:$0xf]  ;;  %v7075_v28 = vor.u32 %v9255_v16, %v7074_v13 }
 0x19e   :  { %v7132_v36 = vld [vmem:[#allocation5 + $0x830] sm:$0xf0]  ;;  %v6498_v24 = vld [vmem:[#allocation5 + $0x318] sm:$0xf]  ;;  %v6787_v32 = vor.u32 %v9183_v19, %v6786_v18 }
 0x19f   :  { %v7135_v49 = vor.u32 %v9266_v34, %v7132_v36  ;;  %v9330_v52 = vld [vmem:[#allocation5 + $0xa14] sm:$0xf]  ;;  %3163 = vmatpush.bf16.msra.mxu3 %v6595_v38  ;;  %3150 = vmatpush.bf16.msrb.mxu1 %v6307_v39  ;;  %v9039_v30 = vld [vmem:[#allocation5 + $0xf4] sm:$0xf0]  ;;  %v6499_v36 = vor.u32 %v9111_v27, %v6498_v24 }
 0x1a0   :  { %v7388_v56 = vld [vmem:[#allocation5 + $0xa30] sm:$0xf0]  ;;  %3127 = vmatpush.bf16.msrb.mxu2 %v7423_v44  ;;  %v7042_v33 = vld [vmem:[#allocation5 + $0x758] sm:$0xf]  ;;  %v6211_v40 = vor.u32 %v9039_v30, %v6210_v29  ;;  %v10219_v44 = vpop.f32.mrf.mxu2 }
 0x1a1   :  { %v7391_v63 = vor.u32 %v9330_v52, %v7388_v56  ;;  %3114 = vmatpush.bf16.msra.mxu0 %v7135_v49  ;;  %v9247_v34 = vld [vmem:[#allocation5 + $0x774] sm:$0xf0] }
 0x1a2   :  { %v6754_v38 = vld [vmem:[#allocation5 + $0x518] sm:$0xf]  ;;  %v7043_v46 = vor.u32 %v9247_v34, %v7042_v33 }
 0x1a3   :  { %3164 = vmatpush.bf16.msra.mxu3 %v6563_v62  ;;  %3151 = vmatpush.bf16.msrb.mxu1 %v6275_v1  ;;  %v9175_v39 = vld [vmem:[#allocation5 + $0x534] sm:$0xf0]  ;;  %v6179_v62 = vor.u32 %v9031_v48, %v6178_v0 }
 0x1a4   :  { %3128 = vmatpush.bf16.msrb.mxu2 %v7391_v63  ;;  %3115 = vmatmul.bf16.vlgmr.msra.gmra.mxu0 %v10135_v37  ;;  %v6755_v49 = vor.u32 %v9175_v39, %v6754_v38  ;;  %v7010_v52 = vld [vmem:[#allocation5 + $0x718] sm:$0xf] }
 0x1a5   :  { %3177 = vmatpush.bf16.msrb.mxu0 %v6851_v57  ;;  %v9239_v56 = vld [vmem:[#allocation5 + $0x734] sm:$0xf0]  ;;  %v6467_v57 = vor.u32 %v9103_v43, %v6466_v41 }
 0x1a6   :  { %v6722_v58 = vld [vmem:[#allocation5 + $0x4d8] sm:$0xf]  ;;  %v7011_v3 = vor.u32 %v9239_v56, %v7010_v52 }
 0x1a7   :  { %3129 = vmatmul.bf16.vlgmr.msrb.gmra.mxu2 %v10137_v42  ;;  %3165 = vmatpush.bf16.msra.mxu3 %v6531_v17  ;;  %v9167_v61 = vld [vmem:[#allocation5 + $0x4f4] sm:$0xf0] }
 0x1a8   :  { %3191 = vmatpush.bf16.msra.mxu2 %v7107_v10  ;;  %3152 = vmatpush.bf16.msrb.mxu1 %v6243_v22  ;;  %v6434_v1 = vld [vmem:[#allocation5 + $0x298] sm:$0xf]  ;;  %v6723_v5 = vor.u32 %v9167_v61, %v6722_v58  ;;  %v10225_v34 = vpop.f32.mrf.mxu2 }
 0x1a9   :  { %3178 = vmatpush.bf16.msrb.mxu0 %v6819_v12  ;;  %v9095_v2 = vld [vmem:[#allocation5 + $0x2b4] sm:$0xf0]  ;;  %7661 = vmatmul.msk.bf16.vlgmr.msrb.gmra.mxu3 %vm2557_vm0, %v10131_v50 }
 0x1aa   :  { %v6146_v63 = vld [vmem:[#allocation5 + $0x58] sm:$0xf]  ;;  %v6435_v12 = vor.u32 %v9095_v2, %v6434_v1 }
 0x1ab   :  { %3166 = vmatpush.bf16.msra.mxu3 %v6499_v36  ;;  %v9023_v4 = vld [vmem:[#allocation5 + $0x74] sm:$0xf0] }
 0x1ac   :  { %3192 = vmatpush.bf16.msra.mxu2 %v7075_v28  ;;  %3153 = vmatpush.bf16.msrb.mxu1 %v6211_v40  ;;  %v6978_v10 = vld [vmem:[#allocation5 + $0x6d8] sm:$0xf]  ;;  %v6147_v17 = vor.u32 %v9023_v4, %v6146_v63 }
 0x1ad   :  { %3179 = vmatpush.bf16.msrb.mxu0 %v6787_v32  ;;  %v9231_v20 = vld [vmem:[#allocation5 + $0x6f4] sm:$0xf0] }
 0x1ae   :  { %v6690_v13 = vld [vmem:[#allocation5 + $0x498] sm:$0xf]  ;;  %v6979_v22 = vor.u32 %v9231_v20, %v6978_v10 }
 0x1af   :  { %3167 = vmatpush.bf16.msra.mxu3 %v6467_v57  ;;  %v9159_v16 = vld [vmem:[#allocation5 + $0x4b4] sm:$0xf0] }
 0x1b0   :  { %3193 = vmatpush.bf16.msra.mxu2 %v7043_v46  ;;  %3154 = vmatpush.bf16.msrb.mxu1 %v6179_v62  ;;  %v6402_v18 = vld [vmem:[#allocation5 + $0x258] sm:$0xf]  ;;  %v6691_v29 = vor.u32 %v9159_v16, %v6690_v13 }
 0x1b1   :  { %3180 = vmatpush.bf16.msrb.mxu0 %v6755_v49  ;;  %v9087_v19 = vld [vmem:[#allocation5 + $0x274] sm:$0xf0] }
 0x1b2   :  { %v6114_v24 = vld [vmem:[#allocation5 + $0x18] sm:$0xf]  ;;  %v6403_v36 = vor.u32 %v9087_v19, %v6402_v18 }
 0x1b3   :  { %v9015_v27 = vld [vmem:[#allocation5 + $0x34] sm:$0xf0]  ;;  %3168 = vmatpush.bf16.msra.mxu3 %v6435_v12 }
 0x1b4   :  { %3194 = vmatpush.bf16.msra.mxu2 %v7011_v3  ;;  %v6946_v28 = vld [vmem:[#allocation5 + $0x698] sm:$0xf]  ;;  %3155 = vmatpush.bf16.msrb.mxu1 %v6147_v17  ;;  %v6115_v40 = vor.u32 %v9015_v27, %v6114_v24  ;;  %v10229_v24 = vpop.f32.mrf.mxu2 }
 0x1b5   :  { %3181 = vmatpush.bf16.msrb.mxu0 %v6723_v5  ;;  %v9223_v30 = vld [vmem:[#allocation5 + $0x6b4] sm:$0xf0]  ;;  %v10227_v5 = vpop.f32.mrf.mxu0 }
 0x1b6   :  { %v7362_v32 = vld [vmem:[#allocation5 + $0x9d8] sm:$0xf]  ;;  %v6947_v46 = vor.u32 %v9223_v30, %v6946_v28  ;;  %v9067_v28 = vld [vmem:[#allocation5 + $0x1dc] sm:$0xf] }
 0x1b7   :  { %v9327_v33 = vld [vmem:[#allocation5 + $0x9f4] sm:$0xf0]  ;;  %3169 = vmatpush.bf16.msra.mxu3 %v6403_v36 }
 0x1b8   :  { %v6658_v38 = vld [vmem:[#allocation5 + $0x458] sm:$0xf]  ;;  %3195 = vmatpush.bf16.msra.mxu2 %v6979_v22  ;;  %v7363_v0 = vor.u32 %v9327_v33, %v7362_v32  ;;  %3156 = vmatpush.bf16.msrb.mxu1 %v6115_v40  ;;  %v9131_v32 = vld [vmem:[#allocation5 + $0x3dc] sm:$0xf] }
 0x1b9   :  { %v9151_v39 = vld [vmem:[#allocation5 + $0x474] sm:$0xf0]  ;;  %3182 = vmatpush.bf16.msrb.mxu0 %v6691_v29  ;;  %v6340_v29 = vld [vmem:[#allocation5 + $0x1f8] sm:$0xf0] }
 0x1ba   :  { %v6370_v41 = vld [vmem:[#allocation5 + $0x218] sm:$0xf]  ;;  %v6659_v56 = vor.u32 %v9151_v39, %v6658_v38  ;;  %v6596_v33 = vld [vmem:[#allocation5 + $0x3f8] sm:$0xf0] }
 0x1bb   :  { %v9079_v43 = vld [vmem:[#allocation5 + $0x234] sm:$0xf0]  ;;  %3157 = vmatmul.bf16.vlgmr.msrb.gmra.mxu1 %v10121_v55 }
 0x1bc   :  { %v7618_v48 = vld [vmem:[#allocation5 + $0xbd8] sm:$0xf]  ;;  %v6371_v62 = vor.u32 %v9079_v43, %v6370_v41  ;;  %3196 = vmatpush.bf16.msra.mxu2 %v6947_v46  ;;  %3205 = vmatpush.bf16.msra.mxu1 %v7363_v0  ;;  %v6343_v41 = vor.u32 %v9067_v28, %v6340_v29  ;;  %v10233_v0 = vpop.f32.mrf.mxu3 }
 0x1bd   :  { %v9391_v49 = vld [vmem:[#allocation5 + $0xbf4] sm:$0xf0]  ;;  %3183 = vmatpush.bf16.msrb.mxu0 %v6659_v56 }
 0x1be   :  { %v6914_v52 = vld [vmem:[#allocation5 + $0x658] sm:$0xf]  ;;  %v7619_v3 = vor.u32 %v9391_v49, %v7618_v48  ;;  %3170 = vmatpush.bf16.msra.mxu3 %v6371_v62  ;;  %v6599_v48 = vor.u32 %v9131_v32, %v6596_v33  ;;  %v9059_v49 = vld [vmem:[#allocation5 + $0x19c] sm:$0xf] }
 0x1bf   :  { %v9215_v57 = vld [vmem:[#allocation5 + $0x674] sm:$0xf0] }
 0x1c0   :  { %v7330_v58 = vld [vmem:[#allocation5 + $0x998] sm:$0xf]  ;;  %v6915_v10 = vor.u32 %v9215_v57, %v6914_v52  ;;  %v6308_v52 = vld [vmem:[#allocation5 + $0x1b8] sm:$0xf0] }
 0x1c1   :  { %v9319_v61 = vld [vmem:[#allocation5 + $0x9b4] sm:$0xf0]  ;;  %3171 = vmatmul.bf16.vlgmr.msra.gmra.mxu3 %v10127_v8  ;;  %v9123_v57 = vld [vmem:[#allocation5 + $0x39c] sm:$0xf] }
 0x1c2   :  { %v6626_v1 = vld [vmem:[#allocation5 + $0x418] sm:$0xf]  ;;  %v7331_v20 = vor.u32 %v9319_v61, %v7330_v58  ;;  %3219 = vmatpush.bf16.msrb.mxu3 %v7619_v3  ;;  %3197 = vmatpush.bf16.msra.mxu2 %v6915_v10  ;;  %v6564_v58 = vld [vmem:[#allocation5 + $0x3b8] sm:$0xf0]  ;;  %v6311_v3 = vor.u32 %v9059_v49, %v6308_v52  ;;  %v10238_v10 = vpop.f32.mrf.mxu0 }
 0x1c3   :  { %v9143_v2 = vld [vmem:[#allocation5 + $0x434] sm:$0xf0] }
 0x1c4   :  { %v7650_v63 = vld [vmem:[#allocation5 + $0xc18] sm:$0xf]  ;;  %v6627_v17 = vor.u32 %v9143_v2, %v6626_v1  ;;  %3206 = vmatpush.bf16.msra.mxu1 %v7331_v20  ;;  %v10235_v2 = vpop.f32.mrf.mxu1  ;;  %v6567_v20 = vor.u32 %v9123_v57, %v6564_v58  ;;  %v10243_v33 = vpop.f32.mrf.mxu3 }
 0x1c5   :  { %v9399_v4 = vld [vmem:[#allocation5 + $0xc34] sm:$0xf0] }
 0x1c6   :  { %v7586_v12 = vld [vmem:[#allocation5 + $0xb98] sm:$0xf]  ;;  %v7651_v27 = vor.u32 %v9399_v4, %v7650_v63  ;;  %3184 = vmatpush.bf16.msrb.mxu0 %v6627_v17  ;;  %v9115_v17 = vld [vmem:[#allocation5 + $0x35c] sm:$0xf] }
 0x1c7   :  { %v9383_v13 = vld [vmem:[#allocation5 + $0xbb4] sm:$0xf0] }
 0x1c8   :  { %v6882_v16 = vld [vmem:[#allocation5 + $0x618] sm:$0xf]  ;;  %v7587_v30 = vor.u32 %v9383_v13, %v7586_v12  ;;  %v9051_v12 = vld [vmem:[#allocation5 + $0x15c] sm:$0xf] }
 0x1c9   :  { %v9207_v18 = vld [vmem:[#allocation5 + $0x634] sm:$0xf0]  ;;  %3185 = vmatmul.bf16.vlgmr.msrb.gmra.mxu0 %v10119_v54  ;;  %v6276_v13 = vld [vmem:[#allocation5 + $0x178] sm:$0xf0] }
 0x1ca   :  { %v7298_v19 = vld [vmem:[#allocation5 + $0x958] sm:$0xf]  ;;  %v6883_v36 = vor.u32 %v9207_v18, %v6882_v16  ;;  %3240 = vmatpush.bf16.msra.mxu0 %v7651_v27  ;;  %3220 = vmatpush.bf16.msrb.mxu3 %v7587_v30  ;;  %v6532_v18 = vld [vmem:[#allocation5 + $0x378] sm:$0xf0]  ;;  %v6279_v29 = vor.u32 %v9051_v12, %v6276_v13 }
 0x1cb   :  { %v9311_v22 = vld [vmem:[#allocation5 + $0x974] sm:$0xf0] }
 0x1cc   :  { %v7299_v38 = vor.u32 %v9311_v22, %v7298_v19  ;;  %v7554_v39 = vld [vmem:[#allocation5 + $0xb58] sm:$0xf]  ;;  %3198 = vmatpush.bf16.msra.mxu2 %v6883_v36  ;;  %v10241_v19 = vpop.f32.mrf.mxu2  ;;  %v6535_v36 = vor.u32 %v9115_v17, %v6532_v18  ;;  %v10245_v52 = vpop.f32.mrf.mxu1 }
 0x1cd   :  { %v9375_v40 = vld [vmem:[#allocation5 + $0xb74] sm:$0xf0] }
 0x1ce   :  { %v7266_v43 = vld [vmem:[#allocation5 + $0x918] sm:$0xf]  ;;  %v7555_v56 = vor.u32 %v9375_v40, %v7554_v39  ;;  %3207 = vmatpush.bf16.msra.mxu1 %v7299_v38  ;;  %3261 = vmatpush.bf16.msrb.mxu0 %v6599_v48  ;;  %v9043_v38 = vld [vmem:[#allocation5 + $0x11c] sm:$0xf] }
 0x1cf   :  { %v9303_v46 = vld [vmem:[#allocation5 + $0x934] sm:$0xf0]  ;;  %3199 = vmatmul.bf16.vlgmr.msra.gmra.mxu2 %v10123_v60  ;;  %v6244_v39 = vld [vmem:[#allocation5 + $0x138] sm:$0xf0] }
 0x1d0   :  { %v7267_v61 = vor.u32 %v9303_v46, %v7266_v43  ;;  %v7522_v62 = vld [vmem:[#allocation5 + $0xb18] sm:$0xf]  ;;  %3247 = vmatpush.bf16.msrb.mxu2 %v6343_v41  ;;  %3221 = vmatpush.bf16.msrb.mxu3 %v7555_v56  ;;  %v9107_v41 = vld [vmem:[#allocation5 + $0x31c] sm:$0xf]  ;;  %v6247_v56 = vor.u32 %v9043_v38, %v6244_v39 }
 0x1d1   :  { %v9367_v1 = vld [vmem:[#allocation5 + $0xb34] sm:$0xf0]  ;;  %v6500_v43 = vld [vmem:[#allocation5 + $0x338] sm:$0xf0] }
 0x1d2   :  { %v7234_v63 = vld [vmem:[#allocation5 + $0x8d8] sm:$0xf]  ;;  %v7523_v16 = vor.u32 %v9367_v1, %v7522_v62  ;;  %3208 = vmatpush.bf16.msra.mxu1 %v7267_v61  ;;  %3262 = vmatpush.bf16.msrb.mxu0 %v6567_v20  ;;  %v10247_v61 = vpop.f32.mrf.mxu0  ;;  %v6503_v62 = vor.u32 %v9107_v41, %v6500_v43  ;;  %v9035_v1 = vld [vmem:[#allocation5 + $0xdc] sm:$0xf]  ;;  %v10251_v41 = vpop.f32.mrf.mxu3 }
 0x1d3   :  { %v9295_v4 = vld [vmem:[#allocation5 + $0x8f4] sm:$0xf0]  ;;  %10515 = vst [vmem:[#allocation25_spill] sm:$0xff] %v10247_v61  ;;  %v6468_v20 = vld [vmem:[#allocation5 + $0x2f8] sm:$0xf0] }
 0x1d4   :  { %v7235_v22 = vor.u32 %v9295_v4, %v7234_v63  ;;  %v7490_v27 = vld [vmem:[#allocation5 + $0xad8] sm:$0xf]  ;;  %3248 = vmatpush.bf16.msrb.mxu2 %v6311_v3  ;;  %3222 = vmatpush.bf16.msrb.mxu3 %v7523_v16  ;;  %v6212_v3 = vld [vmem:[#allocation5 + $0xf8] sm:$0xf0]  ;;  %v10249_v12 = vpop.f32.mrf.mxu2 }
 0x1d5   :  { %v9359_v28 = vld [vmem:[#allocation5 + $0xaf4] sm:$0xf0]  ;;  %v9099_v4 = vld [vmem:[#allocation5 + $0x2dc] sm:$0xf]  ;;  %10516 = vst [vmem:[#allocation26_spill] sm:$0xff] %v10249_v12  ;;  %v6215_v18 = vor.u32 %v9035_v1, %v6212_v3 }
 0x1d6   :  { %v7202_v30 = vld [vmem:[#allocation5 + $0x898] sm:$0xf]  ;;  %v7491_v40 = vor.u32 %v9359_v28, %v7490_v27  ;;  %3209 = vmatpush.bf16.msra.mxu1 %v7235_v22  ;;  %3263 = vmatpush.bf16.msrb.mxu0 %v6535_v36  ;;  %v9027_v28 = vld [vmem:[#allocation5 + $0x9c] sm:$0xf]  ;;  %v7906_v12 = vld [vmem:[#allocation8 + $0x1e0] sm:$0xf] }
 0x1d7   :  { %v9287_v32 = vld [vmem:[#allocation5 + $0x8b4] sm:$0xf0]  ;;  %v6852_v36 = vld [vmem:[#allocation5 + $0x5f8] sm:$0xf0] }
 0x1d8   :  { %v7203_v46 = vor.u32 %v9287_v32, %v7202_v30  ;;  %v7458_v48 = vld [vmem:[#allocation5 + $0xa98] sm:$0xf]  ;;  %3249 = vmatpush.bf16.msrb.mxu2 %v6279_v29  ;;  %3223 = vmatpush.bf16.msrb.mxu3 %v7491_v40  ;;  %v6471_v29 = vor.u32 %v9099_v4, %v6468_v20  ;;  %v6180_v30 = vld [vmem:[#allocation5 + $0xb8] sm:$0xf0]  ;;  %v10255_v20 = vpop.f32.mrf.mxu1 }
 0x1d9   :  { %v9351_v49 = vld [vmem:[#allocation5 + $0xab4] sm:$0xf0]  ;;  %v9195_v32 = vld [vmem:[#allocation5 + $0x5dc] sm:$0xf]  ;;  %7662 = vmatmul.msk.bf16.vlgmr.msra.gmra.mxu0 %vm2557_vm0, %v10131_v50 }
 0x1da   :  { %v7170_v57 = vld [vmem:[#allocation5 + $0x858] sm:$0xf]  ;;  %v7459_v63 = vor.u32 %v9351_v49, %v7458_v48  ;;  %3210 = vmatpush.bf16.msra.mxu1 %v7203_v46  ;;  %3264 = vmatpush.bf16.msrb.mxu0 %v6503_v62  ;;  %v9091_v39 = vld [vmem:[#allocation5 + $0x29c] sm:$0xf]  ;;  %v6183_v49 = vor.u32 %v9027_v28, %v6180_v30 }
 0x1db   :  { %v9279_v58 = vld [vmem:[#allocation5 + $0x874] sm:$0xf0]  ;;  %v6436_v40 = vld [vmem:[#allocation5 + $0x2b8] sm:$0xf0] }
 0x1dc   :  { %v7171_v13 = vor.u32 %v9279_v58, %v7170_v57  ;;  %v7426_v16 = vld [vmem:[#allocation5 + $0xa58] sm:$0xf]  ;;  %3250 = vmatpush.bf16.msrb.mxu2 %v6247_v56  ;;  %3224 = vmatpush.bf16.msrb.mxu3 %v7459_v63  ;;  %v6855_v56 = vor.u32 %v9195_v32, %v6852_v36  ;;  %v9259_v57 = vld [vmem:[#allocation5 + $0x7dc] sm:$0xf]  ;;  %v6439_v1 = vor.u32 %v9091_v39, %v6436_v40 }
 0x1dd   :  { %v9343_v17 = vld [vmem:[#allocation5 + $0xa74] sm:$0xf0]  ;;  %v7108_v58 = vld [vmem:[#allocation5 + $0x7f8] sm:$0xf0] }
 0x1de   :  { %v7138_v22 = vld [vmem:[#allocation5 + $0x818] sm:$0xf]  ;;  %v7427_v38 = vor.u32 %v9343_v17, %v7426_v16  ;;  %3211 = vmatpush.bf16.msra.mxu1 %v7171_v13  ;;  %v9019_v62 = vld [vmem:[#allocation5 + $0x5c] sm:$0xf]  ;;  %3265 = vmatpush.bf16.msrb.mxu0 %v6471_v29 }
 0x1df   :  { %v9271_v27 = vld [vmem:[#allocation5 + $0x834] sm:$0xf0]  ;;  %v6148_v3 = vld [vmem:[#allocation5 + $0x78] sm:$0xf0] }
 0x1e0   :  { %v7139_v43 = vor.u32 %v9271_v27, %v7138_v22  ;;  %v7394_v46 = vld [vmem:[#allocation5 + $0xa18] sm:$0xf]  ;;  %3251 = vmatpush.bf16.msrb.mxu2 %v6215_v18  ;;  %v9187_v63 = vld [vmem:[#allocation5 + $0x59c] sm:$0xf]  ;;  %3225 = vmatpush.bf16.msrb.mxu3 %v7427_v38  ;;  %v10257_v18 = vpop.f32.mrf.mxu0  ;;  %v10259_v22 = vpop.f32.mrf.mxu2  ;;  %v7111_v27 = vor.u32 %v9259_v57, %v7108_v58  ;;  %v6151_v29 = vor.u32 %v9019_v62, %v6148_v3 }
 0x1e1   :  { %v9335_v48 = vld [vmem:[#allocation5 + $0xa34] sm:$0xf0]  ;;  %v6820_v4 = vld [vmem:[#allocation5 + $0x5b8] sm:$0xf0]  ;;  %10517 = vst [vmem:[#allocation27_spill] sm:$0xff] %v10257_v18  ;;  %v10262_v57 = vpop.f32.mrf.mxu3 }
 0x1e2   :  { %v7395_v13 = vor.u32 %v9335_v48, %v7394_v46  ;;  %v9083_v16 = vld [vmem:[#allocation5 + $0x25c] sm:$0xf]  ;;  %3212 = vmatpush.bf16.msra.mxu1 %v7139_v43  ;;  %v6823_v30 = vor.u32 %v9187_v63, %v6820_v4  ;;  %3266 = vmatpush.bf16.msrb.mxu0 %v6439_v1  ;;  %10518 = vst [vmem:[#allocation28_spill] sm:$0xff] %v10262_v57 }
 0x1e3   :  { %v6404_v17 = vld [vmem:[#allocation5 + $0x278] sm:$0xf0] }
 0x1e4   :  { %v9251_v28 = vld [vmem:[#allocation5 + $0x79c] sm:$0xf]  ;;  %3252 = vmatpush.bf16.msrb.mxu2 %v6183_v49  ;;  %v6407_v40 = vor.u32 %v9083_v16, %v6404_v17  ;;  %3226 = vmatpush.bf16.msrb.mxu3 %v7395_v13 }
 0x1e5   :  { %v7076_v32 = vld [vmem:[#allocation5 + $0x7b8] sm:$0xf0]  ;;  %3213 = vmatmul.bf16.vlgmr.msra.gmra.mxu1 %v10135_v37 }
 0x1e6   :  { %3275 = vmatpush.bf16.msrb.mxu1 %v6855_v56  ;;  %v9011_v36 = vld [vmem:[#allocation5 + $0x1c] sm:$0xf]  ;;  %v7079_v49 = vor.u32 %v9251_v28, %v7076_v32  ;;  %3267 = vmatpush.bf16.msrb.mxu0 %v6407_v40 }
 0x1e7   :  { %v6116_v39 = vld [vmem:[#allocation5 + $0x38] sm:$0xf0]  ;;  %3227 = vmatmul.bf16.vlgmr.msrb.gmra.mxu3 %v10137_v42 }
 0x1e8   :  { %v9075_v38 = vld [vmem:[#allocation5 + $0x21c] sm:$0xf]  ;;  %3289 = vmatpush.bf16.msra.mxu3 %v7111_v27  ;;  %3253 = vmatpush.bf16.msrb.mxu2 %v6151_v29  ;;  %v6119_v62 = vor.u32 %v9011_v36, %v6116_v39  ;;  %v10265_v27 = vpop.f32.mrf.mxu1  ;;  %v10267_v40 = vpop.f32.mrf.mxu0 }
 0x1e9   :  { %v9179_v46 = vld [vmem:[#allocation5 + $0x55c] sm:$0xf]  ;;  %v6375_v4 = vor.u32 %v9075_v38, %v6372_v51  ;;  %10519 = vst [vmem:[#allocation29_spill] sm:$0xff] %v10265_v27  ;;  %v10269_v51 = vpop.f32.mrf.mxu2 }
 0x1ea   :  { %v6788_v48 = vld [vmem:[#allocation5 + $0x578] sm:$0xf0]  ;;  %3276 = vmatpush.bf16.msrb.mxu1 %v6823_v30  ;;  %10520 = vst [vmem:[#allocation30_spill] sm:$0xff] %v10269_v51 }
 0x1eb   :  { %v7364_v43 = vld [vmem:[#allocation5 + $0x9f8] sm:$0xf0]  ;;  %v6791_v1 = vor.u32 %v9179_v46, %v6788_v48  ;;  %3268 = vmatpush.bf16.msrb.mxu0 %v6375_v4  ;;  %v10273_v4 = vpop.f32.mrf.mxu3 }
 0x1ec   :  { %v9387_v56 = vld [vmem:[#allocation5 + $0xbdc] sm:$0xf]  ;;  %v7367_v13 = vor.u32 %v9323_v15, %v7364_v43  ;;  %3290 = vmatpush.bf16.msra.mxu3 %v7079_v49  ;;  %3254 = vmatpush.bf16.msrb.mxu2 %v6119_v62  ;;  %10521 = vst [vmem:[#allocation31_spill] sm:$0xff] %v10273_v4 }
 0x1ed   :  { %v7620_v58 = vld [vmem:[#allocation5 + $0xbf8] sm:$0xf0] }
 0x1ee   :  { %v9243_v3 = vld [vmem:[#allocation5 + $0x75c] sm:$0xf]  ;;  %v7623_v61 = vor.u32 %v9387_v56, %v7620_v58  ;;  %3277 = vmatpush.bf16.msrb.mxu1 %v6791_v1  ;;  %3269 = vmatmul.bf16.vlgmr.msrb.gmra.mxu0 %v10127_v8 }
 0x1ef   :  { %v7044_v63 = vld [vmem:[#allocation5 + $0x778] sm:$0xf0]  ;;  %3255 = vmatmul.bf16.vlgmr.msrb.gmra.mxu2 %v10121_v55 }
 0x1f0   :  { %v9171_v16 = vld [vmem:[#allocation5 + $0x51c] sm:$0xf]  ;;  %v7047_v28 = vor.u32 %v9243_v3, %v7044_v63  ;;  %3303 = vmatpush.bf16.msra.mxu2 %v7367_v13  ;;  %3317 = vmatpush.bf16.msra.mxu0 %v7623_v61 }
 0x1f1   :  { %v6756_v17 = vld [vmem:[#allocation5 + $0x538] sm:$0xf0] }
 0x1f2   :  { %v9315_v18 = vld [vmem:[#allocation5 + $0x99c] sm:$0xf]  ;;  %v6759_v32 = vor.u32 %v9171_v16, %v6756_v17  ;;  %3291 = vmatpush.bf16.msra.mxu3 %v7047_v28 }
 0x1f3   :  { %v7332_v57 = vld [vmem:[#allocation5 + $0x9b8] sm:$0xf0] }
 0x1f4   :  { %v9379_v29 = vld [vmem:[#allocation5 + $0xb9c] sm:$0xf]  ;;  %v7335_v15 = vor.u32 %v9315_v18, %v7332_v57  ;;  %3278 = vmatpush.bf16.msrb.mxu1 %v6759_v32 }
 0x1f5   :  { %v7588_v30 = vld [vmem:[#allocation5 + $0xbb8] sm:$0xf0] }
 0x1f6   :  { %v9235_v36 = vld [vmem:[#allocation5 + $0x71c] sm:$0xf]  ;;  %v7591_v48 = vor.u32 %v9379_v29, %v7588_v30  ;;  %3304 = vmatpush.bf16.msra.mxu2 %v7335_v15 }
 0x1f7   :  { %v7012_v39 = vld [vmem:[#allocation5 + $0x738] sm:$0xf0] }
 0x1f8   :  { %v9163_v38 = vld [vmem:[#allocation5 + $0x4dc] sm:$0xf]  ;;  %v7015_v56 = vor.u32 %v9235_v36, %v7012_v39  ;;  %3318 = vmatpush.bf16.msra.mxu0 %v7591_v48  ;;  %v10275_v39 = vpop.f32.mrf.mxu1 }
 0x1f9   :  { %v6724_v46 = vld [vmem:[#allocation5 + $0x4f8] sm:$0xf0] }
 0x1fa   :  { %v9307_v43 = vld [vmem:[#allocation5 + $0x95c] sm:$0xf]  ;;  %v6727_v1 = vor.u32 %v9163_v38, %v6724_v46  ;;  %3292 = vmatpush.bf16.msra.mxu3 %v7015_v56  ;;  %v10279_v56 = vpop.f32.mrf.mxu2 }
 0x1fb   :  { %v7300_v49 = vld [vmem:[#allocation5 + $0x978] sm:$0xf0]  ;;  %10522 = vst [vmem:[#allocation32_spill] sm:$0xff] %v10279_v56 }
 0x1fc   :  { %v9371_v58 = vld [vmem:[#allocation5 + $0xb5c] sm:$0xf]  ;;  %v7303_v18 = vor.u32 %v9307_v43, %v7300_v49  ;;  %3279 = vmatpush.bf16.msrb.mxu1 %v6727_v1  ;;  %v10277_v49 = vpop.f32.mrf.mxu0 }
 0x1fd   :  { %v7556_v62 = vld [vmem:[#allocation5 + $0xb78] sm:$0xf0] }
 0x1fe   :  { %v9227_v3 = vld [vmem:[#allocation5 + $0x6dc] sm:$0xf]  ;;  %v7559_v13 = vor.u32 %v9371_v58, %v7556_v62  ;;  %3305 = vmatpush.bf16.msra.mxu2 %v7303_v18  ;;  %v10281_v18 = vpop.f32.mrf.mxu3 }
 0x1ff   :  { %v6980_v63 = vld [vmem:[#allocation5 + $0x6f8] sm:$0xf0] }
 0x200   :  { %v9155_v61 = vld [vmem:[#allocation5 + $0x49c] sm:$0xf]  ;;  %v6983_v55 = vor.u32 %v9227_v3, %v6980_v63  ;;  %3319 = vmatpush.bf16.msra.mxu0 %v7559_v13  ;;  %v10286_v14 = vpop.f32.mrf.mxu1 }
 0x201   :  { %v6692_v57 = vld [vmem:[#allocation5 + $0x4b8] sm:$0xf0] }
 0x202   :  { %v9299_v16 = vld [vmem:[#allocation5 + $0x91c] sm:$0xf]  ;;  %v6695_v30 = vor.u32 %v9155_v61, %v6692_v57  ;;  %3293 = vmatpush.bf16.msra.mxu3 %v6983_v55 }
 0x203   :  { %v7268_v17 = vld [vmem:[#allocation5 + $0x938] sm:$0xf0] }
 0x204   :  { %v9363_v28 = vld [vmem:[#allocation5 + $0xb1c] sm:$0xf]  ;;  %v7271_v8 = vor.u32 %v9299_v16, %v7268_v17  ;;  %3280 = vmatpush.bf16.msrb.mxu1 %v6695_v30  ;;  %v10523_v30 = vperm.slane %v10157_v6, 0  ;;  %v10288_v27 = vpop.f32.mrf.mxu0 }
 0x205   :  { %v7524_v29 = vld [vmem:[#allocation5 + $0xb38] sm:$0xf0] }
 0x206   :  { %v9219_v32 = vld [vmem:[#allocation5 + $0x69c] sm:$0xf]  ;;  %v7527_v46 = vor.u32 %v9363_v28, %v7524_v29  ;;  %3306 = vmatpush.bf16.msra.mxu2 %v7271_v8 }
 0x207   :  { %v6948_v36 = vld [vmem:[#allocation5 + $0x6b8] sm:$0xf0] }
 0x208   :  { %v9147_v15 = vld [vmem:[#allocation5 + $0x45c] sm:$0xf]  ;;  %v6951_v58 = vor.u32 %v9219_v32, %v6948_v36  ;;  %3320 = vmatpush.bf16.msra.mxu0 %v7527_v46 }
 0x209   :  { %v6660_v38 = vld [vmem:[#allocation5 + $0x478] sm:$0xf0] }
 0x20a   :  { %v9291_v48 = vld [vmem:[#allocation5 + $0x8dc] sm:$0xf]  ;;  %v6663_v3 = vor.u32 %v9147_v15, %v6660_v38  ;;  %3294 = vmatpush.bf16.msra.mxu3 %v6951_v58  ;;  %v2573_v15 = vadd.f32 %v10168_v53, %v10523_v30  ;;  %v9462_v58 = vld [vmem:[#allocation8 + $0x1ec] sm:$0xf0] }
 0x20b   :  { %v7236_v43 = vld [vmem:[#allocation5 + $0x8f8] sm:$0xf0] }
 0x20c   :  { %v9355_v62 = vld [vmem:[#allocation5 + $0xadc] sm:$0xf]  ;;  %v7239_v57 = vor.u32 %v9291_v48, %v7236_v43  ;;  %3281 = vmatpush.bf16.msrb.mxu1 %v6663_v3  ;;  %v7778_v43 = vld [vmem:[#allocation8 + $0xe0] sm:$0xf] }
 0x20d   :  { %v7492_v1 = vld [vmem:[#allocation5 + $0xaf8] sm:$0xf0] }
 0x20e   :  { %v9211_v63 = vld [vmem:[#allocation5 + $0x65c] sm:$0xf]  ;;  %v7495_v28 = vor.u32 %v9355_v62, %v7492_v1  ;;  %3307 = vmatpush.bf16.msra.mxu2 %v7239_v57  ;;  %v9430_v1 = vld [vmem:[#allocation8 + $0xec] sm:$0xf0]  ;;  %v7907_v57 = vor.u32 %v9462_v58, %v7906_v12 }
 0x20f   :  { %v6916_v61 = vld [vmem:[#allocation5 + $0x678] sm:$0xf0]  ;;  %v7779_v30 = vor.u32 %v9430_v1, %v7778_v43  ;;  %v8034_v43 = vld [vmem:[#allocation8 + $0x2e0] sm:$0xf]  ;;  %v9526_v1 = vld [vmem:[#allocation8 + $0x3ec] sm:$0xf0] }
 0x210   :  { %v9139_v13 = vld [vmem:[#allocation5 + $0x41c] sm:$0xf]  ;;  %v6919_v55 = vor.u32 %v9211_v63, %v6916_v61  ;;  %3321 = vmatpush.bf16.msra.mxu0 %v7495_v28  ;;  %v9426_v28 = vld [vmem:[#allocation8 + $0xcc] sm:$0xf0] }
 0x211   :  { %v6628_v16 = vld [vmem:[#allocation5 + $0x438] sm:$0xf0] }
 0x212   :  { %v9283_v17 = vld [vmem:[#allocation5 + $0x89c] sm:$0xf]  ;;  %v6631_v38 = vor.u32 %v9139_v13, %v6628_v16  ;;  %3295 = vmatpush.bf16.msra.mxu3 %v6919_v55  ;;  %v2587_v16 = vadd.f32 %v10171_v59, %v2573_v15 }
 0x213   :  { %v7204_v29 = vld [vmem:[#allocation5 + $0x8b8] sm:$0xf0] }
 0x214   :  { %v9395_v51 = vld [vmem:[#allocation5 + $0xc1c] sm:$0xf]  ;;  %v7207_v46 = vor.u32 %v9283_v17, %v7204_v29  ;;  %3282 = vmatpush.bf16.msrb.mxu1 %v6631_v38  ;;  %v7762_v17 = vld [vmem:[#allocation8 + $0xc0] sm:$0xf]  ;;  %v10296_v38 = vpop.f32.mrf.mxu3 }
 0x215   :  { %v7652_v56 = vld [vmem:[#allocation5 + $0xc38] sm:$0xf0]  ;;  %v7890_v29 = vld [vmem:[#allocation8 + $0x1c0] sm:$0xf] }
 0x216   :  { %v9347_v32 = vld [vmem:[#allocation5 + $0xa9c] sm:$0xf]  ;;  %v7655_v62 = vor.u32 %v9395_v51, %v7652_v56  ;;  %v10291_v51 = vpop.f32.mrf.mxu2  ;;  %3308 = vmatpush.bf16.msra.mxu2 %v7207_v46  ;;  %v2601_v46 = vadd.f32 %v10166_v21, %v2587_v16  ;;  %v10302_v21 = vpop.f32.mrf.mxu1 }
 0x217   :  { %v7460_v36 = vld [vmem:[#allocation5 + $0xab8] sm:$0xf0]  ;;  %3283 = vmatmul.bf16.vlgmr.msrb.gmra.mxu1 %v10119_v54 }
 0x218   :  { %v9203_v8 = vld [vmem:[#allocation5 + $0x61c] sm:$0xf]  ;;  %v7463_v63 = vor.u32 %v9347_v32, %v7460_v36  ;;  %3338 = vmatpush.bf16.msra.mxu1 %v7655_v62  ;;  %v9458_v32 = vld [vmem:[#allocation8 + $0x1cc] sm:$0xf0]  ;;  %v10524_v36 = vperm.slane %v10157_v6, 1  ;;  %v7763_v6 = vor.u32 %v9426_v28, %v7762_v17  ;;  %v2615_v17 = vadd.f32 %v10176_v25, %v2601_v46 }
 0x219   :  { %v6884_v48 = vld [vmem:[#allocation5 + $0x638] sm:$0xf0]  ;;  %v7891_v62 = vor.u32 %v9458_v32, %v7890_v29  ;;  %v8146_v28 = vld [vmem:[#allocation8 + $0x3c0] sm:$0xf]  ;;  %v9522_v29 = vld [vmem:[#allocation8 + $0x3cc] sm:$0xf0]  ;;  %v10308_v32 = vpop.f32.mrf.mxu0 }
 0x21a   :  { %v9275_v61 = vld [vmem:[#allocation5 + $0x85c] sm:$0xf]  ;;  %v6887_v53 = vor.u32 %v9203_v8, %v6884_v48  ;;  %v2671_v55 = vadd.f32 %v10196_v31, %v10524_v36  ;;  %3322 = vmatpush.bf16.msra.mxu0 %v7463_v63  ;;  %v8162_v31 = vld [vmem:[#allocation8 + $0x3e0] sm:$0xf]  ;;  %v9454_v36 = vld [vmem:[#allocation8 + $0x1ac] sm:$0xf0] }
 0x21b   :  { %v7172_v4 = vld [vmem:[#allocation5 + $0x878] sm:$0xf0]  ;;  %v7746_v63 = vld [vmem:[#allocation8 + $0xa0] sm:$0xf]  ;;  %v8163_v16 = vor.u32 %v9526_v1, %v8162_v31  ;;  %v8147_v31 = vor.u32 %v9522_v29, %v8146_v28  ;;  %v9482_v28 = vld [vmem:[#allocation8 + $0x28c] sm:$0xf0] }
 0x21c   :  { %v9339_v3 = vld [vmem:[#allocation5 + $0xa5c] sm:$0xf]  ;;  %v7175_v56 = vor.u32 %v9275_v61, %v7172_v4  ;;  %3296 = vmatpush.bf16.msra.mxu3 %v6887_v53  ;;  %v9494_v4 = vld [vmem:[#allocation8 + $0x2ec] sm:$0xf0]  ;;  %4929 = vmatpush.bf16.msrb.mxu1 %v7907_v57  ;;  %v8002_v1 = vld [vmem:[#allocation8 + $0x2a0] sm:$0xf] }
 0x21d   :  { %v7428_v13 = vld [vmem:[#allocation5 + $0xa78] sm:$0xf0]  ;;  %v9422_v61 = vld [vmem:[#allocation8 + $0xac] sm:$0xf0]  ;;  %v8035_v53 = vor.u32 %v9494_v4, %v8034_v43  ;;  %v7858_v43 = vld [vmem:[#allocation8 + $0x180] sm:$0xf] }
 0x21e   :  { %v7431_v8 = vor.u32 %v9339_v3, %v7428_v13  ;;  %v9267_v48 = vld [vmem:[#allocation5 + $0x81c] sm:$0xf]  ;;  %3309 = vmatpush.bf16.msra.mxu2 %v7175_v56  ;;  %v2685_v3 = vadd.f32 %v10200_v45, %v2671_v55  ;;  %v7874_v13 = vld [vmem:[#allocation8 + $0x1a0] sm:$0xf]  ;;  %v9490_v57 = vld [vmem:[#allocation8 + $0x2cc] sm:$0xf0]  ;;  %v7747_v56 = vor.u32 %v9422_v61, %v7746_v63 }
 0x21f   :  { %v7140_v59 = vld [vmem:[#allocation5 + $0x838] sm:$0xf0]  ;;  %3297 = vmatmul.bf16.vlgmr.msra.gmra.mxu3 %v10123_v60  ;;  %v10305_v45 = vld [vmem:[#allocation7] sm:$0xff]  ;;  %v7875_v55 = vor.u32 %v9454_v36, %v7874_v13  ;;  %v9450_v4 = vld [vmem:[#allocation8 + $0x18c] sm:$0xf0] }
 0x220   :  { %v9331_v15 = vld [vmem:[#allocation5 + $0xa1c] sm:$0xf]  ;;  %4915 = vmatpush.bf16.msrb.mxu3 %v7779_v30  ;;  %v7143_v58 = vor.u32 %v9267_v48, %v7140_v59  ;;  %3323 = vmatpush.bf16.msra.mxu0 %v7431_v8  ;;  %v8018_v30 = vld [vmem:[#allocation8 + $0x2c0] sm:$0xf]  ;;  %v583_v60 = vperm.slane %v10305_v45, 2  ;;  %v2629_v59 = vadd.f32 %v10190_v9, %v2615_v17  ;;  %v584_v25 = vperm.slane %v10305_v45, 3  ;;  %v10326_v17 = vpop.f32.mrf.mxu1 }
 0x221   :  { %v7396_v12 = vld [vmem:[#allocation5 + $0xa38] sm:$0xf0]  ;;  %4930 = vmatpush.bf16.msrb.mxu1 %v7891_v62  ;;  %v7730_v8 = vld [vmem:[#allocation8 + $0x80] sm:$0xf]  ;;  %v9418_v48 = vld [vmem:[#allocation8 + $0x8c] sm:$0xf0]  ;;  %v10316_v62 = vpop.f32.mrf.mxu2 }
 0x222   :  { %v7399_v54 = vor.u32 %v9331_v15, %v7396_v12  ;;  %3310 = vmatpush.bf16.msra.mxu2 %v7143_v58  ;;  %v2699_v15 = vadd.f32 %v10203_v26, %v2685_v3  ;;  %v8019_v12 = vor.u32 %v9490_v57, %v8018_v30  ;;  %v2769_v46 = vadd.f32 %v10255_v20, %v583_v60  ;;  %v9486_v58 = vld [vmem:[#allocation8 + $0x2ac] sm:$0xf0]  ;;  %v8130_v26 = vld [vmem:[#allocation8 + $0x3a0] sm:$0xf] }
 0x223   :  { %v7731_v9 = vor.u32 %v9418_v48, %v7730_v8  ;;  %v9518_v63 = vld [vmem:[#allocation8 + $0x3ac] sm:$0xf0]  ;;  %v2767_v61 = vadd.f32 %v10245_v52, %v583_v60  ;;  %v7859_v20 = vor.u32 %v9450_v4, %v7858_v43  ;;  %v7714_v3 = vld [vmem:[#allocation8 + $0x60] sm:$0xf]  ;;  %v2867_v36 = vadd.f32 %v10241_v19, %v584_v25  ;;  %v10329_v60 = vpop.f32.mrf.mxu0 }
 0x224   :  { %4916 = vmatpush.bf16.msrb.mxu3 %v7763_v6  ;;  %3324 = vmatpush.bf16.msra.mxu0 %v7399_v54  ;;  %v10314_v6 = vpop.f32.mrf.mxu3  ;;  %v9414_v54 = vld [vmem:[#allocation8 + $0x6c] sm:$0xf0]  ;;  %v2713_v13 = vadd.f32 %v10235_v2, %v2699_v15  ;;  %v2783_v57 = vadd.f32 %v10251_v41, %v2769_v46  ;;  %v2865_v52 = vadd.f32 %v10229_v24, %v584_v25  ;;  %v8114_v29 = vld [vmem:[#allocation8 + $0x380] sm:$0xf] }
 0x225   :  { %3311 = vmatmul.bf16.vlgmr.msra.gmra.mxu2 %v10135_v37  ;;  %4931 = vmatpush.bf16.msrb.mxu1 %v7875_v55  ;;  %v8003_v37 = vor.u32 %v9486_v58, %v8002_v1  ;;  %v9446_v30 = vld [vmem:[#allocation8 + $0x16c] sm:$0xf0]  ;;  %v2781_v19 = vadd.f32 %v10243_v33, %v2767_v61  ;;  %v7698_v8 = vld [vmem:[#allocation8 + $0x40] sm:$0xf] }
 0x226   :  { %4943 = vmatpush.bf16.msrb.mxu2 %v8035_v53  ;;  %v2643_v53 = vadd.f32 %v10194_v23, %v2629_v59  ;;  %v7715_v23 = vor.u32 %v9414_v54, %v7714_v3  ;;  %v9514_v2 = vld [vmem:[#allocation8 + $0x38c] sm:$0xf0]  ;;  %v2727_v48 = vadd.f32 %v10233_v0, %v2713_v13  ;;  %v2881_v59 = vadd.f32 %v10277_v49, %v2867_v36  ;;  %v7826_v25 = vld [vmem:[#allocation8 + $0x140] sm:$0xf] }
 0x227   :  { %3325 = vmatmul.bf16.vlgmr.msra.gmra.mxu0 %v10137_v42  ;;  %v8131_v42 = vor.u32 %v9518_v63, %v8130_v26  ;;  %v9410_v41 = vld [vmem:[#allocation8 + $0x4c] sm:$0xf0]  ;;  %v2797_v43 = vadd.f32 %v10238_v10, %v2783_v57  ;;  %v2879_v33 = vadd.f32 %v10267_v40, %v2865_v52  ;;  %7663 = vmatmul.msk.bf16.vlgmr.msra.gmra.mxu1 %vm2557_vm0, %v10131_v50  ;;  %v7970_v46 = vld [vmem:[#allocation8 + $0x260] sm:$0xf]  ;;  %v3345_v50 = vmax.f32 %v10181_v47, 0.0 }
 0x228   :  { %4957 = vmatpush.bf16.msrb.mxu0 %v8163_v16  ;;  %4917 = vmatpush.bf16.msrb.mxu3 %v7747_v56  ;;  %v7842_v16 = vld [vmem:[#allocation8 + $0x160] sm:$0xf]  ;;  %v10332_v24 = vadd.f32 %v10179_v35, %v2643_v53  ;;  %v8115_v35 = vor.u32 %v9514_v2, %v8114_v29  ;;  %v2895_v0 = vadd.f32 %v10302_v21, %v2881_v59  ;;  %v9510_v58 = vld [vmem:[#allocation8 + $0x36c] sm:$0xf0] }
 0x229   :  { %v7986_v56 = vld [vmem:[#allocation8 + $0x280] sm:$0xf]  ;;  %4932 = vmatpush.bf16.msrb.mxu1 %v7859_v20  ;;  %v7843_v55 = vor.u32 %v9446_v30, %v7842_v16  ;;  %v10338_v4 = vpop.f32.mrf.mxu2  ;;  %v7699_v49 = vor.u32 %v9410_v41, %v7698_v8  ;;  %v2893_v10 = vadd.f32 %v10286_v14, %v2879_v33  ;;  %v9406_v61 = vld [vmem:[#allocation8 + $0x2c] sm:$0xf0]  ;;  %v2741_v20 = vadd.f32 %v10215_v7, %v2727_v48 }
 0x22a   :  { %4944 = vmatpush.bf16.msrb.mxu2 %v8019_v12  ;;  %v7987_v15 = vor.u32 %v9482_v28, %v7986_v56  ;;  %v9442_v12 = vld [vmem:[#allocation8 + $0x14c] sm:$0xf0]  ;;  %v8098_v1 = vld [vmem:[#allocation8 + $0x360] sm:$0xf]  ;;  %v2909_v21 = vadd.f32 %v10296_v38, %v2895_v0  ;;  %v2811_v14 = vadd.f32 %v10225_v34, %v2797_v43  ;;  %v10356_v28 = vpop.f32.mrf.mxu1 }
 0x22b   :  { %v7827_v26 = vor.u32 %v9442_v12, %v7826_v25  ;;  %v7682_v63 = vld [vmem:[#allocation8 + $0x20] sm:$0xf]  ;;  %v9438_v53 = vld [vmem:[#allocation8 + $0x12c] sm:$0xf0]  ;;  %v2907_v13 = vadd.f32 %v10281_v18, %v2893_v10  ;;  %v8099_v36 = vor.u32 %v9510_v58, %v8098_v1  ;;  %v2755_v30 = vadd.f32 %v10223_v11, %v2741_v20  ;;  %v10362_v25 = vpop.f32.mrf.mxu0  ;;  %v10529_v58 = vld [vmem:[#allocation28_spill] sm:$0xff] }
 0x22c   :  { %4958 = vmatpush.bf16.msrb.mxu0 %v8147_v31  ;;  %4918 = vmatpush.bf16.msrb.mxu3 %v7731_v9  ;;  %v9478_v31 = vld [vmem:[#allocation8 + $0x26c] sm:$0xf0]  ;;  %v2795_v9 = vadd.f32 %v10227_v5, %v2781_v19  ;;  %v10345_v40 = vpop.f32.mrf.mxu3  ;;  %v7810_v54 = vld [vmem:[#allocation8 + $0x120] sm:$0xf]  ;;  %v3353_v5 = vmax.f32 %v10332_v24, 0.0  ;;  %v7683_v7 = vor.u32 %v9406_v61, %v7682_v63  ;;  %v2825_v56 = vadd.f32 %v10275_v39, %v2811_v14 }
 0x22d   :  { %4933 = vmatpush.bf16.msrb.mxu1 %v7843_v55  ;;  %v7971_v3 = vor.u32 %v9478_v31, %v7970_v46  ;;  %v9474_v16 = vld [vmem:[#allocation8 + $0x24c] sm:$0xf0]  ;;  %v8082_v57 = vld [vmem:[#allocation8 + $0x340] sm:$0xf]  ;;  %v7811_v34 = vor.u32 %v9438_v53, %v7810_v54  ;;  %v2923_v2 = vadd.f32 %v10259_v22, %v2909_v21  ;;  %v10528_v46 = vld [vmem:[#allocation24_spill] sm:$0xff]  ;;  %v3354_v31 = vmax.f32 %v2755_v30, 0.0 }
 0x22e   :  { %4945 = vmatpush.bf16.msrb.mxu2 %v8003_v37  ;;  %v7954_v37 = vld [vmem:[#allocation8 + $0x240] sm:$0xf]  ;;  %v9506_v38 = vld [vmem:[#allocation8 + $0x34c] sm:$0xf0]  ;;  %v3346_v22 = vmax.f32 %v10528_v46, 0.0  ;;  %v585_v10 = vperm.slane %v10305_v45, 4 }
 0x22f   :  { %v7666_v52 = vld [vmem:[#allocation8] sm:$0xf]  ;;  %v9402_v18 = vld [vmem:[#allocation8 + $0xc] sm:$0xf0]  ;;  %v7955_v11 = vor.u32 %v9474_v16, %v7954_v37  ;;  %v8083_v12 = vor.u32 %v9506_v38, %v8082_v57  ;;  %v2937_v21 = vadd.f32 %v10308_v32, %v2923_v2  ;;  %v10378_v32 = vpack.c.bf16 %v3353_v5, %v3345_v50  ;;  %v10533_v2 = vld [vmem:[#allocation30_spill] sm:$0xff] }
 0x230   :  { %4959 = vmatpush.bf16.msrb.mxu0 %v8131_v42  ;;  %4919 = vmatpush.bf16.msrb.mxu3 %v7715_v23  ;;  %v2809_v42 = vadd.f32 %v10219_v44, %v2795_v9  ;;  %v7794_v23 = vld [vmem:[#allocation8 + $0x100] sm:$0xf]  ;;  %v9434_v29 = vld [vmem:[#allocation8 + $0x10c] sm:$0xf0]  ;;  %v7667_v0 = vor.u32 %v9402_v18, %v7666_v52  ;;  %v10380_v52 = vpack.c.bf16 %v3354_v31, %v3346_v22 }
 0x231   :  { %4934 = vmatpush.bf16.msrb.mxu1 %v7827_v26  ;;  %v8290_v19 = vld [vmem:[#allocation8 + $0x4e0] sm:$0xf]  ;;  %v9558_v55 = vld [vmem:[#allocation8 + $0x4ec] sm:$0xf0]  ;;  %v10369_v63 = vpop.f32.mrf.mxu2  ;;  %v7795_v61 = vor.u32 %v9434_v29, %v7794_v23  ;;  %v2963_v50 = vadd.f32 %v10314_v6, %v585_v10 }
 0x232   :  { %4946 = vmatpush.bf16.msrb.mxu2 %v7987_v15  ;;  %v8418_v8 = vld [vmem:[#allocation8 + $0x5e0] sm:$0xf]  ;;  %v10526_v59 = vld [vmem:[#allocation31_spill] sm:$0xff]  ;;  %v10527_v15 = vld [vmem:[#allocation26_spill] sm:$0xff]  ;;  %v8291_v20 = vor.u32 %v9558_v55, %v8290_v19  ;;  %v10386_v19 = vpop.f32.mrf.mxu1 }
 0x233   :  { %v10525_v41 = vld [vmem:[#allocation29_spill] sm:$0xff]  ;;  %v2839_v44 = vadd.f32 %v10526_v59, %v2825_v56  ;;  %v2921_v39 = vadd.f32 %v10527_v15, %v2907_v13  ;;  %v9590_v43 = vld [vmem:[#allocation8 + $0x5ec] sm:$0xf0]  ;;  %v10389_v59 = vpop.f32.mrf.mxu0 }
 0x234   :  { %4960 = vmatpush.bf16.msrb.mxu0 %v8115_v35  ;;  %4920 = vmatpush.bf16.msrb.mxu3 %v7699_v49  ;;  %v2823_v48 = vadd.f32 %v10525_v41, %v2809_v42  ;;  %v7938_v33 = vld [vmem:[#allocation8 + $0x220] sm:$0xf]  ;;  %v9470_v35 = vld [vmem:[#allocation8 + $0x22c] sm:$0xf0]  ;;  %v10367_v26 = vpop.f32.mrf.mxu3  ;;  %v10531_v42 = vld [vmem:[#allocation32_spill] sm:$0xff] }
 0x235   :  { %v8066_v49 = vld [vmem:[#allocation8 + $0x320] sm:$0xf]  ;;  %v9502_v1 = vld [vmem:[#allocation8 + $0x32c] sm:$0xf0]  ;;  %4935 = vmatpush.bf16.msrb.mxu1 %v7811_v34  ;;  %v7939_v54 = vor.u32 %v9470_v35, %v7938_v33  ;;  %v2935_v16 = vadd.f32 %v10288_v27, %v2921_v39  ;;  %v2951_v56 = vadd.f32 %v10531_v42, %v2937_v21  ;;  %v2965_v34 = vadd.f32 %v10345_v40, %v585_v10 }
 0x236   :  { %4947 = vmatpush.bf16.msrb.mxu2 %v7971_v3  ;;  %v2837_v9 = vadd.f32 %v10529_v58, %v2823_v48  ;;  %v8419_v3 = vor.u32 %v9590_v43, %v8418_v8  ;;  %v8274_v53 = vld [vmem:[#allocation8 + $0x4c0] sm:$0xf]  ;;  %v9554_v14 = vld [vmem:[#allocation8 + $0x4cc] sm:$0xf0]  ;;  %v8067_v30 = vor.u32 %v9502_v1, %v8066_v49  ;;  %v2977_v49 = vadd.f32 %v10326_v17, %v2963_v50 }
 0x237   :  { %v8402_v13 = vld [vmem:[#allocation8 + $0x5c0] sm:$0xf]  ;;  %v9466_v38 = vld [vmem:[#allocation8 + $0x20c] sm:$0xf0]  ;;  %v8275_v47 = vor.u32 %v9554_v14, %v8274_v53  ;;  %v3356_v43 = vmax.f32 %v2951_v56, 0.0  ;;  %v2979_v6 = vadd.f32 %v10356_v28, %v2965_v34  ;;  %v586_v42 = vperm.slane %v10305_v45, 5 }
 0x238   :  { %4961 = vmatpush.bf16.msrb.mxu0 %v8099_v36  ;;  %4921 = vmatpush.bf16.msrb.mxu3 %v7683_v7  ;;  %v10530_v36 = vld [vmem:[#allocation27_spill] sm:$0xff]  ;;  %v7922_v57 = vld [vmem:[#allocation8 + $0x200] sm:$0xf] }
 0x239   :  { %v2853_v37 = vadd.f32 %v10530_v36, %v2839_v44  ;;  %v9586_v7 = vld [vmem:[#allocation8 + $0x5cc] sm:$0xf0]  ;;  %v8050_v18 = vld [vmem:[#allocation8 + $0x300] sm:$0xf]  ;;  %4936 = vmatpush.bf16.msrb.mxu1 %v7795_v61  ;;  %v7923_v55 = vor.u32 %v9466_v38, %v7922_v57  ;;  %v10394_v35 = vpop.f32.mrf.mxu2 }
 0x23a   :  { %4948 = vmatpush.bf16.msrb.mxu2 %v7955_v11  ;;  %v9498_v27 = vld [vmem:[#allocation8 + $0x30c] sm:$0xf0]  ;;  %v10532_v23 = vld [vmem:[#allocation25_spill] sm:$0xff]  ;;  %v2949_v11 = vadd.f32 %v10533_v2, %v2935_v16  ;;  %v8403_v5 = vor.u32 %v9586_v7, %v8402_v13  ;;  %v2991_v13 = vadd.f32 %v10291_v51, %v2977_v49 }
 0x23b   :  { %v2851_v29 = vadd.f32 %v10532_v23, %v2837_v9  ;;  %v8546_v24 = vld [vmem:[#allocation8 + $0x6e0] sm:$0xf]  ;;  %v9550_v8 = vld [vmem:[#allocation8 + $0x4ac] sm:$0xf0]  ;;  %v3355_v48 = vmax.f32 %v2853_v37, 0.0  ;;  %v8051_v44 = vor.u32 %v9498_v27, %v8050_v18  ;;  %v3062_v56 = vpop.f32.mrf.mxu0 }
 0x23c   :  { %4962 = vmatpush.bf16.msrb.mxu0 %v8083_v12  ;;  %4922 = vmatpush.bf16.msrb.mxu3 %v7667_v0  ;;  %v8258_v40 = vld [vmem:[#allocation8 + $0x4a0] sm:$0xf]  ;;  %v9622_v41 = vld [vmem:[#allocation8 + $0x6ec] sm:$0xf0]  ;;  %v3348_v0 = vmax.f32 %v2949_v11, 0.0  ;;  %v3020_v28 = vpop.f32.mrf.mxu3  ;;  %v3005_v51 = vadd.f32 %v10329_v60, %v2991_v13 }
 0x23d   :  { %4985 = vmatpush.bf16.msra.mxu1 %v8419_v3  ;;  %v8386_v15 = vld [vmem:[#allocation8 + $0x5a0] sm:$0xf]  ;;  %v9582_v39 = vld [vmem:[#allocation8 + $0x5ac] sm:$0xf0]  ;;  %v8547_v12 = vor.u32 %v9622_v41, %v8546_v24  ;;  %v3347_v33 = vmax.f32 %v2851_v29, 0.0  ;;  %v8259_v46 = vor.u32 %v9550_v8, %v8258_v40  ;;  %v3061_v40 = vadd.f32 %v10389_v59, %v586_v42 }
 0x23e   :  { %4949 = vmatpush.bf16.msrb.mxu2 %v7939_v54  ;;  %4937 = vmatmul.bf16.vlgmr.msrb.gmra.mxu1 %v10380_v52  ;;  %v8530_v22 = vld [vmem:[#allocation8 + $0x6c0] sm:$0xf]  ;;  %v9618_v31 = vld [vmem:[#allocation8 + $0x6cc] sm:$0xf0]  ;;  %v8387_v1 = vor.u32 %v9582_v39, %v8386_v15  ;;  %v10399_v3 = vpack.c.bf16 %v3356_v43, %v3348_v0  ;;  %v2993_v54 = vadd.f32 %v10316_v62, %v2979_v6  ;;  %v9460_v13 = vld [vmem:[#allocation8 + $0x1e4] sm:$0xf] }
 0x23f   :  { %4923 = vmatmul.bf16.vlgmr.msrb.gmra.mxu3 %v10378_v32  ;;  %v8242_v58 = vld [vmem:[#allocation8 + $0x480] sm:$0xf]  ;;  %v9546_v9 = vld [vmem:[#allocation8 + $0x48c] sm:$0xf0]  ;;  %v10397_v10 = vpack.c.bf16 %v3355_v48, %v3347_v33  ;;  %v8531_v21 = vor.u32 %v9618_v31, %v8530_v22  ;;  %v3063_v22 = vadd.f32 %v3062_v56, %v586_v42  ;;  %v9424_v42 = vld [vmem:[#allocation8 + $0xc4] sm:$0xf] }
 0x240   :  { %4971 = vmatpush.bf16.msra.mxu3 %v8291_v20  ;;  %4963 = vmatpush.bf16.msrb.mxu0 %v8067_v30  ;;  %v8370_v61 = vld [vmem:[#allocation8 + $0x580] sm:$0xf]  ;;  %v9578_v20 = vld [vmem:[#allocation8 + $0x58c] sm:$0xf0]  ;;  %v8243_v17 = vor.u32 %v9546_v9, %v8242_v58  ;;  %v3034_v30 = vpop.f32.mrf.mxu1  ;;  %v3007_v62 = vadd.f32 %v10362_v25, %v2993_v54  ;;  %v9428_v54 = vld [vmem:[#allocation8 + $0xe4] sm:$0xf] }
 0x241   :  { %4986 = vmatpush.bf16.msra.mxu1 %v8403_v5  ;;  %v8514_v53 = vld [vmem:[#allocation8 + $0x6a0] sm:$0xf]  ;;  %v9614_v14 = vld [vmem:[#allocation8 + $0x6ac] sm:$0xf0]  ;;  %v8371_v36 = vor.u32 %v9578_v20, %v8370_v61  ;;  %v3076_v24 = vpop.f32.mrf.mxu2  ;;  %v7764_v56 = vld [vmem:[#allocation8 + $0xd0] sm:$0xf0] }
 0x242   :  { %4950 = vmatpush.bf16.msrb.mxu2 %v7923_v55  ;;  %v8226_v37 = vld [vmem:[#allocation8 + $0x460] sm:$0xf]  ;;  %v9542_v16 = vld [vmem:[#allocation8 + $0x46c] sm:$0xf0]  ;;  %v8515_v38 = vor.u32 %v9614_v14, %v8514_v53  ;;  %v3021_v27 = vadd.f32 %v3020_v28, %v3007_v62  ;;  %v3019_v55 = vadd.f32 %v10367_v26, %v3005_v51  ;;  %v3075_v26 = vadd.f32 %v10394_v35, %v3061_v40 }
 0x243   :  { %v8354_v7 = vld [vmem:[#allocation8 + $0x560] sm:$0xf]  ;;  %v9574_v57 = vld [vmem:[#allocation8 + $0x56c] sm:$0xf0]  ;;  %v8227_v34 = vor.u32 %v9542_v16, %v8226_v37  ;;  %v3116_v61 = vpop.f32.mrf.mxu0  ;;  %v3077_v14 = vadd.f32 %v3076_v24, %v3063_v22  ;;  %v7767_v24 = vor.u32 %v9424_v42, %v7764_v56  ;;  %v7732_v22 = vld [vmem:[#allocation8 + $0x90] sm:$0xf0] }
 0x244   :  { %4972 = vmatpush.bf16.msra.mxu3 %v8275_v47  ;;  %4964 = vmatpush.bf16.msrb.mxu0 %v8051_v44  ;;  %v8498_v18 = vld [vmem:[#allocation8 + $0x680] sm:$0xf]  ;;  %v8355_v23 = vor.u32 %v9574_v57, %v8354_v7  ;;  %v9538_v2 = vld [vmem:[#allocation8 + $0x44c] sm:$0xf0]  ;;  %v3088_v47 = vpop.f32.mrf.mxu3  ;;  %v3035_v48 = vadd.f32 %v3034_v30, %v3021_v27  ;;  %v9456_v27 = vld [vmem:[#allocation8 + $0x1c4] sm:$0xf] }
 0x245   :  { %4951 = vmatmul.bf16.vlgmr.msrb.gmra.mxu2 %v10397_v10  ;;  %4987 = vmatpush.bf16.msra.mxu1 %v8387_v1  ;;  %v8210_v29 = vld [vmem:[#allocation8 + $0x440] sm:$0xf]  ;;  %v9610_v11 = vld [vmem:[#allocation8 + $0x68c] sm:$0xf0]  ;;  %v3089_v53 = vadd.f32 %v3088_v47, %v3075_v26  ;;  %v9416_v26 = vld [vmem:[#allocation8 + $0x84] sm:$0xf] }
 0x246   :  { %4999 = vmatpush.bf16.msra.mxu2 %v8547_v12  ;;  %v8338_v50 = vld [vmem:[#allocation8 + $0x540] sm:$0xf]  ;;  %v9570_v5 = vld [vmem:[#allocation8 + $0x54c] sm:$0xf0]  ;;  %v8499_v25 = vor.u32 %v9610_v11, %v8498_v18  ;;  %v8211_v8 = vor.u32 %v9538_v2, %v8210_v29  ;;  %v3049_v49 = vadd.f32 %v10369_v63, %v3035_v48 }
 0x247   :  { %4965 = vmatmul.bf16.vlgmr.msrb.gmra.mxu0 %v10399_v3  ;;  %v8482_v41 = vld [vmem:[#allocation8 + $0x660] sm:$0xf]  ;;  %v9606_v60 = vld [vmem:[#allocation8 + $0x66c] sm:$0xf0]  ;;  %v8339_v44 = vor.u32 %v9570_v5, %v8338_v50  ;;  %v9420_v50 = vld [vmem:[#allocation8 + $0xa4] sm:$0xf] }
 0x248   :  { %4973 = vmatpush.bf16.msra.mxu3 %v8259_v46  ;;  %v8194_v15 = vld [vmem:[#allocation8 + $0x420] sm:$0xf]  ;;  %v9534_v39 = vld [vmem:[#allocation8 + $0x42c] sm:$0xf0]  ;;  %v3102_v12 = vpop.f32.mrf.mxu1  ;;  %v8483_v33 = vor.u32 %v9606_v60, %v8482_v41  ;;  %v3033_v46 = vadd.f32 %v10386_v19, %v3019_v55  ;;  %v3357_v7 = vmax.f32 %v3049_v49, 0.0 }
 0x249   :  { %4988 = vmatpush.bf16.msra.mxu1 %v8371_v36  ;;  %v8322_v43 = vld [vmem:[#allocation8 + $0x520] sm:$0xf]  ;;  %v9566_v6 = vld [vmem:[#allocation8 + $0x52c] sm:$0xf0]  ;;  %v8195_v59 = vor.u32 %v9534_v39, %v8194_v15  ;;  %v7908_v36 = vld [vmem:[#allocation8 + $0x1f0] sm:$0xf0]  ;;  %v3130_v37 = vpop.f32.mrf.mxu2 }
 0x24a   :  { %5000 = vmatpush.bf16.msra.mxu2 %v8531_v21  ;;  %v8466_v31 = vld [vmem:[#allocation8 + $0x640] sm:$0xf]  ;;  %v9602_v0 = vld [vmem:[#allocation8 + $0x64c] sm:$0xf0]  ;;  %v8323_v1 = vor.u32 %v9566_v6, %v8322_v43  ;;  %v3047_v35 = vadd.f32 %v10338_v4, %v3033_v46  ;;  %v7911_v62 = vor.u32 %v9460_v13, %v7908_v36  ;;  %v3103_v4 = vadd.f32 %v3102_v12, %v3089_v53  ;;  %v7748_v55 = vld [vmem:[#allocation8 + $0xb0] sm:$0xf0] }
 0x24b   :  { %v8178_v58 = vld [vmem:[#allocation8 + $0x400] sm:$0xf]  ;;  %v9530_v9 = vld [vmem:[#allocation8 + $0x40c] sm:$0xf0]  ;;  %v8467_v19 = vor.u32 %v9602_v0, %v8466_v31  ;;  %v8036_v41 = vld [vmem:[#allocation8 + $0x2f0] sm:$0xf0]  ;;  %v3118_v12 = vpop.f32.mrf.mxu0  ;;  %v7751_v43 = vor.u32 %v9420_v50, %v7748_v55 }
 0x24c   :  { %4974 = vmatpush.bf16.msra.mxu3 %v8243_v17  ;;  %v8306_v28 = vld [vmem:[#allocation8 + $0x500] sm:$0xf]  ;;  %v3090_v20 = vpop.f32.mrf.mxu3  ;;  %v9562_v21 = vld [vmem:[#allocation8 + $0x50c] sm:$0xf0]  ;;  %v7780_v17 = vld [vmem:[#allocation8 + $0xf0] sm:$0xf0]  ;;  %v8179_v63 = vor.u32 %v9530_v9, %v8178_v58  ;;  %v3117_v60 = vadd.f32 %v3116_v61, %v3103_v4  ;;  %v7735_v61 = vor.u32 %v9416_v26, %v7732_v22 }
 0x24d   :  { %4989 = vmatpush.bf16.msra.mxu1 %v8355_v23  ;;  %v8450_v16 = vld [vmem:[#allocation8 + $0x620] sm:$0xf]  ;;  %v9598_v30 = vld [vmem:[#allocation8 + $0x62c] sm:$0xf0]  ;;  %v8307_v57 = vor.u32 %v9562_v21, %v8306_v28  ;;  %v3349_v18 = vmax.f32 %v3047_v35, 0.0  ;;  %v3091_v51 = vadd.f32 %v3090_v20, %v3077_v14 }
 0x24e   :  { %5001 = vmatpush.bf16.msra.mxu2 %v8515_v38  ;;  %v7783_v38 = vor.u32 %v9428_v54, %v7780_v17  ;;  %v7892_v23 = vld [vmem:[#allocation8 + $0x1d0] sm:$0xf0]  ;;  %v8434_v2 = vld [vmem:[#allocation8 + $0x600] sm:$0xf]  ;;  %v9594_v11 = vld [vmem:[#allocation8 + $0x60c] sm:$0xf0]  ;;  %v3131_v31 = vadd.f32 %v3130_v37, %v3117_v60 }
 0x24f   :  { %v10414_v47 = vpack.c.bf16 %v3357_v7, %v3349_v18  ;;  %v8435_v40 = vor.u32 %v9594_v11, %v8434_v2  ;;  %v7876_v15 = vld [vmem:[#allocation8 + $0x1b0] sm:$0xf0]  ;;  %v9488_v6 = vld [vmem:[#allocation8 + $0x2c4] sm:$0xf]  ;;  %v8674_v20 = vld [vmem:[#allocation8 + $0x7e0] sm:$0xf] }
 0x250   :  { %4975 = vmatpush.bf16.msra.mxu3 %v8227_v34  ;;  %v8451_v34 = vor.u32 %v9598_v30, %v8450_v16  ;;  %v3104_v29 = vpop.f32.mrf.mxu1  ;;  %v9448_v49 = vld [vmem:[#allocation8 + $0x184] sm:$0xf]  ;;  %v9654_v21 = vld [vmem:[#allocation8 + $0x7ec] sm:$0xf0]  ;;  %v7716_v53 = vld [vmem:[#allocation8 + $0x70] sm:$0xf0] }
 0x251   :  { %4990 = vmatpush.bf16.msra.mxu1 %v8339_v44  ;;  %v3105_v48 = vadd.f32 %v3104_v29, %v3091_v51  ;;  %v9452_v44 = vld [vmem:[#allocation8 + $0x1a4] sm:$0xf]  ;;  %v8675_v14 = vor.u32 %v9654_v21, %v8674_v20  ;;  %v8004_v13 = vld [vmem:[#allocation8 + $0x2b0] sm:$0xf0]  ;;  %v8658_v42 = vld [vmem:[#allocation8 + $0x7c0] sm:$0xf] }
 0x252   :  { %5002 = vmatpush.bf16.msra.mxu2 %v8499_v25  ;;  %v7895_v25 = vor.u32 %v9456_v27, %v7892_v23  ;;  %v7879_v46 = vor.u32 %v9452_v44, %v7876_v15  ;;  %v9484_v54 = vld [vmem:[#allocation8 + $0x2a4] sm:$0xf]  ;;  %v7988_v4 = vld [vmem:[#allocation8 + $0x290] sm:$0xf0]  ;;  %v8642_v50 = vld [vmem:[#allocation8 + $0x7a0] sm:$0xf] }
 0x253   :  { %v3119_v0 = vadd.f32 %v3118_v12, %v3105_v48  ;;  %v9412_v35 = vld [vmem:[#allocation8 + $0x64] sm:$0xf]  ;;  %v8007_v16 = vor.u32 %v9484_v54, %v8004_v13  ;;  %5013 = vmatpush.bf16.msra.mxu0 %v8675_v14  ;;  %v7828_v23 = vld [vmem:[#allocation8 + $0x150] sm:$0xf0]  ;;  %v8610_v21 = vld [vmem:[#allocation8 + $0x760] sm:$0xf] }
 0x254   :  { %4976 = vmatpush.bf16.msra.mxu3 %v8211_v8  ;;  %v3144_v5 = vpop.f32.mrf.mxu3  ;;  %v9492_v8 = vld [vmem:[#allocation8 + $0x2e4] sm:$0xf]  ;;  %v7684_v55 = vld [vmem:[#allocation8 + $0x30] sm:$0xf0]  ;;  %v9638_v54 = vld [vmem:[#allocation8 + $0x76c] sm:$0xf0] }
 0x255   :  { %4991 = vmatpush.bf16.msra.mxu1 %v8323_v1  ;;  %v8039_v39 = vor.u32 %v9492_v8, %v8036_v41  ;;  %v7860_v1 = vld [vmem:[#allocation8 + $0x190] sm:$0xf0]  ;;  %v3145_v9 = vadd.f32 %v3144_v5, %v3131_v31  ;;  %v9444_v37 = vld [vmem:[#allocation8 + $0x164] sm:$0xf]  ;;  %v9646_v5 = vld [vmem:[#allocation8 + $0x7ac] sm:$0xf0] }
 0x256   :  { %5003 = vmatpush.bf16.msra.mxu2 %v8483_v33  ;;  %v3132_v33 = vpop.f32.mrf.mxu2  ;;  %v9408_v30 = vld [vmem:[#allocation8 + $0x44] sm:$0xf]  ;;  %v7972_v41 = vld [vmem:[#allocation8 + $0x270] sm:$0xf0] }
 0x257   :  { %v3133_v28 = vadd.f32 %v3132_v33, %v3119_v0  ;;  %v3350_v7 = vmax.f32 %v3145_v9, 0.0  ;;  %v9480_v18 = vld [vmem:[#allocation8 + $0x284] sm:$0xf]  ;;  %v7812_v48 = vld [vmem:[#allocation8 + $0x130] sm:$0xf0]  ;;  %v10420_v9 = vpop.f32.mrf.mxu0 }
 0x258   :  { %4977 = vmatpush.bf16.msra.mxu3 %v8195_v59  ;;  %v8020_v59 = vld [vmem:[#allocation8 + $0x2d0] sm:$0xf0]  ;;  %v9440_v27 = vld [vmem:[#allocation8 + $0x144] sm:$0xf]  ;;  %v7991_v2 = vor.u32 %v9480_v18, %v7988_v4  ;;  %v3158_v31 = vpop.f32.mrf.mxu1 }
 0x259   :  { %4992 = vmatpush.bf16.msra.mxu1 %v8307_v57  ;;  %v8023_v58 = vor.u32 %v9488_v6, %v8020_v59  ;;  %v9476_v8 = vld [vmem:[#allocation8 + $0x264] sm:$0xf]  ;;  %v7668_v12 = vld [vmem:[#allocation8 + $0x10] sm:$0xf0]  ;;  %v9642_v6 = vld [vmem:[#allocation8 + $0x78c] sm:$0xf0] }
 0x25a   :  { %5004 = vmatpush.bf16.msra.mxu2 %v8467_v19  ;;  %v7863_v19 = vor.u32 %v9448_v49, %v7860_v1  ;;  %v9436_v60 = vld [vmem:[#allocation8 + $0x124] sm:$0xf]  ;;  %v7975_v44 = vor.u32 %v9476_v8, %v7972_v41  ;;  %v7956_v59 = vld [vmem:[#allocation8 + $0x250] sm:$0xf0] }
 0x25b   :  { %v9400_v15 = vld [vmem:[#allocation8 + $0x4] sm:$0xf]  ;;  %v7815_v33 = vor.u32 %v9436_v60, %v7812_v48  ;;  %v7796_v0 = vld [vmem:[#allocation8 + $0x110] sm:$0xf0] }
 0x25c   :  { %4978 = vmatpush.bf16.msra.mxu3 %v8179_v63  ;;  %v3146_v17 = vpop.f32.mrf.mxu3  ;;  %v7844_v63 = vld [vmem:[#allocation8 + $0x170] sm:$0xf0]  ;;  %v9472_v22 = vld [vmem:[#allocation8 + $0x244] sm:$0xf]  ;;  %v7671_v20 = vor.u32 %v9400_v15, %v7668_v12  ;;  %v8562_v15 = vld [vmem:[#allocation8 + $0x700] sm:$0xf] }
 0x25d   :  { %5041 = vmatpush.bf16.msrb.mxu1 %v7911_v62  ;;  %v3147_v36 = vadd.f32 %v3146_v17, %v3133_v28  ;;  %v7700_v62 = vld [vmem:[#allocation8 + $0x50] sm:$0xf0]  ;;  %v7847_v56 = vor.u32 %v9444_v37, %v7844_v63  ;;  %v9556_v49 = vld [vmem:[#allocation8 + $0x4e4] sm:$0xf]  ;;  %v8611_v37 = vor.u32 %v9638_v54, %v8610_v21 }
 0x25e   :  { %5005 = vmatpush.bf16.msra.mxu2 %v8451_v34  ;;  %v9650_v34 = vld [vmem:[#allocation8 + $0x7cc] sm:$0xf0]  ;;  %v7703_v11 = vor.u32 %v9408_v30, %v7700_v62  ;;  %v8292_v1 = vld [vmem:[#allocation8 + $0x4f0] sm:$0xf0]  ;;  %v9588_v28 = vld [vmem:[#allocation8 + $0x5e4] sm:$0xf] }
 0x25f   :  { %4979 = vmatmul.bf16.vlgmr.msra.gmra.mxu3 %v10414_v47  ;;  %v3358_v57 = vmax.f32 %v3147_v36, 0.0  ;;  %v8659_v29 = vor.u32 %v9650_v34, %v8658_v42  ;;  %v9552_v13 = vld [vmem:[#allocation8 + $0x4c4] sm:$0xf]  ;;  %v8276_v36 = vld [vmem:[#allocation8 + $0x4d0] sm:$0xf0] }
 0x260   :  { %5027 = vmatpush.bf16.msrb.mxu3 %v7783_v38  ;;  %v7719_v38 = vor.u32 %v9412_v35, %v7716_v53  ;;  %v9468_v35 = vld [vmem:[#allocation8 + $0x224] sm:$0xf]  ;;  %v7940_v53 = vld [vmem:[#allocation8 + $0x230] sm:$0xf0]  ;;  %v8279_v42 = vor.u32 %v9552_v13, %v8276_v36 }
 0x261   :  { %5042 = vmatpush.bf16.msrb.mxu1 %v7895_v25  ;;  %v10417_v51 = vpack.c.bf16 %v3358_v57, %v3350_v7  ;;  %v7831_v25 = vor.u32 %v9440_v27, %v7828_v23  ;;  %5014 = vmatpush.bf16.msra.mxu0 %v8659_v29  ;;  %v9584_v63 = vld [vmem:[#allocation8 + $0x5c4] sm:$0xf]  ;;  %v7943_v30 = vor.u32 %v9468_v35, %v7940_v53  ;;  %v8594_v57 = vld [vmem:[#allocation8 + $0x740] sm:$0xf]  ;;  %v8260_v4 = vld [vmem:[#allocation8 + $0x4b0] sm:$0xf0] }
 0x262   :  { %5006 = vmatpush.bf16.msra.mxu2 %v8435_v40  ;;  %v8643_v40 = vor.u32 %v9646_v5, %v8642_v50  ;;  %v9464_v62 = vld [vmem:[#allocation8 + $0x204] sm:$0xf]  ;;  %v587_v23 = vperm.slane %v10305_v45, 6  ;;  %v8578_v50 = vld [vmem:[#allocation8 + $0x720] sm:$0xf] }
 0x263   :  { %4993 = vmatmul.bf16.vlgmr.msra.gmra.mxu1 %v10417_v51  ;;  %v9548_v18 = vld [vmem:[#allocation8 + $0x4a4] sm:$0xf]  ;;  %v9630_v5 = vld [vmem:[#allocation8 + $0x72c] sm:$0xf0]  ;;  %v8244_v41 = vld [vmem:[#allocation8 + $0x490] sm:$0xf0] }
 0x264   :  { %5028 = vmatpush.bf16.msrb.mxu3 %v7767_v24  ;;  %v9404_v24 = vld [vmem:[#allocation8 + $0x24] sm:$0xf]  ;;  %v3172_v7 = vpop.f32.mrf.mxu3  ;;  %v8579_v45 = vor.u32 %v9630_v5, %v8578_v50  ;;  %v3159_v60 = vadd.f32 %v3158_v31, %v587_v23  ;;  %v8356_v31 = vld [vmem:[#allocation8 + $0x570] sm:$0xf0] }
 0x265   :  { %5043 = vmatpush.bf16.msrb.mxu1 %v7879_v46  ;;  %v9432_v46 = vld [vmem:[#allocation8 + $0x104] sm:$0xf]  ;;  %5015 = vmatpush.bf16.msra.mxu0 %v8643_v40  ;;  %v8212_v53 = vld [vmem:[#allocation8 + $0x450] sm:$0xf0] }
 0x266   :  { %5055 = vmatpush.bf16.msrb.mxu2 %v8039_v39  ;;  %v7687_v39 = vor.u32 %v9404_v24, %v7684_v55  ;;  %v7799_v17 = vor.u32 %v9432_v46, %v7796_v0  ;;  %v9580_v29 = vld [vmem:[#allocation8 + $0x5a4] sm:$0xf]  ;;  %v3160_v24 = vpop.f32.mrf.mxu1  ;;  %v8263_v55 = vor.u32 %v9548_v18, %v8260_v4  ;;  %v8164_v0 = vld [vmem:[#allocation8 + $0x3f0] sm:$0xf0] }
 0x267   :  { %v9544_v8 = vld [vmem:[#allocation8 + $0x484] sm:$0xf]  ;;  %v8340_v36 = vld [vmem:[#allocation8 + $0x550] sm:$0xf0] }
 0x268   :  { %5029 = vmatpush.bf16.msrb.mxu3 %v7751_v43  ;;  %v8626_v43 = vld [vmem:[#allocation8 + $0x780] sm:$0xf]  ;;  %v9576_v48 = vld [vmem:[#allocation8 + $0x584] sm:$0xf]  ;;  %v8247_v12 = vor.u32 %v9544_v8, %v8244_v41  ;;  %v8324_v18 = vld [vmem:[#allocation8 + $0x530] sm:$0xf0] }
 0x269   :  { %5044 = vmatpush.bf16.msrb.mxu1 %v7863_v19  ;;  %v8627_v26 = vor.u32 %v9642_v6, %v8626_v43  ;;  %v8295_v19 = vor.u32 %v9556_v49, %v8292_v1  ;;  %v9540_v43 = vld [vmem:[#allocation8 + $0x464] sm:$0xf]  ;;  %v3200_v6 = vpop.f32.mrf.mxu2  ;;  %v3173_v49 = vadd.f32 %v3172_v7, %v3159_v60  ;;  %v8132_v7 = vld [vmem:[#allocation8 + $0x3b0] sm:$0xf0] }
 0x26a   :  { %5056 = vmatpush.bf16.msrb.mxu2 %v8023_v58  ;;  %v7959_v58 = vor.u32 %v9472_v22, %v7956_v59  ;;  %v9524_v59 = vld [vmem:[#allocation8 + $0x3e4] sm:$0xf]  ;;  %v8308_v60 = vld [vmem:[#allocation8 + $0x510] sm:$0xf0] }
 0x26b   :  { %5016 = vmatpush.bf16.msra.mxu0 %v8627_v26  ;;  %v8228_v26 = vld [vmem:[#allocation8 + $0x470] sm:$0xf0]  ;;  %v9572_v1 = vld [vmem:[#allocation8 + $0x564] sm:$0xf] }
 0x26c   :  { %5030 = vmatpush.bf16.msrb.mxu3 %v7735_v61  ;;  %v8420_v61 = vld [vmem:[#allocation8 + $0x5f0] sm:$0xf0]  ;;  %v8231_v21 = vor.u32 %v9540_v43, %v8228_v26  ;;  %v9520_v54 = vld [vmem:[#allocation8 + $0x3c4] sm:$0xf] }
 0x26d   :  { %5045 = vmatpush.bf16.msrb.mxu1 %v7847_v56  ;;  %v8423_v14 = vor.u32 %v9588_v28, %v8420_v61  ;;  %v7924_v56 = vld [vmem:[#allocation8 + $0x210] sm:$0xf0]  ;;  %v3161_v61 = vadd.f32 %v3160_v24, %v587_v23  ;;  %v9536_v35 = vld [vmem:[#allocation8 + $0x444] sm:$0xf] }
 0x26e   :  { %5057 = vmatpush.bf16.msrb.mxu2 %v8007_v16  ;;  %v8404_v16 = vld [vmem:[#allocation8 + $0x5d0] sm:$0xf0]  ;;  %v3214_v28 = vpop.f32.mrf.mxu1  ;;  %v9568_v13 = vld [vmem:[#allocation8 + $0x544] sm:$0xf] }
 0x26f   :  { %v8407_v34 = vor.u32 %v9584_v63, %v8404_v16  ;;  %5017 = vmatpush.bf16.msra.mxu0 %v8611_v37  ;;  %v8215_v16 = vor.u32 %v9536_v35, %v8212_v53  ;;  %v9528_v5 = vld [vmem:[#allocation8 + $0x404] sm:$0xf]  ;;  %v8084_v35 = vld [vmem:[#allocation8 + $0x350] sm:$0xf0] }
 0x270   :  { %5031 = vmatpush.bf16.msrb.mxu3 %v7719_v38  ;;  %v9634_v38 = vld [vmem:[#allocation8 + $0x74c] sm:$0xf0] }
 0x271   :  { %5046 = vmatpush.bf16.msrb.mxu1 %v7831_v25  ;;  %v8595_v27 = vor.u32 %v9634_v38, %v8594_v57  ;;  %v10425_v25 = vpop.f32.mrf.mxu0  ;;  %v8343_v38 = vor.u32 %v9568_v13, %v8340_v36  ;;  %v7754_v36 = vld [vmem:[#allocation8 + $0xa8] sm:$0xf] }
 0x272   :  { %5058 = vmatpush.bf16.msrb.mxu2 %v7991_v2  ;;  %v8388_v2 = vld [vmem:[#allocation8 + $0x5b0] sm:$0xf0] }
 0x273   :  { %v8391_v40 = vor.u32 %v9580_v29, %v8388_v2  ;;  %5018 = vmatpush.bf16.msra.mxu0 %v8595_v27  ;;  %v9512_v2 = vld [vmem:[#allocation8 + $0x384] sm:$0xf] }
 0x274   :  { %5032 = vmatpush.bf16.msrb.mxu3 %v7703_v11  ;;  %v7927_v11 = vor.u32 %v9464_v62, %v7924_v56  ;;  %v9532_v62 = vld [vmem:[#allocation8 + $0x424] sm:$0xf] }
 0x275   :  { %5047 = vmatpush.bf16.msrb.mxu1 %v7815_v33  ;;  %v3174_v33 = vpop.f32.mrf.mxu3 }
 0x276   :  { %5059 = vmatpush.bf16.msrb.mxu2 %v7975_v44  ;;  %v8372_v44 = vld [vmem:[#allocation8 + $0x590] sm:$0xf0]  ;;  %v3175_v63 = vadd.f32 %v3174_v33, %v3161_v61  ;;  %v3216_v24 = vpop.f32.mrf.mxu1  ;;  %v9459_v61 = vld [vmem:[#allocation8 + $0x1d4] sm:$0xf0] }
 0x277   :  { %v8375_v46 = vor.u32 %v9576_v48, %v8372_v44  ;;  %5019 = vmatpush.bf16.msra.mxu0 %v8579_v45  ;;  %v7786_v48 = vld [vmem:[#allocation8 + $0xe8] sm:$0xf]  ;;  %v9431_v44 = vld [vmem:[#allocation8 + $0xf4] sm:$0xf0]  ;;  %v8100_v33 = vld [vmem:[#allocation8 + $0x370] sm:$0xf0] }
 0x278   :  { %5033 = vmatpush.bf16.msrb.mxu3 %v7687_v39  ;;  %v9626_v39 = vld [vmem:[#allocation8 + $0x70c] sm:$0xf0]  ;;  %v3189_v27 = vadd.f32 %v10425_v25, %v3175_v63  ;;  %v7914_v25 = vld [vmem:[#allocation8 + $0x1e8] sm:$0xf] }
 0x279   :  { %5048 = vmatpush.bf16.msrb.mxu1 %v7799_v17  ;;  %v8563_v22 = vor.u32 %v9626_v39, %v8562_v15  ;;  %v8148_v17 = vld [vmem:[#allocation8 + $0x3d0] sm:$0xf0]  ;;  %v9463_v39 = vld [vmem:[#allocation8 + $0x1f4] sm:$0xf0] }
 0x27a   :  { %5060 = vmatpush.bf16.msrb.mxu2 %v7959_v58  ;;  %v8167_v58 = vor.u32 %v9524_v59, %v8164_v0  ;;  %v8151_v37 = vor.u32 %v9520_v54, %v8148_v17  ;;  %v8548_v17 = vld [vmem:[#allocation8 + $0x6f0] sm:$0xf0] }
 0x27b   :  { %5020 = vmatpush.bf16.msra.mxu0 %v8563_v22  ;;  %v7787_v22 = vor.u32 %v9431_v44, %v7786_v48  ;;  %v9415_v48 = vld [vmem:[#allocation8 + $0x74] sm:$0xf0] }
 0x27c   :  { %5034 = vmatpush.bf16.msrb.mxu3 %v7671_v20  ;;  %5049 = vmatmul.bf16.vlgmr.msrb.gmra.mxu1 %v10380_v52  ;;  %v3242_v20 = vpop.f32.mrf.mxu0  ;;  %v9766_v44 = vld [vmem:[#allocation7] sm:$0xff] }
 0x27d   :  { %5097 = vmatpush.bf16.msra.mxu1 %v8423_v14  ;;  %v3187_v14 = vadd.f32 %v10420_v9, %v3173_v49  ;;  %v3228_v57 = vpop.f32.mrf.mxu3  ;;  %v3202_v9 = vpop.f32.mrf.mxu2  ;;  %v7915_v49 = vor.u32 %v9463_v39, %v7914_v25  ;;  %v7850_v39 = vld [vmem:[#allocation8 + $0x168] sm:$0xf] }
 0x27e   :  { %5061 = vmatpush.bf16.msrb.mxu2 %v7943_v30  ;;  %v9516_v30 = vld [vmem:[#allocation8 + $0x3a4] sm:$0xf]  ;;  %v3203_v8 = vadd.f32 %v3202_v9, %v3189_v27  ;;  %v7738_v27 = vld [vmem:[#allocation8 + $0x88] sm:$0xf] }
 0x27f   :  { %5035 = vmatmul.bf16.vlgmr.msrb.gmra.mxu3 %v10378_v32  ;;  %5069 = vmatpush.bf16.msrb.mxu0 %v8167_v58  ;;  %v3201_v56 = vadd.f32 %v3200_v6, %v3187_v14  ;;  %v8135_v4 = vor.u32 %v9516_v30, %v8132_v7  ;;  %v9508_v6 = vld [vmem:[#allocation8 + $0x364] sm:$0xf]  ;;  %v9455_v30 = vld [vmem:[#allocation8 + $0x1b4] sm:$0xf0] }
 0x280   :  { %5083 = vmatpush.bf16.msra.mxu3 %v8295_v19  ;;  %v8359_v19 = vor.u32 %v9572_v1, %v8356_v31  ;;  %v7770_v1 = vld [vmem:[#allocation8 + $0xc8] sm:$0xf]  ;;  %v9427_v31 = vld [vmem:[#allocation8 + $0xd4] sm:$0xf0]  ;;  %v8103_v58 = vor.u32 %v9508_v6, %v8100_v33  ;;  %v9616_v7 = vld [vmem:[#allocation8 + $0x6c4] sm:$0xf] }
 0x281   :  { %5098 = vmatpush.bf16.msra.mxu1 %v8407_v34  ;;  %v9564_v34 = vld [vmem:[#allocation8 + $0x524] sm:$0xf]  ;;  %v3215_v23 = vadd.f32 %v3214_v28, %v3201_v56  ;;  %v7898_v28 = vld [vmem:[#allocation8 + $0x1c8] sm:$0xf]  ;;  %v7771_v53 = vor.u32 %v9427_v31, %v7770_v1  ;;  %v8500_v33 = vld [vmem:[#allocation8 + $0x690] sm:$0xf0] }
 0x282   :  { %5062 = vmatpush.bf16.msrb.mxu2 %v7927_v11  ;;  %v8116_v11 = vld [vmem:[#allocation8 + $0x390] sm:$0xf0]  ;;  %v8327_v50 = vor.u32 %v9564_v34, %v8324_v18  ;;  %v9500_v56 = vld [vmem:[#allocation8 + $0x324] sm:$0xf]  ;;  %v7834_v31 = vld [vmem:[#allocation8 + $0x148] sm:$0xf] }
 0x283   :  { %5070 = vmatpush.bf16.msrb.mxu0 %v8151_v37  ;;  %v3229_v41 = vadd.f32 %v3228_v57, %v3215_v23  ;;  %v8119_v15 = vor.u32 %v9512_v2, %v8116_v11  ;;  %v9423_v37 = vld [vmem:[#allocation8 + $0xb4] sm:$0xf0]  ;;  %v8068_v34 = vld [vmem:[#allocation8 + $0x330] sm:$0xf0]  ;;  %v7866_v2 = vld [vmem:[#allocation8 + $0x188] sm:$0xf] }
 0x284   :  { %5084 = vmatpush.bf16.msra.mxu3 %v8279_v42  ;;  %v8196_v42 = vld [vmem:[#allocation8 + $0x430] sm:$0xf0]  ;;  %v3244_v45 = vpop.f32.mrf.mxu0  ;;  %v7755_v18 = vor.u32 %v9423_v37, %v7754_v36  ;;  %v9419_v23 = vld [vmem:[#allocation8 + $0x94] sm:$0xf0]  ;;  %v9608_v6 = vld [vmem:[#allocation8 + $0x684] sm:$0xf] }
 0x285   :  { %5099 = vmatpush.bf16.msra.mxu1 %v8391_v40  ;;  %v8199_v29 = vor.u32 %v9532_v62, %v8196_v42  ;;  %v9560_v40 = vld [vmem:[#allocation8 + $0x504] sm:$0xf]  ;;  %v3243_v59 = vadd.f32 %v3242_v20, %v3229_v41  ;;  %v7899_v20 = vor.u32 %v9459_v61, %v7898_v28  ;;  %v8532_v42 = vld [vmem:[#allocation8 + $0x6d0] sm:$0xf0]  ;;  %v9451_v11 = vld [vmem:[#allocation8 + $0x194] sm:$0xf0]  ;;  %v7739_v41 = vor.u32 %v9419_v23, %v7738_v27 }
 0x286   :  { %v8311_v26 = vor.u32 %v9560_v40, %v8308_v60  ;;  %v8052_v40 = vld [vmem:[#allocation8 + $0x310] sm:$0xf0]  ;;  %v7722_v60 = vld [vmem:[#allocation8 + $0x68] sm:$0xf]  ;;  %v8503_v1 = vor.u32 %v9608_v6, %v8500_v33  ;;  %v9604_v61 = vld [vmem:[#allocation8 + $0x664] sm:$0xf] }
 0x287   :  { %5071 = vmatpush.bf16.msrb.mxu0 %v8135_v4  ;;  %v3351_v14 = vmax.f32 %v3243_v59, 0.0  ;;  %v3256_v4 = vpop.f32.mrf.mxu2  ;;  %v7706_v59 = vld [vmem:[#allocation8 + $0x48] sm:$0xf]  ;;  %v9439_v37 = vld [vmem:[#allocation8 + $0x134] sm:$0xf0] }
 0x288   :  { %5085 = vmatpush.bf16.msra.mxu3 %v8263_v55  ;;  %v8180_v55 = vld [vmem:[#allocation8 + $0x410] sm:$0xf0]  ;;  %v7818_v36 = vld [vmem:[#allocation8 + $0x128] sm:$0xf]  ;;  %v9559_v23 = vld [vmem:[#allocation8 + $0x4f4] sm:$0xf0] }
 0x289   :  { %5100 = vmatpush.bf16.msra.mxu1 %v8375_v46  ;;  %v8183_v43 = vor.u32 %v9528_v5, %v8180_v55  ;;  %v3230_v46 = vpop.f32.mrf.mxu3  ;;  %v8516_v5 = vld [vmem:[#allocation8 + $0x6b0] sm:$0xf0]  ;;  %v9496_v55 = vld [vmem:[#allocation8 + $0x304] sm:$0xf]  ;;  %v8298_v27 = vld [vmem:[#allocation8 + $0x4e8] sm:$0xf] }
 0x28a   :  { %v8410_v6 = vld [vmem:[#allocation8 + $0x5c8] sm:$0xf]  ;;  %v9587_v33 = vld [vmem:[#allocation8 + $0x5d4] sm:$0xf0] }
 0x28b   :  { %5072 = vmatpush.bf16.msrb.mxu0 %v8119_v15  ;;  %v588_v15 = vperm.slane %v9766_v44, 7 }
 0x28c   :  { %5086 = vmatpush.bf16.msra.mxu3 %v8247_v12  ;;  %v3217_v12 = vadd.f32 %v3216_v24, %v3203_v8  ;;  %v10432_v62 = vpop.f32.mrf.mxu0  ;;  %v9612_v24 = vld [vmem:[#allocation8 + $0x6a4] sm:$0xf] }
 0x28d   :  { %5101 = vmatpush.bf16.msra.mxu1 %v8359_v19  ;;  %v9504_v19 = vld [vmem:[#allocation8 + $0x344] sm:$0xf]  ;;  %v8519_v25 = vor.u32 %v9612_v24, %v8516_v5  ;;  %v8426_v24 = vld [vmem:[#allocation8 + $0x5e8] sm:$0xf] }
 0x28e   :  { %v3231_v0 = vadd.f32 %v3230_v46, %v3217_v12  ;;  %v8087_v57 = vor.u32 %v9504_v19, %v8084_v35  ;;  %v9447_v12 = vld [vmem:[#allocation8 + $0x174] sm:$0xf0]  ;;  %v7723_v46 = vor.u32 %v9415_v48, %v7722_v60  ;;  %v9592_v60 = vld [vmem:[#allocation8 + $0x604] sm:$0xf] }
 0x28f   :  { %5073 = vmatpush.bf16.msrb.mxu0 %v8103_v58  ;;  %v9443_v58 = vld [vmem:[#allocation8 + $0x154] sm:$0xf0]  ;;  %v3258_v28 = vpop.f32.mrf.mxu2 }
 0x290   :  { %5087 = vmatpush.bf16.msra.mxu3 %v8231_v21  ;;  %v9620_v21 = vld [vmem:[#allocation8 + $0x6e4] sm:$0xf]  ;;  %v3245_v54 = vadd.f32 %v3244_v45, %v3231_v0  ;;  %v7867_v45 = vor.u32 %v9451_v11, %v7866_v2  ;;  %v9411_v0 = vld [vmem:[#allocation8 + $0x54] sm:$0xf0]  ;;  %v7835_v35 = vor.u32 %v9443_v58, %v7834_v31  ;;  %v8452_v11 = vld [vmem:[#allocation8 + $0x630] sm:$0xf0]  ;;  %v8411_v31 = vor.u32 %v9587_v33, %v8410_v6 }
 0x291   :  { %5102 = vmatpush.bf16.msra.mxu1 %v8343_v38  ;;  %v8551_v63 = vor.u32 %v9620_v21, %v8548_v17  ;;  %v8484_v21 = vld [vmem:[#allocation8 + $0x670] sm:$0xf0]  ;;  %v7707_v17 = vor.u32 %v9411_v0, %v7706_v59  ;;  %v9495_v59 = vld [vmem:[#allocation8 + $0x2f4] sm:$0xf0]  ;;  %v8266_v58 = vld [vmem:[#allocation8 + $0x4a8] sm:$0xf] }
 0x292   :  { %v3359_v13 = vmax.f32 %v3245_v54, 0.0  ;;  %v9571_v6 = vld [vmem:[#allocation8 + $0x554] sm:$0xf0]  ;;  %v9644_v33 = vld [vmem:[#allocation8 + $0x7a4] sm:$0xf] }
 0x293   :  { %5074 = vmatpush.bf16.msrb.mxu0 %v8087_v57  ;;  %v7819_v57 = vor.u32 %v9439_v37, %v7818_v36 }
 0x294   :  { %5088 = vmatpush.bf16.msra.mxu3 %v8215_v16  ;;  %v7882_v16 = vld [vmem:[#allocation8 + $0x1a8] sm:$0xf]  ;;  %v10430_v38 = vpack.c.bf16 %v3359_v13, %v3351_v14  ;;  %v3284_v8 = vpop.f32.mrf.mxu1  ;;  %v9407_v14 = vld [vmem:[#allocation8 + $0x34] sm:$0xf0] }
 0x295   :  { %5103 = vmatpush.bf16.msra.mxu1 %v8327_v50  ;;  %v7883_v9 = vor.u32 %v9455_v30, %v7882_v16  ;;  %v8071_v50 = vor.u32 %v9500_v56, %v8068_v34  ;;  %v8468_v16 = vld [vmem:[#allocation8 + $0x650] sm:$0xf0]  ;;  %v7802_v56 = vld [vmem:[#allocation8 + $0x108] sm:$0xf]  ;;  %v9435_v34 = vld [vmem:[#allocation8 + $0x114] sm:$0xf0] }
 0x296   :  { %5007 = vmatmul.bf16.vlgmr.msra.gmra.mxu2 %v10430_v38 }
 0x297   :  { %5111 = vmatpush.bf16.msra.mxu2 %v8551_v63  ;;  %5075 = vmatpush.bf16.msrb.mxu0 %v8071_v50  ;;  %v9600_v63 = vld [vmem:[#allocation8 + $0x644] sm:$0xf]  ;;  %v9591_v50 = vld [vmem:[#allocation8 + $0x5f4] sm:$0xf0] }
 0x298   :  { %5089 = vmatpush.bf16.msra.mxu3 %v8199_v29  ;;  %v8535_v29 = vor.u32 %v9616_v7, %v8532_v42  ;;  %v7674_v7 = vld [vmem:[#allocation8 + $0x8] sm:$0xf]  ;;  %v9403_v42 = vld [vmem:[#allocation8 + $0x14] sm:$0xf0] }
 0x299   :  { %5104 = vmatpush.bf16.msra.mxu1 %v8311_v26  ;;  %v3272_v26 = vpop.f32.mrf.mxu0 }
 0x29b   :  { %5112 = vmatpush.bf16.msra.mxu2 %v8535_v29 }
 0x29c   :  { %5090 = vmatpush.bf16.msra.mxu3 %v8183_v43  ;;  %5105 = vmatmul.bf16.vlgmr.msra.gmra.mxu1 %v10417_v51  ;;  %v8055_v43 = vor.u32 %v9496_v55, %v8052_v40  ;;  %v3286_v54 = vpop.f32.mrf.mxu1  ;;  %v7675_v55 = vor.u32 %v9403_v42, %v7674_v7  ;;  %v9579_v42 = vld [vmem:[#allocation8 + $0x594] sm:$0xf0] }
 0x29d   :  { %5153 = vmatpush.bf16.msrb.mxu1 %v7915_v49  ;;  %v3257_v49 = vadd.f32 %v3256_v4, %v588_v15 }
 0x29e   :  { %5076 = vmatpush.bf16.msrb.mxu0 %v8055_v43 }
 0x29f   :  { %5091 = vmatmul.bf16.vlgmr.msra.gmra.mxu3 %v10414_v47  ;;  %5113 = vmatpush.bf16.msra.mxu2 %v8519_v25  ;;  %v3271_v13 = vadd.f32 %v10432_v62, %v3257_v49  ;;  %v8471_v62 = vor.u32 %v9600_v63, %v8468_v16  ;;  %v8436_v25 = vld [vmem:[#allocation8 + $0x610] sm:$0xf0]  ;;  %v8250_v63 = vld [vmem:[#allocation8 + $0x488] sm:$0xf]  ;;  %v9547_v16 = vld [vmem:[#allocation8 + $0x494] sm:$0xf0] }
 0x2a0   :  { %5139 = vmatpush.bf16.msrb.mxu3 %v7787_v22  ;;  %v7851_v22 = vor.u32 %v9447_v12, %v7850_v39  ;;  %v8282_v39 = vld [vmem:[#allocation8 + $0x4c8] sm:$0xf]  ;;  %v9555_v12 = vld [vmem:[#allocation8 + $0x4d4] sm:$0xf0]  ;;  %v8439_v0 = vor.u32 %v9592_v60, %v8436_v25 }
 0x2a1   :  { %5154 = vmatpush.bf16.msrb.mxu1 %v7899_v20  ;;  %v8487_v20 = vor.u32 %v9604_v61, %v8484_v21  ;;  %v3285_v4 = vadd.f32 %v3284_v8, %v3271_v13  ;;  %v8283_v49 = vor.u32 %v9555_v12, %v8282_v39  ;;  %v7994_v60 = vld [vmem:[#allocation8 + $0x288] sm:$0xf]  ;;  %v9539_v25 = vld [vmem:[#allocation8 + $0x454] sm:$0xf0] }
 0x2a2   :  { %v3298_v19 = vpop.f32.mrf.mxu3 }
 0x2a3   :  { %5114 = vmatpush.bf16.msra.mxu2 %v8503_v1  ;;  %v3299_v5 = vadd.f32 %v3298_v19, %v3285_v4  ;;  %v8010_v4 = vld [vmem:[#allocation8 + $0x2a8] sm:$0xf] }
 0x2a4   :  { %5140 = vmatpush.bf16.msrb.mxu3 %v7771_v53  ;;  %v7690_v53 = vld [vmem:[#allocation8 + $0x28] sm:$0xf]  ;;  %v3326_v29 = vpop.f32.mrf.mxu0  ;;  %v3340_v40 = vpop.f32.mrf.mxu1 }
 0x2a5   :  { %5155 = vmatpush.bf16.msrb.mxu1 %v7883_v9  ;;  %v7691_v30 = vor.u32 %v9407_v14, %v7690_v53  ;;  %v9596_v9 = vld [vmem:[#allocation8 + $0x624] sm:$0xf]  ;;  %v9491_v53 = vld [vmem:[#allocation8 + $0x2d4] sm:$0xf0] }
 0x2a6   :  { %5063 = vmatmul.bf16.vlgmr.msrb.gmra.mxu2 %v10397_v10  ;;  %v8455_v44 = vor.u32 %v9596_v9, %v8452_v11  ;;  %v8251_v9 = vor.u32 %v9547_v16, %v8250_v63  ;;  %v9543_v11 = vld [vmem:[#allocation8 + $0x474] sm:$0xf0]  ;;  %v9636_v16 = vld [vmem:[#allocation8 + $0x764] sm:$0xf] }
 0x2a7   :  { %5115 = vmatpush.bf16.msra.mxu2 %v8487_v20  ;;  %v9563_v63 = vld [vmem:[#allocation8 + $0x514] sm:$0xf0] }
 0x2a8   :  { %5141 = vmatpush.bf16.msrb.mxu3 %v7755_v18  ;;  %v3259_v18 = vadd.f32 %v3258_v28, %v588_v15  ;;  %v3312_v2 = vpop.f32.mrf.mxu2  ;;  %v8427_v15 = vor.u32 %v9591_v50, %v8426_v24  ;;  %v9551_v28 = vld [vmem:[#allocation8 + $0x4b4] sm:$0xf0] }
 0x2a9   :  { %5156 = vmatpush.bf16.msrb.mxu1 %v7867_v45  ;;  %v8299_v45 = vor.u32 %v9559_v23, %v8298_v27  ;;  %v3313_v8 = vadd.f32 %v3312_v2, %v3299_v5  ;;  %v8267_v13 = vor.u32 %v9551_v28, %v8266_v58  ;;  %v8234_v2 = vld [vmem:[#allocation8 + $0x468] sm:$0xf] }
 0x2aa   :  { %v3273_v48 = vadd.f32 %v3272_v26, %v3259_v18  ;;  %v3300_v43 = vpop.f32.mrf.mxu3  ;;  %v8676_v18 = vld [vmem:[#allocation8 + $0x7f0] sm:$0xf0]  ;;  %v8362_v5 = vld [vmem:[#allocation8 + $0x568] sm:$0xf] }
 0x2ab   :  { %5116 = vmatpush.bf16.msra.mxu2 %v8471_v62  ;;  %v3327_v1 = vadd.f32 %v3326_v29, %v3313_v8  ;;  %v9487_v62 = vld [vmem:[#allocation8 + $0x2b4] sm:$0xf0]  ;;  %v8235_v8 = vor.u32 %v9543_v11, %v8234_v2  ;;  %v8330_v28 = vld [vmem:[#allocation8 + $0x528] sm:$0xf] }
 0x2ac   :  { %5142 = vmatpush.bf16.msrb.mxu3 %v7739_v41  ;;  %v7803_v41 = vor.u32 %v9435_v34, %v7802_v56  ;;  %v3328_v14 = vpop.f32.mrf.mxu0  ;;  %v9652_v56 = vld [vmem:[#allocation8 + $0x7e4] sm:$0xf]  ;;  %v8011_v50 = vor.u32 %v9487_v62, %v8010_v4  ;;  %v7916_v4 = vld [vmem:[#allocation8 + $0x1f8] sm:$0xf0] }
 0x2ad   :  { %5157 = vmatpush.bf16.msrb.mxu1 %v7851_v22  ;;  %v8042_v22 = vld [vmem:[#allocation8 + $0x2e8] sm:$0xf]  ;;  %v3341_v20 = vadd.f32 %v3340_v40, %v3327_v1  ;;  %v8679_v24 = vor.u32 %v9652_v56, %v8676_v18  ;;  %v9648_v40 = vld [vmem:[#allocation8 + $0x7c4] sm:$0xf]  ;;  %v9461_v18 = vld [vmem:[#allocation8 + $0x1ec] sm:$0xf] }
 0x2ae   :  { %v8043_v21 = vor.u32 %v9495_v59, %v8042_v22  ;;  %v7978_v22 = vld [vmem:[#allocation8 + $0x268] sm:$0xf]  ;;  %v9479_v59 = vld [vmem:[#allocation8 + $0x274] sm:$0xf0]  ;;  %v7919_v11 = vor.u32 %v9461_v18, %v7916_v4 }
 0x2af   :  { %5117 = vmatpush.bf16.msra.mxu2 %v8455_v44  ;;  %v3352_v27 = vmax.f32 %v3341_v20, 0.0  ;;  %v8202_v1 = vld [vmem:[#allocation8 + $0x428] sm:$0xf]  ;;  %v7979_v58 = vor.u32 %v9479_v59, %v7978_v22  ;;  %v7884_v22 = vld [vmem:[#allocation8 + $0x1b8] sm:$0xf0] }
 0x2b0   :  { %5143 = vmatpush.bf16.msrb.mxu3 %v7723_v46  ;;  %v3287_v46 = vadd.f32 %v3286_v54, %v3273_v48  ;;  %v3314_v61 = vpop.f32.mrf.mxu2  ;;  %v9583_v54 = vld [vmem:[#allocation8 + $0x5b4] sm:$0xf0]  ;;  %v8314_v20 = vld [vmem:[#allocation8 + $0x508] sm:$0xf] }
 0x2b1   :  { %5158 = vmatpush.bf16.msrb.mxu1 %v7835_v35  ;;  %v8026_v35 = vld [vmem:[#allocation8 + $0x2c8] sm:$0xf]  ;;  %v9483_v48 = vld [vmem:[#allocation8 + $0x294] sm:$0xf0]  ;;  %v8315_v62 = vor.u32 %v9563_v63, %v8314_v20  ;;  %v7724_v63 = vld [vmem:[#allocation8 + $0x78] sm:$0xf0] }
 0x2b2   :  { %v3301_v26 = vadd.f32 %v3300_v43, %v3287_v46  ;;  %v8027_v7 = vor.u32 %v9491_v53, %v8026_v35  ;;  %v7995_v12 = vor.u32 %v9483_v48, %v7994_v60  ;;  %v8346_v43 = vld [vmem:[#allocation8 + $0x548] sm:$0xf]  ;;  %v8644_v46 = vld [vmem:[#allocation8 + $0x7b0] sm:$0xf0]  ;;  %v9623_v48 = vld [vmem:[#allocation8 + $0x6f4] sm:$0xf0] }
 0x2b3   :  { %5118 = vmatpush.bf16.msra.mxu2 %v8439_v0  ;;  %v8554_v60 = vld [vmem:[#allocation8 + $0x6e8] sm:$0xf]  ;;  %v9611_v18 = vld [vmem:[#allocation8 + $0x694] sm:$0xf0] }
 0x2b4   :  { %5144 = vmatpush.bf16.msrb.mxu3 %v7707_v17  ;;  %v8394_v17 = vld [vmem:[#allocation8 + $0x5a8] sm:$0xf]  ;;  %v3315_v19 = vadd.f32 %v3314_v61, %v3301_v26  ;;  %v9535_v26 = vld [vmem:[#allocation8 + $0x434] sm:$0xf0] }
 0x2b5   :  { %5159 = vmatpush.bf16.msrb.mxu1 %v7819_v57  ;;  %v8395_v37 = vor.u32 %v9583_v54, %v8394_v17  ;;  %v8378_v57 = vld [vmem:[#allocation8 + $0x588] sm:$0xf]  ;;  %v9567_v61 = vld [vmem:[#allocation8 + $0x534] sm:$0xf0]  ;;  %v8628_v17 = vld [vmem:[#allocation8 + $0x790] sm:$0xf0]  ;;  %v8203_v35 = vor.u32 %v9535_v26, %v8202_v1 }
 0x2b6   :  { %v3329_v36 = vadd.f32 %v3328_v14, %v3315_v19  ;;  %5119 = vmatmul.bf16.vlgmr.msra.gmra.mxu2 %v10430_v38  ;;  %v8379_v29 = vor.u32 %v9579_v42, %v8378_v57  ;;  %v7962_v54 = vld [vmem:[#allocation8 + $0x248] sm:$0xf]  ;;  %v9475_v19 = vld [vmem:[#allocation8 + $0x254] sm:$0xf0]  ;;  %v8331_v53 = vor.u32 %v9567_v61, %v8330_v28  ;;  %v9429_v42 = vld [vmem:[#allocation8 + $0xec] sm:$0xf] }
 0x2b7   :  { %5167 = vmatpush.bf16.msrb.mxu2 %v8043_v21  ;;  %v9640_v21 = vld [vmem:[#allocation8 + $0x784] sm:$0xf]  ;;  %v8186_v14 = vld [vmem:[#allocation8 + $0x408] sm:$0xf]  ;;  %v9471_v57 = vld [vmem:[#allocation8 + $0x234] sm:$0xf0] }
 0x2b8   :  { %5145 = vmatpush.bf16.msrb.mxu3 %v7691_v30  ;;  %v3342_v30 = vpop.f32.mrf.mxu1  ;;  %v8538_v59 = vld [vmem:[#allocation8 + $0x6c8] sm:$0xf]  ;;  %v9624_v1 = vld [vmem:[#allocation8 + $0x704] sm:$0xf]  ;;  %v9417_v28 = vld [vmem:[#allocation8 + $0x8c] sm:$0xf] }
 0x2b9   :  { %5160 = vmatpush.bf16.msrb.mxu1 %v7803_v41  ;;  %v3343_v34 = vadd.f32 %v3342_v30, %v3329_v36  ;;  %v8631_v36 = vor.u32 %v9640_v21, %v8628_v17  ;;  %v8612_v30 = vld [vmem:[#allocation8 + $0x770] sm:$0xf0]  ;;  %v7740_v61 = vld [vmem:[#allocation8 + $0x98] sm:$0xf0]  ;;  %v9449_v17 = vld [vmem:[#allocation8 + $0x18c] sm:$0xf] }
 0x2ba   :  { %v7743_v20 = vor.u32 %v9417_v28, %v7740_v61  ;;  %v8458_v28 = vld [vmem:[#allocation8 + $0x628] sm:$0xf]  ;;  %v9599_v61 = vld [vmem:[#allocation8 + $0x634] sm:$0xf0] }
 0x2bb   :  { %v3360_v23 = vmax.f32 %v3343_v34, 0.0  ;;  %5168 = vmatpush.bf16.msrb.mxu2 %v8027_v7  ;;  %v7946_v7 = vld [vmem:[#allocation8 + $0x228] sm:$0xf]  ;;  %v7788_v34 = vld [vmem:[#allocation8 + $0xf8] sm:$0xf0] }
 0x2bc   :  { %5146 = vmatpush.bf16.msrb.mxu3 %v7675_v55  ;;  %5161 = vmatmul.bf16.vlgmr.msrb.gmra.mxu1 %v10380_v52  ;;  %v9575_v55 = vld [vmem:[#allocation8 + $0x574] sm:$0xf0]  ;;  %v7791_v2 = vor.u32 %v9429_v42, %v7788_v34  ;;  %v8154_v42 = vld [vmem:[#allocation8 + $0x3c8] sm:$0xf] }
 0x2bd   :  { %5209 = vmatpush.bf16.msra.mxu1 %v8427_v15  ;;  %v10441_v41 = vpack.c.bf16 %v3360_v23, %v3352_v27  ;;  %v8363_v44 = vor.u32 %v9575_v55, %v8362_v5  ;;  %v8218_v15 = vld [vmem:[#allocation8 + $0x448] sm:$0xf]  ;;  %v7947_v27 = vor.u32 %v9471_v57, %v7946_v7  ;;  %v9632_v23 = vld [vmem:[#allocation8 + $0x744] sm:$0xf]  ;;  %v9425_v5 = vld [vmem:[#allocation8 + $0xcc] sm:$0xf] }
 0x2be   :  { %v8219_v0 = vor.u32 %v9539_v25, %v8218_v15  ;;  %v7772_v55 = vld [vmem:[#allocation8 + $0xd8] sm:$0xf0]  ;;  %v9445_v7 = vld [vmem:[#allocation8 + $0x16c] sm:$0xf]  ;;  %v8506_v34 = vld [vmem:[#allocation8 + $0x688] sm:$0xf] }
 0x2bf   :  { %5147 = vmatmul.bf16.vlgmr.msrb.gmra.mxu3 %v10378_v32  ;;  %5021 = vmatmul.bf16.vlgmr.msra.gmra.mxu0 %v10441_v41  ;;  %v7775_v15 = vor.u32 %v9425_v5, %v7772_v55  ;;  %v7852_v57 = vld [vmem:[#allocation8 + $0x178] sm:$0xf0]  ;;  %v8490_v5 = vld [vmem:[#allocation8 + $0x668] sm:$0xf]  ;;  %v9607_v55 = vld [vmem:[#allocation8 + $0x674] sm:$0xf0] }
 0x2c0   :  { %5195 = vmatpush.bf16.msra.mxu3 %v8299_v45  ;;  %v8660_v45 = vld [vmem:[#allocation8 + $0x7d0] sm:$0xf0]  ;;  %5125 = vmatpush.bf16.msra.mxu0 %v8679_v24  ;;  %v7930_v24 = vld [vmem:[#allocation8 + $0x208] sm:$0xf] }
 0x2c1   :  { %5210 = vmatpush.bf16.msra.mxu1 %v8411_v31  ;;  %5169 = vmatpush.bf16.msrb.mxu2 %v8011_v50  ;;  %v8663_v39 = vor.u32 %v9648_v40, %v8660_v45  ;;  %v8647_v31 = vor.u32 %v9644_v33, %v8644_v46  ;;  %v9467_v50 = vld [vmem:[#allocation8 + $0x214] sm:$0xf0]  ;;  %v9457_v40 = vld [vmem:[#allocation8 + $0x1cc] sm:$0xf]  ;;  %v7900_v45 = vld [vmem:[#allocation8 + $0x1d8] sm:$0xf0] }
 0x2c2   :  { %v7903_v25 = vor.u32 %v9457_v40, %v7900_v45  ;;  %v7756_v33 = vld [vmem:[#allocation8 + $0xb8] sm:$0xf0]  ;;  %v9453_v46 = vld [vmem:[#allocation8 + $0x1ac] sm:$0xf] }
 0x2c4   :  { %5196 = vmatpush.bf16.msra.mxu3 %v8283_v49  ;;  %v8347_v49 = vor.u32 %v9571_v6, %v8346_v43  ;;  %5126 = vmatpush.bf16.msra.mxu0 %v8663_v39  ;;  %v9628_v39 = vld [vmem:[#allocation8 + $0x724] sm:$0xf]  ;;  %v9421_v43 = vld [vmem:[#allocation8 + $0xac] sm:$0xf]  ;;  %v8555_v6 = vor.u32 %v9623_v48, %v8554_v60  ;;  %v7692_v48 = vld [vmem:[#allocation8 + $0x38] sm:$0xf0] }
 0x2c5   :  { %5211 = vmatpush.bf16.msra.mxu1 %v8395_v37  ;;  %5170 = vmatpush.bf16.msrb.mxu2 %v7995_v12  ;;  %v7963_v37 = vor.u32 %v9475_v19, %v7962_v54  ;;  %v8580_v12 = vld [vmem:[#allocation8 + $0x730] sm:$0xf0]  ;;  %v7759_v26 = vor.u32 %v9421_v43, %v7756_v33  ;;  %v7868_v54 = vld [vmem:[#allocation8 + $0x198] sm:$0xf0]  ;;  %v8170_v19 = vld [vmem:[#allocation8 + $0x3e8] sm:$0xf] }
 0x2c6   :  { %v9405_v60 = vld [vmem:[#allocation8 + $0x2c] sm:$0xf]  ;;  %v8474_v43 = vld [vmem:[#allocation8 + $0x648] sm:$0xf] }
 0x2c7   :  { %v7695_v33 = vor.u32 %v9405_v60, %v7692_v48  ;;  %v8058_v60 = vld [vmem:[#allocation8 + $0x308] sm:$0xf] }
 0x2c8   :  { %5197 = vmatpush.bf16.msra.mxu3 %v8267_v13  ;;  %v9531_v13 = vld [vmem:[#allocation8 + $0x414] sm:$0xf0]  ;;  %5127 = vmatpush.bf16.msra.mxu0 %v8647_v31  ;;  %v7887_v31 = vor.u32 %v9453_v46, %v7884_v22  ;;  %v9401_v22 = vld [vmem:[#allocation8 + $0xc] sm:$0xf] }
 0x2c9   :  { %5212 = vmatpush.bf16.msra.mxu1 %v8379_v29  ;;  %5171 = vmatpush.bf16.msrb.mxu2 %v7979_v58  ;;  %v8187_v56 = vor.u32 %v9531_v13, %v8186_v14  ;;  %v8596_v29 = vld [vmem:[#allocation8 + $0x750] sm:$0xf0]  ;;  %v9615_v14 = vld [vmem:[#allocation8 + $0x6b4] sm:$0xf0] }
 0x2ca   :  { %v8564_v58 = vld [vmem:[#allocation8 + $0x710] sm:$0xf0] }
 0x2cb   :  { %v8567_v13 = vor.u32 %v9624_v1, %v8564_v58  ;;  %v9511_v58 = vld [vmem:[#allocation8 + $0x374] sm:$0xf0] }
 0x2cc   :  { %5198 = vmatpush.bf16.msra.mxu3 %v8251_v9  ;;  %5128 = vmatpush.bf16.msra.mxu0 %v8631_v36  ;;  %v8615_v9 = vor.u32 %v9636_v16, %v8612_v30  ;;  %v7871_v36 = vor.u32 %v9449_v17, %v7868_v54  ;;  %v8300_v17 = vld [vmem:[#allocation8 + $0x4f8] sm:$0xf0]  ;;  %v9589_v54 = vld [vmem:[#allocation8 + $0x5ec] sm:$0xf] }
 0x2cd   :  { %5213 = vmatpush.bf16.msra.mxu1 %v8363_v44  ;;  %5172 = vmatpush.bf16.msrb.mxu2 %v7963_v37  ;;  %v7931_v44 = vor.u32 %v9467_v50, %v7930_v24  ;;  %v9413_v37 = vld [vmem:[#allocation8 + $0x6c] sm:$0xf]  ;;  %v8138_v24 = vld [vmem:[#allocation8 + $0x3a8] sm:$0xf]  ;;  %v9519_v50 = vld [vmem:[#allocation8 + $0x3b4] sm:$0xf0] }
 0x2ce   :  { %v7727_v4 = vor.u32 %v9413_v37, %v7724_v63 }
 0x2cf   :  { %5077 = vmatmul.bf16.vlgmr.msrb.gmra.mxu0 %v10399_v3 }
 0x2d0   :  { %5199 = vmatpush.bf16.msra.mxu3 %v8235_v8  ;;  %5129 = vmatpush.bf16.msra.mxu0 %v8615_v9  ;;  %v8599_v8 = vor.u32 %v9632_v23, %v8596_v29  ;;  %v9409_v9 = vld [vmem:[#allocation8 + $0x4c] sm:$0xf]  ;;  %v8507_v29 = vor.u32 %v9611_v18, %v8506_v34  ;;  %v8044_v18 = vld [vmem:[#allocation8 + $0x2f8] sm:$0xf0] }
 0x2d1   :  { %5214 = vmatpush.bf16.msra.mxu1 %v8347_v49  ;;  %5173 = vmatpush.bf16.msrb.mxu2 %v7947_v27  ;;  %v8583_v49 = vor.u32 %v9628_v39, %v8580_v12  ;;  %v7708_v27 = vld [vmem:[#allocation8 + $0x58] sm:$0xf0]  ;;  %v8122_v39 = vld [vmem:[#allocation8 + $0x388] sm:$0xf]  ;;  %v9515_v12 = vld [vmem:[#allocation8 + $0x394] sm:$0xf0] }
 0x2d2   :  { %v7711_v40 = vor.u32 %v9409_v9, %v7708_v27  ;;  %v9493_v34 = vld [vmem:[#allocation8 + $0x2ec] sm:$0xf] }
 0x2d4   :  { %5200 = vmatpush.bf16.msra.mxu3 %v8219_v0  ;;  %v9619_v0 = vld [vmem:[#allocation8 + $0x6d4] sm:$0xf0]  ;;  %5130 = vmatpush.bf16.msra.mxu0 %v8599_v8  ;;  %v8139_v8 = vor.u32 %v9519_v50, %v8138_v24  ;;  %v8268_v24 = vld [vmem:[#allocation8 + $0x4b8] sm:$0xf0]  ;;  %v9581_v50 = vld [vmem:[#allocation8 + $0x5ac] sm:$0xf] }
 0x2d5   :  { %5215 = vmatpush.bf16.msra.mxu1 %v8331_v53  ;;  %5174 = vmatpush.bf16.msrb.mxu2 %v7931_v44  ;;  %v8539_v21 = vor.u32 %v9619_v0, %v8538_v59  ;;  %v8522_v53 = vld [vmem:[#allocation8 + $0x6a8] sm:$0xf]  ;;  %v8491_v44 = vor.u32 %v9607_v55, %v8490_v5  ;;  %v7676_v59 = vld [vmem:[#allocation8 + $0x18] sm:$0xf0]  ;;  %v9433_v0 = vld [vmem:[#allocation8 + $0x10c] sm:$0xf] }
 0x2d6   :  { %v8523_v30 = vor.u32 %v9615_v14, %v8522_v53  ;;  %v8396_v5 = vld [vmem:[#allocation8 + $0x5b8] sm:$0xf0]  ;;  %v9489_v55 = vld [vmem:[#allocation8 + $0x2cc] sm:$0xf] }
 0x2d8   :  { %5201 = vmatpush.bf16.msra.mxu3 %v8203_v35  ;;  %5175 = vmatmul.bf16.vlgmr.msrb.gmra.mxu2 %v10397_v10  ;;  %v9527_v35 = vld [vmem:[#allocation8 + $0x3f4] sm:$0xf0] }
 0x2d9   :  { %5216 = vmatpush.bf16.msra.mxu1 %v8315_v62  ;;  %5223 = vmatpush.bf16.msra.mxu2 %v8555_v6  ;;  %v8171_v16 = vor.u32 %v9527_v35, %v8170_v19  ;;  %v7855_v62 = vor.u32 %v9445_v7, %v7852_v57  ;;  %v9603_v6 = vld [vmem:[#allocation8 + $0x654] sm:$0xf0]  ;;  %v8428_v19 = vld [vmem:[#allocation8 + $0x5f8] sm:$0xf0]  ;;  %v7679_v35 = vor.u32 %v9401_v22, %v7676_v59  ;;  %v9553_v7 = vld [vmem:[#allocation8 + $0x4cc] sm:$0xf] }
 0x2da   :  { %5131 = vmatpush.bf16.msra.mxu0 %v8583_v49  ;;  %v8123_v49 = vor.u32 %v9515_v12, %v8122_v39  ;;  %v8475_v1 = vor.u32 %v9603_v6, %v8474_v43  ;;  %v8431_v63 = vor.u32 %v9589_v54, %v8428_v19  ;;  %v8284_v57 = vld [vmem:[#allocation8 + $0x4d8] sm:$0xf0]  ;;  %v8682_v12 = vld [vmem:[#allocation8 + $0x7e8] sm:$0xf]  ;;  %v9655_v43 = vld [vmem:[#allocation8 + $0x7f4] sm:$0xf0] }
 0x2db   :  { %v8287_v9 = vor.u32 %v9553_v7, %v8284_v57  ;;  %v8380_v39 = vld [vmem:[#allocation8 + $0x598] sm:$0xf0]  ;;  %v9485_v6 = vld [vmem:[#allocation8 + $0x2ac] sm:$0xf] }
 0x2dc   :  { %5202 = vmatpush.bf16.msra.mxu3 %v8187_v56  ;;  %5217 = vmatmul.bf16.vlgmr.msra.gmra.mxu1 %v10417_v51  ;;  %v9523_v56 = vld [vmem:[#allocation8 + $0x3d4] sm:$0xf0] }
 0x2dd   :  { %5265 = vmatpush.bf16.msrb.mxu1 %v7919_v11  ;;  %5224 = vmatpush.bf16.msra.mxu2 %v8539_v21  ;;  %v8155_v23 = vor.u32 %v9523_v56, %v8154_v42  ;;  %v7836_v11 = vld [vmem:[#allocation8 + $0x158] sm:$0xf0]  ;;  %v9557_v21 = vld [vmem:[#allocation8 + $0x4ec] sm:$0xf] }
 0x2de   :  { %5132 = vmatpush.bf16.msra.mxu0 %v8567_v13  ;;  %v8459_v13 = vor.u32 %v9599_v61, %v8458_v28  ;;  %v8303_v37 = vor.u32 %v9557_v21, %v8300_v17  ;;  %v9585_v42 = vld [vmem:[#allocation8 + $0x5cc] sm:$0xf]  ;;  %v8412_v56 = vld [vmem:[#allocation8 + $0x5d8] sm:$0xf0]  ;;  %v8666_v28 = vld [vmem:[#allocation8 + $0x7c8] sm:$0xf] }
 0x2df   :  { %5203 = vmatmul.bf16.vlgmr.msra.gmra.mxu3 %v10414_v47  ;;  %v8415_v27 = vor.u32 %v9585_v42, %v8412_v56  ;;  %v9651_v61 = vld [vmem:[#allocation8 + $0x7d4] sm:$0xf0]  ;;  %v9481_v21 = vld [vmem:[#allocation8 + $0x28c] sm:$0xf]  ;;  %v7996_v17 = vld [vmem:[#allocation8 + $0x298] sm:$0xf0] }
 0x2e0   :  { %5251 = vmatpush.bf16.msrb.mxu3 %v7791_v2  ;;  %v9441_v2 = vld [vmem:[#allocation8 + $0x14c] sm:$0xf]  ;;  %v8204_v56 = vld [vmem:[#allocation8 + $0x438] sm:$0xf0] }
 0x2e1   :  { %5266 = vmatpush.bf16.msrb.mxu1 %v7903_v25  ;;  %5225 = vmatpush.bf16.msra.mxu2 %v8523_v30  ;;  %v7839_v45 = vor.u32 %v9441_v2, %v7836_v11  ;;  %v7820_v25 = vld [vmem:[#allocation8 + $0x138] sm:$0xf0]  ;;  %v9595_v30 = vld [vmem:[#allocation8 + $0x614] sm:$0xf0]  ;;  %v9549_v2 = vld [vmem:[#allocation8 + $0x4ac] sm:$0xf]  ;;  %v8047_v11 = vor.u32 %v9493_v34, %v8044_v18 }
 0x2e2   :  { %5181 = vmatpush.bf16.msrb.mxu0 %v8171_v16  ;;  %v8442_v16 = vld [vmem:[#allocation8 + $0x608] sm:$0xf]  ;;  %v8271_v48 = vor.u32 %v9549_v2, %v8268_v24  ;;  %v9533_v42 = vld [vmem:[#allocation8 + $0x42c] sm:$0xf] }
 0x2e3   :  { %5133 = vmatmul.bf16.vlgmr.msra.gmra.mxu0 %v10441_v41  ;;  %v8207_v2 = vor.u32 %v9533_v42, %v8204_v56  ;;  %v9529_v24 = vld [vmem:[#allocation8 + $0x40c] sm:$0xf] }
 0x2e4   :  { %5252 = vmatpush.bf16.msrb.mxu3 %v7775_v15  ;;  %v9437_v15 = vld [vmem:[#allocation8 + $0x12c] sm:$0xf] }
 0x2e5   :  { %5267 = vmatpush.bf16.msrb.mxu1 %v7887_v31  ;;  %5226 = vmatpush.bf16.msra.mxu2 %v8507_v29  ;;  %v7823_v46 = vor.u32 %v9437_v15, %v7820_v25  ;;  %v8106_v31 = vld [vmem:[#allocation8 + $0x368] sm:$0xf]  ;;  %v9503_v29 = vld [vmem:[#allocation8 + $0x334] sm:$0xf0]  ;;  %v9545_v15 = vld [vmem:[#allocation8 + $0x48c] sm:$0xf] }
 0x2e6   :  { %5182 = vmatpush.bf16.msrb.mxu0 %v8155_v23  ;;  %v8107_v14 = vor.u32 %v9511_v58, %v8106_v31  ;;  %v8074_v23 = vld [vmem:[#allocation8 + $0x328] sm:$0xf]  ;;  %v8252_v25 = vld [vmem:[#allocation8 + $0x498] sm:$0xf0]  ;;  %v9573_v31 = vld [vmem:[#allocation8 + $0x56c] sm:$0xf] }
 0x2e7   :  { %v8255_v22 = vor.u32 %v9545_v15, %v8252_v25  ;;  %v8364_v58 = vld [vmem:[#allocation8 + $0x578] sm:$0xf0]  ;;  %v8746_v15 = vld [vmem:[#allocation11 + $0x70] sm:$0xf]  ;;  %v9521_v56 = vld [vmem:[#allocation8 + $0x3cc] sm:$0xf] }
 0x2e8   :  { %5253 = vmatpush.bf16.msrb.mxu3 %v7759_v26  ;;  %v7804_v26 = vld [vmem:[#allocation8 + $0x118] sm:$0xf0]  ;;  %v8367_v19 = vor.u32 %v9573_v31, %v8364_v58 }
 0x2e9   :  { %5268 = vmatpush.bf16.msrb.mxu1 %v7871_v36  ;;  %5227 = vmatpush.bf16.msra.mxu2 %v8491_v44  ;;  %v7807_v53 = vor.u32 %v9433_v0, %v7804_v26  ;;  %v9507_v36 = vld [vmem:[#allocation8 + $0x354] sm:$0xf0]  ;;  %v9541_v0 = vld [vmem:[#allocation8 + $0x46c] sm:$0xf]  ;;  %v9671_v25 = vld [vmem:[#allocation11 + $0x74] sm:$0xf0] }
 0x2ea   :  { %5183 = vmatpush.bf16.msrb.mxu0 %v8139_v8  ;;  %v8399_v8 = vor.u32 %v9581_v50, %v8396_v5  ;;  %v9499_v44 = vld [vmem:[#allocation8 + $0x314] sm:$0xf0]  ;;  %v8188_v50 = vld [vmem:[#allocation8 + $0x418] sm:$0xf0] }
 0x2ec   :  { %5254 = vmatpush.bf16.msrb.mxu3 %v7743_v20  ;;  %v8090_v20 = vld [vmem:[#allocation8 + $0x348] sm:$0xf] }
 0x2ed   :  { %5269 = vmatpush.bf16.msrb.mxu1 %v7855_v62  ;;  %5228 = vmatpush.bf16.msra.mxu2 %v8475_v1  ;;  %v8443_v62 = vor.u32 %v9595_v30, %v8442_v16  ;;  %v8683_v1 = vor.u32 %v9655_v43, %v8682_v12  ;;  %v9477_v16 = vld [vmem:[#allocation8 + $0x26c] sm:$0xf]  ;;  %v7980_v30 = vld [vmem:[#allocation8 + $0x278] sm:$0xf0]  ;;  %v8602_v43 = vld [vmem:[#allocation8 + $0x748] sm:$0xf] }
 0x2ee   :  { %5184 = vmatpush.bf16.msrb.mxu0 %v8123_v49  ;;  %v8236_v49 = vld [vmem:[#allocation8 + $0x478] sm:$0xf0]  ;;  %v7983_v18 = vor.u32 %v9477_v16, %v7980_v30  ;;  %v9613_v16 = vld [vmem:[#allocation8 + $0x6ac] sm:$0xf] }
 0x2ef   :  { %v8239_v54 = vor.u32 %v9541_v0, %v8236_v49  ;;  %v8556_v0 = vld [vmem:[#allocation8 + $0x6f8] sm:$0xf0]  ;;  %v8738_v49 = vld [vmem:[#allocation11 + $0x60] sm:$0xf] }
 0x2f0   :  { %5255 = vmatpush.bf16.msrb.mxu3 %v7727_v4  ;;  %v8091_v4 = vor.u32 %v9507_v36, %v8090_v20  ;;  %v9569_v20 = vld [vmem:[#allocation8 + $0x54c] sm:$0xf]  ;;  %v8348_v36 = vld [vmem:[#allocation8 + $0x558] sm:$0xf0] }
 0x2f1   :  { %5270 = vmatpush.bf16.msrb.mxu1 %v7839_v45  ;;  %5229 = vmatpush.bf16.msra.mxu2 %v8459_v13  ;;  %v8075_v45 = vor.u32 %v9503_v29, %v8074_v23  ;;  %v7999_v13 = vor.u32 %v9481_v21, %v7996_v17  ;;  %v8351_v57 = vor.u32 %v9569_v20, %v8348_v36  ;;  %v9473_v23 = vld [vmem:[#allocation8 + $0x24c] sm:$0xf]  ;;  %v7964_v29 = vld [vmem:[#allocation8 + $0x258] sm:$0xf0]  ;;  %v9627_v20 = vld [vmem:[#allocation8 + $0x714] sm:$0xf0] }
 0x2f2   :  { %5185 = vmatpush.bf16.msrb.mxu0 %v8107_v14  ;;  %v8667_v14 = vor.u32 %v9651_v61, %v8666_v28  ;;  %v8586_v28 = vld [vmem:[#allocation8 + $0x728] sm:$0xf]  ;;  %v9631_v61 = vld [vmem:[#allocation8 + $0x734] sm:$0xf0]  ;;  %v9617_v21 = vld [vmem:[#allocation8 + $0x6cc] sm:$0xf] }
 0x2f3   :  { %v9525_v36 = vld [vmem:[#allocation8 + $0x3ec] sm:$0xf]  ;;  %v8524_v30 = vld [vmem:[#allocation8 + $0x6b8] sm:$0xf0] }
 0x2f4   :  { %5256 = vmatpush.bf16.msrb.mxu3 %v7711_v40  ;;  %v8028_v40 = vld [vmem:[#allocation8 + $0x2d8] sm:$0xf0]  ;;  %v8527_v42 = vor.u32 %v9613_v16, %v8524_v30  ;;  %v8794_v30 = vld [vmem:[#allocation11 + $0xd0] sm:$0xf] }
 0x2f5   :  { %5271 = vmatpush.bf16.msrb.mxu1 %v7823_v46  ;;  %5230 = vmatpush.bf16.msra.mxu2 %v8443_v62  ;;  %v8059_v46 = vor.u32 %v9499_v44, %v8058_v60  ;;  %v8332_v62 = vld [vmem:[#allocation8 + $0x538] sm:$0xf0]  ;;  %v8618_v60 = vld [vmem:[#allocation8 + $0x768] sm:$0xf] }
 0x2f6   :  { %5186 = vmatpush.bf16.msrb.mxu0 %v8091_v4  ;;  %v9565_v4 = vld [vmem:[#allocation8 + $0x52c] sm:$0xf]  ;;  %v7948_v44 = vld [vmem:[#allocation8 + $0x238] sm:$0xf0] }
 0x2f8   :  { %5257 = vmatpush.bf16.msrb.mxu3 %v7695_v33  ;;  %5231 = vmatmul.bf16.vlgmr.msra.gmra.mxu2 %v10430_v38  ;;  %v8012_v33 = vld [vmem:[#allocation8 + $0x2b8] sm:$0xf0] }
 0x2f9   :  { %5272 = vmatpush.bf16.msrb.mxu1 %v7807_v53  ;;  %5279 = vmatpush.bf16.msrb.mxu2 %v8047_v11  ;;  %v8015_v26 = vor.u32 %v9485_v6, %v8012_v33  ;;  %v8220_v53 = vld [vmem:[#allocation8 + $0x458] sm:$0xf0]  ;;  %v8335_v11 = vor.u32 %v9565_v4, %v8332_v62  ;;  %v9635_v6 = vld [vmem:[#allocation8 + $0x754] sm:$0xf0]  ;;  %v9465_v33 = vld [vmem:[#allocation8 + $0x20c] sm:$0xf] }
 0x2fa   :  { %5187 = vmatpush.bf16.msrb.mxu0 %v8075_v45  ;;  %v8316_v45 = vld [vmem:[#allocation8 + $0x518] sm:$0xf0] }
 0x2fb   :  { %v8508_v4 = vld [vmem:[#allocation8 + $0x698] sm:$0xf0] }
 0x2fc   :  { %5258 = vmatpush.bf16.msrb.mxu3 %v7679_v35  ;;  %5273 = vmatmul.bf16.vlgmr.msrb.gmra.mxu1 %v10380_v52  ;;  %v9577_v52 = vld [vmem:[#allocation8 + $0x58c] sm:$0xf] }
 0x2fd   :  { %5321 = vmatpush.bf16.msra.mxu1 %v8431_v63  ;;  %v8383_v59 = vor.u32 %v9577_v52, %v8380_v39  ;;  %v9537_v35 = vld [vmem:[#allocation8 + $0x44c] sm:$0xf]  ;;  %v9647_v63 = vld [vmem:[#allocation8 + $0x7b4] sm:$0xf0] }
 0x2fe   :  { %5188 = vmatpush.bf16.msrb.mxu0 %v8059_v46  ;;  %v8223_v7 = vor.u32 %v9537_v35, %v8220_v53  ;;  %v7932_v46 = vld [vmem:[#allocation8 + $0x218] sm:$0xf0]  ;;  %v8587_v53 = vor.u32 %v9631_v61, %v8586_v28  ;;  %v8802_v28 = vld [vmem:[#allocation11 + $0xe0] sm:$0xf]  ;;  %v9685_v61 = vld [vmem:[#allocation11 + $0xe4] sm:$0xf0] }
 0x2ff   :  { %5259 = vmatmul.bf16.vlgmr.msrb.gmra.mxu3 %v10378_v32  ;;  %v8031_v32 = vor.u32 %v9489_v55, %v8028_v40  ;;  %v7967_v55 = vor.u32 %v9473_v23, %v7964_v29  ;;  %v9561_v40 = vld [vmem:[#allocation8 + $0x50c] sm:$0xf]  ;;  %v7935_v31 = vor.u32 %v9465_v33, %v7932_v46  ;;  %v9667_v35 = vld [vmem:[#allocation11 + $0x54] sm:$0xf0] }
 0x300   :  { %5307 = vmatpush.bf16.msra.mxu3 %v8303_v37  ;;  %v8650_v37 = vld [vmem:[#allocation8 + $0x7a8] sm:$0xf]  ;;  %v8319_v52 = vor.u32 %v9561_v40, %v8316_v45  ;;  %v9517_v29 = vld [vmem:[#allocation8 + $0x3ac] sm:$0xf]  ;;  %v10459_v45 = vpop.f32.mrf.mxu1 }
 0x301   :  { %5322 = vmatpush.bf16.msra.mxu1 %v8415_v27  ;;  %5280 = vmatpush.bf16.msrb.mxu2 %v8031_v32  ;;  %v8651_v34 = vor.u32 %v9647_v63, %v8650_v37  ;;  %v9643_v27 = vld [vmem:[#allocation8 + $0x794] sm:$0xf0]  ;;  %v8191_v32 = vor.u32 %v9529_v24, %v8188_v50  ;;  %v8172_v63 = vld [vmem:[#allocation8 + $0x3f8] sm:$0xf0]  ;;  %v9605_v24 = vld [vmem:[#allocation8 + $0x66c] sm:$0xf] }
 0x302   :  { %5237 = vmatpush.bf16.msra.mxu0 %v8683_v1  ;;  %v9669_v1 = vld [vmem:[#allocation11 + $0x64] sm:$0xf0]  ;;  %v8492_v50 = vld [vmem:[#allocation8 + $0x678] sm:$0xf0] }
 0x303   :  { %5189 = vmatmul.bf16.vlgmr.msrb.gmra.mxu0 %v10399_v3  ;;  %v8739_v17 = vor.u32 %v9669_v1, %v8738_v49  ;;  %v9661_v40 = vld [vmem:[#allocation11 + $0x24] sm:$0xf0]  ;;  %v8460_v1 = vld [vmem:[#allocation8 + $0x638] sm:$0xf0] }
 0x304   :  { %5308 = vmatpush.bf16.msra.mxu3 %v8287_v9  ;;  %v8634_v9 = vld [vmem:[#allocation8 + $0x788] sm:$0xf]  ;;  %v9597_v49 = vld [vmem:[#allocation8 + $0x62c] sm:$0xf] }
 0x305   :  { %5323 = vmatpush.bf16.msra.mxu1 %v8399_v8  ;;  %5281 = vmatpush.bf16.msrb.mxu2 %v8015_v26  ;;  %v8635_v5 = vor.u32 %v9643_v27, %v8634_v9  ;;  %v9469_v8 = vld [vmem:[#allocation8 + $0x22c] sm:$0xf]  ;;  %v8603_v26 = vor.u32 %v9635_v6, %v8602_v43  ;;  %v8714_v9 = vld [vmem:[#allocation11 + $0x30] sm:$0xf]  ;;  %v9663_v27 = vld [vmem:[#allocation11 + $0x34] sm:$0xf0] }
 0x306   :  { %5238 = vmatpush.bf16.msra.mxu0 %v8667_v14  ;;  %v7951_v12 = vor.u32 %v9469_v8, %v7948_v44  ;;  %v9513_v8 = vld [vmem:[#allocation8 + $0x38c] sm:$0xf]  ;;  %v10461_v44 = vpop.f32.mrf.mxu2  ;;  %v8810_v43 = vld [vmem:[#allocation11 + $0xf0] sm:$0xf]  ;;  %v9687_v6 = vld [vmem:[#allocation11 + $0xf4] sm:$0xf0] }
 0x308   :  { %5309 = vmatpush.bf16.msra.mxu3 %v8271_v48  ;;  %v9639_v48 = vld [vmem:[#allocation8 + $0x774] sm:$0xf0] }
 0x309   :  { %5324 = vmatpush.bf16.msra.mxu1 %v8383_v59  ;;  %5282 = vmatpush.bf16.msrb.mxu2 %v7999_v13  ;;  %v8619_v39 = vor.u32 %v9639_v48, %v8618_v60  ;;  %v8747_v59 = vor.u32 %v9671_v25, %v8746_v15  ;;  %v8570_v13 = vld [vmem:[#allocation8 + $0x708] sm:$0xf]  ;;  %v8495_v48 = vor.u32 %v9605_v24, %v8492_v50  ;;  %v8124_v15 = vld [vmem:[#allocation8 + $0x398] sm:$0xf0]  ;;  %v9601_v25 = vld [vmem:[#allocation8 + $0x64c] sm:$0xf] }
 0x30a   :  { %5239 = vmatpush.bf16.msra.mxu0 %v8651_v34  ;;  %v8156_v34 = vld [vmem:[#allocation8 + $0x3d8] sm:$0xf0]  ;;  %v8127_v33 = vor.u32 %v9513_v8, %v8124_v15  ;;  %v8732_v24 = vld [vmem:[#allocation11 + $0x58] sm:$0xf0]  ;;  %v9653_v8 = vld [vmem:[#allocation8 + $0x7ec] sm:$0xf] }
 0x30b   :  { %v8159_v23 = vor.u32 %v9521_v56, %v8156_v34  ;;  %v8684_v15 = vld [vmem:[#allocation8 + $0x7f8] sm:$0xf0] }
 0x30c   :  { %5310 = vmatpush.bf16.msra.mxu3 %v8255_v22  ;;  %v9621_v22 = vld [vmem:[#allocation8 + $0x6ec] sm:$0xf] }
 0x30d   :  { %5325 = vmatpush.bf16.msra.mxu1 %v8367_v19  ;;  %5283 = vmatpush.bf16.msrb.mxu2 %v7983_v18  ;;  %v8559_v58 = vor.u32 %v9621_v22, %v8556_v0  ;;  %v8730_v19 = vld [vmem:[#allocation11 + $0x50] sm:$0xf]  ;;  %v9609_v18 = vld [vmem:[#allocation8 + $0x68c] sm:$0xf]  ;;  %v8811_v0 = vor.u32 %v9687_v6, %v8810_v43  ;;  %v9679_v43 = vld [vmem:[#allocation11 + $0xb4] sm:$0xf0] }
 0x30e   :  { %5240 = vmatpush.bf16.msra.mxu0 %v8635_v5  ;;  %v8731_v37 = vor.u32 %v9667_v35, %v8730_v19  ;;  %v8715_v5 = vor.u32 %v9663_v27, %v8714_v9  ;;  %v9509_v22 = vld [vmem:[#allocation8 + $0x36c] sm:$0xf]  ;;  %v8803_v19 = vor.u32 %v9685_v61, %v8802_v28  ;;  %v8076_v9 = vld [vmem:[#allocation8 + $0x338] sm:$0xf0]  ;;  %v8716_v28 = vld [vmem:[#allocation11 + $0x38] sm:$0xf0] }
 0x310   :  { %5311 = vmatpush.bf16.msra.mxu3 %v8239_v54  ;;  %v8540_v54 = vld [vmem:[#allocation8 + $0x6d8] sm:$0xf0] }
 0x311   :  { %5326 = vmatpush.bf16.msra.mxu1 %v8351_v57  ;;  %5284 = vmatpush.bf16.msrb.mxu2 %v7967_v55  ;;  %v8543_v14 = vor.u32 %v9617_v21, %v8540_v54  ;;  %v8175_v57 = vor.u32 %v9525_v36, %v8172_v63  ;;  %v8706_v55 = vld [vmem:[#allocation11 + $0x20] sm:$0xf]  ;;  %v8748_v54 = vld [vmem:[#allocation11 + $0x78] sm:$0xf0]  ;;  %v9593_v36 = vld [vmem:[#allocation8 + $0x60c] sm:$0xf] }
 0x312   :  { %5241 = vmatpush.bf16.msra.mxu0 %v8619_v39  ;;  %v8698_v39 = vld [vmem:[#allocation11 + $0x10] sm:$0xf] }
 0x314   :  { %5312 = vmatpush.bf16.msra.mxu3 %v8223_v7  ;;  %v8571_v7 = vor.u32 %v9627_v20, %v8570_v13  ;;  %v10465_v13 = vpop.f32.mrf.mxu1  ;;  %v8092_v20 = vld [vmem:[#allocation8 + $0x358] sm:$0xf0] }
 0x315   :  { %5327 = vmatpush.bf16.msra.mxu1 %v8335_v11  ;;  %5285 = vmatpush.bf16.msrb.mxu2 %v7951_v12  ;;  %v8140_v11 = vld [vmem:[#allocation8 + $0x3b8] sm:$0xf0] }
 0x316   :  { %5242 = vmatpush.bf16.msra.mxu0 %v8603_v26  ;;  %v8143_v60 = vor.u32 %v9517_v29, %v8140_v11  ;;  %v9659_v12 = vld [vmem:[#allocation11 + $0x14] sm:$0xf0]  ;;  %v9666_v11 = vld [vmem:[#allocation11 + $0x54] sm:$0xf] }
 0x317   :  { %v8699_v26 = vor.u32 %v9659_v12, %v8698_v39  ;;  %v9664_v39 = vld [vmem:[#allocation11 + $0x44] sm:$0xf]  ;;  %v8724_v12 = vld [vmem:[#allocation11 + $0x48] sm:$0xf0] }
 0x318   :  { %5313 = vmatpush.bf16.msra.mxu3 %v8207_v2  ;;  %v10456_v2 = vpop.f32.mrf.mxu3 }
 0x319   :  { %5328 = vmatpush.bf16.msra.mxu1 %v8319_v52  ;;  %5286 = vmatpush.bf16.msrb.mxu2 %v7935_v31  ;;  %v8707_v52 = vor.u32 %v9661_v40, %v8706_v55  ;;  %v8690_v31 = vld [vmem:[#allocation11] sm:$0xf] }
 0x31a   :  { %5243 = vmatpush.bf16.msra.mxu0 %v8587_v53  ;;  %v8463_v53 = vor.u32 %v9597_v49, %v8460_v1  ;;  %v8668_v49 = vld [vmem:[#allocation8 + $0x7d8] sm:$0xf0]  ;;  %v8727_v1 = vor.u32 %v9664_v39, %v8724_v12  ;;  %v8692_v39 = vld [vmem:[#allocation11 + $0x8] sm:$0xf0] }
 0x31c   :  { %5314 = vmatpush.bf16.msra.mxu3 %v8191_v32  ;;  %5329 = vmatmul.bf16.vlgmr.msra.gmra.mxu1 %v10417_v51  ;;  %v9665_v51 = vld [vmem:[#allocation11 + $0x44] sm:$0xf0]  ;;  %v8476_v32 = vld [vmem:[#allocation8 + $0x658] sm:$0xf0]  ;;  %v10476_v40 = vpop.f32.mrf.mxu1 }
 0x31d   :  { %5335 = vmatpush.bf16.msra.mxu2 %v8559_v58  ;;  %v8479_v46 = vor.u32 %v9601_v25, %v8476_v32  ;;  %v9657_v58 = vld [vmem:[#allocation11 + $0x4] sm:$0xf0]  ;;  %5779 = vmatpush.bf16.msrb.mxu1 %v8811_v0  ;;  %v8735_v25 = vor.u32 %v9666_v11, %v8732_v24  ;;  %v8778_v32 = vld [vmem:[#allocation11 + $0xb0] sm:$0xf] }
 0x31e   :  { %5287 = vmatmul.bf16.vlgmr.msrb.gmra.mxu2 %v10397_v10  ;;  %5244 = vmatpush.bf16.msra.mxu0 %v8571_v7  ;;  %v8511_v10 = vor.u32 %v9609_v18, %v8508_v4  ;;  %v8691_v63 = vor.u32 %v9657_v58, %v8690_v31  ;;  %v8740_v7 = vld [vmem:[#allocation11 + $0x68] sm:$0xf0]  ;;  %v10469_v18 = vld [vmem:[#allocation10] sm:$0xf]  ;;  %v10471_v4 = vpop.f32.mrf.mxu0  ;;  %v9677_v31 = vld [vmem:[#allocation11 + $0xa4] sm:$0xf0] }
 0x31f   :  { %5315 = vmatmul.bf16.vlgmr.msra.gmra.mxu3 %v10414_v47  ;;  %v8722_v47 = vld [vmem:[#allocation11 + $0x40] sm:$0xf] }
 0x320   :  { %5765 = vmatpush.bf16.msrb.mxu3 %v8747_v59  ;;  %v8723_v62 = vor.u32 %v9665_v51, %v8722_v47  ;;  %v8108_v59 = vld [vmem:[#allocation8 + $0x378] sm:$0xf0]  ;;  %v10463_v21 = vpop.f32.mrf.mxu3  ;;  %v10467_v47 = vpop.f32.mrf.mxu2  ;;  %v9668_v51 = vld [vmem:[#allocation11 + $0x64] sm:$0xf] }
 0x321   :  { %5336 = vmatpush.bf16.msra.mxu2 %v8543_v14  ;;  %5245 = vmatmul.bf16.vlgmr.msra.gmra.mxu0 %v10441_v41  ;;  %v8111_v35 = vor.u32 %v9509_v22, %v8108_v59  ;;  %v9505_v14 = vld [vmem:[#allocation8 + $0x34c] sm:$0xf]  ;;  %v8743_v27 = vor.u32 %v9668_v51, %v8740_v7  ;;  %v8687_v22 = vor.u32 %v9653_v8, %v8684_v15  ;;  %v9684_v15 = vld [vmem:[#allocation11 + $0xe4] sm:$0xf] }
 0x322   :  { %5293 = vmatpush.bf16.msrb.mxu0 %v8175_v57  ;;  %5780 = vmatpush.bf16.msrb.mxu1 %v8803_v19  ;;  %v9683_v57 = vld [vmem:[#allocation11 + $0xd4] sm:$0xf0]  ;;  %v9649_v59 = vld [vmem:[#allocation8 + $0x7cc] sm:$0xf] }
 0x323   :  { %v8795_v34 = vor.u32 %v9683_v57, %v8794_v30  ;;  %v9645_v19 = vld [vmem:[#allocation8 + $0x7ac] sm:$0xf]  ;;  %v8636_v57 = vld [vmem:[#allocation8 + $0x798] sm:$0xf0] }
 0x324   :  { %5766 = vmatpush.bf16.msrb.mxu3 %v8739_v17  ;;  %v9670_v17 = vld [vmem:[#allocation11 + $0x74] sm:$0xf] }
 0x325   :  { %5337 = vmatpush.bf16.msra.mxu2 %v8527_v42  ;;  %v8751_v16 = vor.u32 %v9670_v17, %v8748_v54  ;;  %v8095_v42 = vor.u32 %v9505_v14, %v8092_v20  ;;  %v8671_v54 = vor.u32 %v9649_v59, %v8668_v49  ;;  %v8762_v20 = vld [vmem:[#allocation11 + $0x90] sm:$0xf]  ;;  %v9633_v59 = vld [vmem:[#allocation8 + $0x74c] sm:$0xf] }
 0x326   :  { %5294 = vmatpush.bf16.msrb.mxu0 %v8159_v23  ;;  %5781 = vmatpush.bf16.msrb.mxu1 %v8795_v34  ;;  %v8786_v23 = vld [vmem:[#allocation11 + $0xc0] sm:$0xf]  ;;  %v4968_v58 = vpop.f32.mrf.mxu0 }
 0x327   :  { %v8754_v34 = vld [vmem:[#allocation11 + $0x80] sm:$0xf] }
 0x328   :  { %5767 = vmatpush.bf16.msrb.mxu3 %v8731_v37  ;;  %v8444_v37 = vld [vmem:[#allocation8 + $0x618] sm:$0xf0]  ;;  %v10473_v29 = vpop.f32.mrf.mxu3 }
 0x329   :  { %5338 = vmatpush.bf16.msra.mxu2 %v8511_v10  ;;  %v8447_v56 = vor.u32 %v9593_v36, %v8444_v37  ;;  %v9681_v10 = vld [vmem:[#allocation11 + $0xc4] sm:$0xf0]  ;;  %v9675_v36 = vld [vmem:[#allocation11 + $0x94] sm:$0xf0]  ;;  %v4996_v37 = vpop.f32.mrf.mxu1 }
 0x32a   :  { %5295 = vmatpush.bf16.msrb.mxu0 %v8143_v60  ;;  %v8787_v50 = vor.u32 %v9681_v10, %v8786_v23  ;;  %v9497_v60 = vld [vmem:[#allocation8 + $0x30c] sm:$0xf]  ;;  %v9686_v23 = vld [vmem:[#allocation11 + $0xf4] sm:$0xf]  ;;  %v8812_v10 = vld [vmem:[#allocation11 + $0xf8] sm:$0xf0] }
 0x32b   :  { %v8815_v24 = vor.u32 %v9686_v23, %v8812_v10 }
 0x32c   :  { %5768 = vmatpush.bf16.msrb.mxu3 %v8723_v62  ;;  %v9501_v62 = vld [vmem:[#allocation8 + $0x32c] sm:$0xf]  ;;  %5782 = vmatpush.bf16.msrb.mxu1 %v8787_v50 }
 0x32d   :  { %5339 = vmatpush.bf16.msra.mxu2 %v8495_v48  ;;  %v8079_v55 = vor.u32 %v9501_v62, %v8076_v9  ;;  %v8060_v48 = vld [vmem:[#allocation8 + $0x318] sm:$0xf0]  ;;  %v9673_v62 = vld [vmem:[#allocation11 + $0x84] sm:$0xf0] }
 0x32e   :  { %5296 = vmatpush.bf16.msrb.mxu0 %v8127_v33  ;;  %v8063_v33 = vor.u32 %v9497_v60, %v8060_v48  ;;  %v8620_v48 = vld [vmem:[#allocation8 + $0x778] sm:$0xf0] }
 0x330   :  { %5769 = vmatpush.bf16.msrb.mxu3 %v8715_v5  ;;  %v3627_v5 = vperm.slane %v10469_v18, 0 }
 0x331   :  { %5340 = vmatpush.bf16.msra.mxu2 %v8479_v46  ;;  %v8779_v46 = vor.u32 %v9679_v43, %v8778_v32  ;;  %v9656_v32 = vld [vmem:[#allocation11 + $0x4] sm:$0xf] }
 0x332   :  { %5297 = vmatpush.bf16.msrb.mxu0 %v8111_v35  ;;  %v4925_v6 = vadd.f32 %v10456_v2, %v3627_v5  ;;  %v4927_v0 = vadd.f32 %v10463_v21, %v3627_v5  ;;  %v4982_v2 = vpop.f32.mrf.mxu3 }
 0x333   :  { %5783 = vmatpush.bf16.msrb.mxu1 %v8779_v46 }
 0x334   :  { %5770 = vmatpush.bf16.msrb.mxu3 %v8707_v52  ;;  %v10478_v52 = vpop.f32.mrf.mxu2  ;;  %v4939_v17 = vadd.f32 %v10459_v45, %v4925_v6  ;;  %v4941_v21 = vadd.f32 %v10465_v13, %v4927_v0  ;;  %v8708_v45 = vld [vmem:[#allocation11 + $0x28] sm:$0xf0]  ;;  %v5050_v6 = vpop.f32.mrf.mxu1  ;;  %v8695_v0 = vor.u32 %v9656_v32, %v8692_v39 }
 0x335   :  { %5341 = vmatpush.bf16.msra.mxu2 %v8463_v53  ;;  %v8652_v53 = vld [vmem:[#allocation8 + $0x7b8] sm:$0xf0]  ;;  %v8756_v32 = vld [vmem:[#allocation11 + $0x88] sm:$0xf0] }
 0x336   :  { %5298 = vmatpush.bf16.msrb.mxu0 %v8095_v42  ;;  %v4953_v35 = vadd.f32 %v10461_v44, %v4939_v17  ;;  %v4955_v30 = vadd.f32 %v10467_v47, %v4941_v21  ;;  %v8655_v7 = vor.u32 %v9645_v19, %v8652_v53  ;;  %v9641_v44 = vld [vmem:[#allocation8 + $0x78c] sm:$0xf]  ;;  %v9680_v19 = vld [vmem:[#allocation11 + $0xc4] sm:$0xf]  ;;  %v3628_v21 = vperm.slane %v10469_v18, 1 }
 0x337   :  { %v8639_v5 = vor.u32 %v9641_v44, %v8636_v57  ;;  %v9629_v17 = vld [vmem:[#allocation8 + $0x72c] sm:$0xf]  ;;  %v9676_v44 = vld [vmem:[#allocation11 + $0xa4] sm:$0xf]  ;;  %v8772_v57 = vld [vmem:[#allocation11 + $0xa8] sm:$0xf0] }
 0x338   :  { %5771 = vmatpush.bf16.msrb.mxu3 %v8699_v26  ;;  %v8770_v26 = vld [vmem:[#allocation11 + $0xa0] sm:$0xf]  ;;  %v4967_v13 = vadd.f32 %v10471_v4, %v4953_v35  ;;  %v4969_v11 = vadd.f32 %v4968_v58, %v4955_v30  ;;  %v8788_v35 = vld [vmem:[#allocation11 + $0xc8] sm:$0xf0]  ;;  %v8780_v30 = vld [vmem:[#allocation11 + $0xb8] sm:$0xf0] }
 0x339   :  { %5342 = vmatpush.bf16.msra.mxu2 %v8447_v56  ;;  %v8771_v61 = vor.u32 %v9677_v31, %v8770_v26  ;;  %v9658_v56 = vld [vmem:[#allocation11 + $0x14] sm:$0xf]  ;;  %v8796_v31 = vld [vmem:[#allocation11 + $0xd8] sm:$0xf0] }
 0x33a   :  { %5299 = vmatpush.bf16.msrb.mxu0 %v8079_v55  ;;  %v4981_v47 = vadd.f32 %v10473_v29, %v4967_v13  ;;  %v5036_v50 = vpop.f32.mrf.mxu3  ;;  %v9637_v55 = vld [vmem:[#allocation8 + $0x76c] sm:$0xf]  ;;  %v4983_v4 = vadd.f32 %v4982_v2, %v4969_v11  ;;  %v9682_v26 = vld [vmem:[#allocation11 + $0xd4] sm:$0xf]  ;;  %v8588_v2 = vld [vmem:[#allocation8 + $0x738] sm:$0xf0] }
 0x33b   :  { %5784 = vmatpush.bf16.msrb.mxu1 %v8771_v61  ;;  %v8764_v11 = vld [vmem:[#allocation11 + $0x98] sm:$0xf0] }
 0x33c   :  { %5772 = vmatpush.bf16.msrb.mxu3 %v8691_v63  ;;  %5343 = vmatmul.bf16.vlgmr.msra.gmra.mxu2 %v10430_v38  ;;  %v9662_v38 = vld [vmem:[#allocation11 + $0x34] sm:$0xf]  ;;  %v9660_v63 = vld [vmem:[#allocation11 + $0x24] sm:$0xf]  ;;  %v5010_v51 = vpop.f32.mrf.mxu2  ;;  %v5022_v9 = vpop.f32.mrf.mxu0  ;;  %v4995_v60 = vadd.f32 %v10476_v40, %v4981_v47  ;;  %v4997_v29 = vadd.f32 %v4996_v37, %v4983_v4  ;;  %v8604_v40 = vld [vmem:[#allocation8 + $0x758] sm:$0xf0] }
 0x33d   :  { %v8719_v14 = vor.u32 %v9662_v38, %v8716_v28  ;;  %v8711_v42 = vor.u32 %v9660_v63, %v8708_v45  ;;  %v8799_v38 = vor.u32 %v9682_v26, %v8796_v31  ;;  %v8607_v28 = vor.u32 %v9633_v59, %v8604_v40  ;;  %v8572_v37 = vld [vmem:[#allocation8 + $0x718] sm:$0xf0]  ;;  %v5052_v63 = vpop.f32.mrf.mxu1  ;;  %v9674_v47 = vld [vmem:[#allocation11 + $0x94] sm:$0xf]  ;;  %v8858_v40 = vld [vmem:[#allocation11 + $0x150] sm:$0xf] }
 0x33e   :  { %5300 = vmatpush.bf16.msrb.mxu0 %v8063_v33  ;;  %v5009_v43 = vadd.f32 %v10478_v52, %v4995_v60  ;;  %v8623_v33 = vor.u32 %v9637_v55, %v8620_v48  ;;  %v5011_v46 = vadd.f32 %v5010_v51, %v4997_v29  ;;  %v5037_v51 = vadd.f32 %v5036_v50, %v3628_v21  ;;  %v8874_v60 = vld [vmem:[#allocation11 + $0x170] sm:$0xf]  ;;  %v9703_v48 = vld [vmem:[#allocation11 + $0x174] sm:$0xf0] }
 0x340   :  { %5821 = vmatpush.bf16.msra.mxu3 %v8751_v16  ;;  %v8763_v16 = vor.u32 %v9675_v36, %v8762_v20  ;;  %v8591_v20 = vor.u32 %v9629_v17, %v8588_v2  ;;  %v9625_v36 = vld [vmem:[#allocation8 + $0x70c] sm:$0xf] }
 0x341   :  { %5301 = vmatmul.bf16.vlgmr.msrb.gmra.mxu0 %v10399_v3  ;;  %v8700_v3 = vld [vmem:[#allocation11 + $0x18] sm:$0xf0] }
 0x342   :  { %5349 = vmatpush.bf16.msra.mxu0 %v8687_v22  ;;  %5785 = vmatpush.bf16.msrb.mxu1 %v8763_v16  ;;  %v8703_v8 = vor.u32 %v9658_v56, %v8700_v3  ;;  %v5023_v22 = vadd.f32 %v5022_v9, %v5009_v43  ;;  %v9678_v16 = vld [vmem:[#allocation11 + $0xb4] sm:$0xf]  ;;  %v5051_v9 = vadd.f32 %v5050_v6, %v5037_v51  ;;  %v8866_v6 = vld [vmem:[#allocation11 + $0x160] sm:$0xf] }
 0x344   :  { %5822 = vmatpush.bf16.msra.mxu3 %v8743_v27  ;;  %v8755_v27 = vor.u32 %v9673_v62, %v8754_v34  ;;  %v5064_v49 = vpop.f32.mrf.mxu2  ;;  %v5363_v61 = vmax.f32 %v5023_v22, 0.0  ;;  %v8775_v62 = vor.u32 %v9676_v44, %v8772_v57  ;;  %v8876_v44 = vld [vmem:[#allocation11 + $0x178] sm:$0xf0] }
 0x345   :  { %v5065_v3 = vadd.f32 %v5064_v49, %v5051_v9  ;;  %v5106_v23 = vpop.f32.mrf.mxu1  ;;  %v8860_v9 = vld [vmem:[#allocation11 + $0x158] sm:$0xf0] }
 0x346   :  { %5350 = vmatpush.bf16.msra.mxu0 %v8671_v54  ;;  %5786 = vmatpush.bf16.msrb.mxu1 %v8755_v27  ;;  %v5038_v54 = vpop.f32.mrf.mxu3 }
 0x347   :  { %v5039_v56 = vadd.f32 %v5038_v54, %v3628_v21 }
 0x348   :  { %5823 = vmatpush.bf16.msra.mxu3 %v8735_v25  ;;  %v8804_v25 = vld [vmem:[#allocation11 + $0xe8] sm:$0xf0] }
 0x349   :  { %v8807_v12 = vor.u32 %v9684_v15, %v8804_v25  ;;  %v5053_v27 = vadd.f32 %v5052_v63, %v5039_v56  ;;  %v8875_v25 = vor.u32 %v9703_v48, %v8874_v60  ;;  %v9691_v63 = vld [vmem:[#allocation11 + $0x114] sm:$0xf0]  ;;  %v9692_v48 = vld [vmem:[#allocation11 + $0x124] sm:$0xf] }
 0x34a   :  { %5351 = vmatpush.bf16.msra.mxu0 %v8655_v7  ;;  %5835 = vmatpush.bf16.msra.mxu1 %v8815_v24  ;;  %v8783_v7 = vor.u32 %v9678_v16, %v8780_v30  ;;  %v8818_v16 = vld [vmem:[#allocation11 + $0x100] sm:$0xf]  ;;  %v9689_v30 = vld [vmem:[#allocation11 + $0x104] sm:$0xf0] }
 0x34b   :  { %5793 = vmatpush.bf16.msrb.mxu2 %v8875_v25  ;;  %v8819_v51 = vor.u32 %v9689_v30, %v8818_v16 }
 0x34c   :  { %5824 = vmatpush.bf16.msra.mxu3 %v8727_v1  ;;  %v5024_v1 = vpop.f32.mrf.mxu0  ;;  %v5066_v13 = vpop.f32.mrf.mxu2 }
 0x34d   :  { %v5025_v58 = vadd.f32 %v5024_v1, %v5011_v46  ;;  %v5067_v24 = vadd.f32 %v5066_v13, %v5053_v27  ;;  %v5108_v22 = vpop.f32.mrf.mxu1  ;;  %v9700_v13 = vld [vmem:[#allocation11 + $0x164] sm:$0xf] }
 0x34e   :  { %5352 = vmatpush.bf16.msra.mxu0 %v8639_v5  ;;  %5836 = vmatpush.bf16.msra.mxu1 %v8807_v12  ;;  %v5092_v34 = vpop.f32.mrf.mxu3  ;;  %v8767_v5 = vor.u32 %v9674_v47, %v8764_v11 }
 0x34f   :  { %v5367_v52 = vmax.f32 %v5025_v58, 0.0 }
 0x350   :  { %5825 = vmatpush.bf16.msra.mxu3 %v8719_v14  ;;  %v8791_v14 = vor.u32 %v9680_v19, %v8788_v35  ;;  %v8842_v19 = vld [vmem:[#allocation11 + $0x130] sm:$0xf]  ;;  %v9695_v35 = vld [vmem:[#allocation11 + $0x134] sm:$0xf0] }
 0x351   :  { %v5371_v53 = vpack.c.bf16 %v5367_v52, %v5363_v61  ;;  %v9697_v61 = vld [vmem:[#allocation11 + $0x144] sm:$0xf0] }
 0x352   :  { %5353 = vmatpush.bf16.msra.mxu0 %v8623_v33  ;;  %5837 = vmatpush.bf16.msra.mxu1 %v8799_v38  ;;  %v9701_v33 = vld [vmem:[#allocation11 + $0x164] sm:$0xf0] }
 0x353   :  { %5773 = vmatmul.bf16.vlgmr.msrb.gmra.mxu3 %v5371_v53  ;;  %v8867_v46 = vor.u32 %v9701_v33, %v8866_v6 }
 0x354   :  { %5826 = vmatpush.bf16.msra.mxu3 %v8711_v42  ;;  %v5078_v45 = vpop.f32.mrf.mxu0  ;;  %v8575_v42 = vor.u32 %v9625_v36, %v8572_v37  ;;  %v5120_v4 = vpop.f32.mrf.mxu2  ;;  %v8826_v37 = vld [vmem:[#allocation11 + $0x110] sm:$0xf] }
 0x355   :  { %v5079_v50 = vadd.f32 %v5078_v45, %v5065_v3  ;;  %5794 = vmatpush.bf16.msrb.mxu2 %v8867_v46  ;;  %v8827_v45 = vor.u32 %v9691_v63, %v8826_v37  ;;  %v5162_v3 = vpop.f32.mrf.mxu1  ;;  %v9715_v37 = vld [vmem:[#allocation11 + $0x1d4] sm:$0xf0] }
 0x356   :  { %5354 = vmatpush.bf16.msra.mxu0 %v8607_v28  ;;  %5838 = vmatpush.bf16.msra.mxu1 %v8791_v14  ;;  %v5094_v39 = vpop.f32.mrf.mxu3  ;;  %v8850_v28 = vld [vmem:[#allocation11 + $0x140] sm:$0xf] }
 0x357   :  { %v5093_v15 = vadd.f32 %v5092_v34, %v5079_v50  ;;  %v8851_v17 = vor.u32 %v9697_v61, %v8850_v28  ;;  %v8834_v14 = vld [vmem:[#allocation11 + $0x120] sm:$0xf]  ;;  %v3629_v50 = vperm.slane %v10469_v18, 2 }
 0x358   :  { %5827 = vmatpush.bf16.msra.mxu3 %v8703_v8  ;;  %v9672_v8 = vld [vmem:[#allocation11 + $0x84] sm:$0xf] }
 0x359   :  { %v8759_v12 = vor.u32 %v9672_v8, %v8756_v32  ;;  %v8836_v8 = vld [vmem:[#allocation11 + $0x128] sm:$0xf0] }
 0x35a   :  { %5355 = vmatpush.bf16.msra.mxu0 %v8591_v20  ;;  %5839 = vmatpush.bf16.msra.mxu1 %v8783_v7  ;;  %v9693_v20 = vld [vmem:[#allocation11 + $0x124] sm:$0xf0]  ;;  %v9702_v7 = vld [vmem:[#allocation11 + $0x174] sm:$0xf]  ;;  %v8839_v25 = vor.u32 %v9692_v48, %v8836_v8  ;;  %v8940_v8 = vld [vmem:[#allocation11 + $0x1f8] sm:$0xf0] }
 0x35b   :  { %v8835_v36 = vor.u32 %v9693_v20, %v8834_v14  ;;  %v8879_v57 = vor.u32 %v9702_v7, %v8876_v44  ;;  %v9713_v7 = vld [vmem:[#allocation11 + $0x1c4] sm:$0xf0]  ;;  %v9718_v48 = vld [vmem:[#allocation11 + $0x1f4] sm:$0xf] }
 0x35c   :  { %5828 = vmatpush.bf16.msra.mxu3 %v8695_v0  ;;  %v5080_v10 = vpop.f32.mrf.mxu0  ;;  %v9699_v0 = vld [vmem:[#allocation11 + $0x154] sm:$0xf0]  ;;  %v5122_v26 = vpop.f32.mrf.mxu2 }
 0x35d   :  { %v5081_v55 = vadd.f32 %v5080_v10, %v5067_v24  ;;  %v8859_v1 = vor.u32 %v9699_v0, %v8858_v40  ;;  %v8852_v10 = vld [vmem:[#allocation11 + $0x148] sm:$0xf0] }
 0x35e   :  { %5356 = vmatpush.bf16.msra.mxu0 %v8575_v42  ;;  %5840 = vmatpush.bf16.msra.mxu1 %v8775_v62  ;;  %v8868_v42 = vld [vmem:[#allocation11 + $0x168] sm:$0xf0]  ;;  %v5148_v56 = vpop.f32.mrf.mxu3  ;;  %v9698_v62 = vld [vmem:[#allocation11 + $0x154] sm:$0xf] }
 0x35f   :  { %v5095_v29 = vadd.f32 %v5094_v39, %v5081_v55  ;;  %5795 = vmatpush.bf16.msrb.mxu2 %v8859_v1  ;;  %v8871_v34 = vor.u32 %v9700_v13, %v8868_v42  ;;  %v8863_v27 = vor.u32 %v9698_v62, %v8860_v9  ;;  %v8844_v55 = vld [vmem:[#allocation11 + $0x138] sm:$0xf0]  ;;  %v5149_v32 = vadd.f32 %v5148_v56, %v3629_v50  ;;  %v9690_v39 = vld [vmem:[#allocation11 + $0x114] sm:$0xf]  ;;  %v9688_v1 = vld [vmem:[#allocation11 + $0x104] sm:$0xf] }
 0x360   :  { %v8906_v56 = vld [vmem:[#allocation11 + $0x1b0] sm:$0xf] }
 0x361   :  { %5357 = vmatmul.bf16.vlgmr.msra.gmra.mxu0 %v10441_v41  ;;  %v5107_v41 = vadd.f32 %v5106_v23, %v5093_v15  ;;  %v5109_v59 = vadd.f32 %v5108_v22, %v5095_v29  ;;  %v9696_v23 = vld [vmem:[#allocation11 + $0x144] sm:$0xf]  ;;  %v5164_v15 = vpop.f32.mrf.mxu1 }
 0x362   :  { %5841 = vmatpush.bf16.msra.mxu1 %v8767_v5  ;;  %v8855_v11 = vor.u32 %v9696_v23, %v8852_v10  ;;  %v9694_v5 = vld [vmem:[#allocation11 + $0x134] sm:$0xf] }
 0x363   :  { %5829 = vmatmul.bf16.vlgmr.msra.gmra.mxu3 %v5371_v53  ;;  %v5121_v49 = vadd.f32 %v5120_v4, %v5107_v41  ;;  %v5123_v58 = vadd.f32 %v5122_v26, %v5109_v59  ;;  %5796 = vmatpush.bf16.msrb.mxu2 %v8851_v17  ;;  %v8843_v53 = vor.u32 %v9695_v35, %v8842_v19  ;;  %v8820_v26 = vld [vmem:[#allocation11 + $0x108] sm:$0xf0]  ;;  %v9717_v19 = vld [vmem:[#allocation11 + $0x1e4] sm:$0xf0] }
 0x364   :  { %v5134_v43 = vpop.f32.mrf.mxu0  ;;  %v5176_v47 = vpop.f32.mrf.mxu2  ;;  %v8847_v60 = vor.u32 %v9694_v5, %v8844_v55  ;;  %v5163_v41 = vadd.f32 %v5162_v3, %v5149_v32  ;;  %v8898_v3 = vld [vmem:[#allocation11 + $0x1a0] sm:$0xf]  ;;  %v8932_v32 = vld [vmem:[#allocation11 + $0x1e8] sm:$0xf0] }
 0x365   :  { %v5135_v31 = vadd.f32 %v5134_v43, %v5121_v49  ;;  %v8882_v55 = vld [vmem:[#allocation11 + $0x180] sm:$0xf] }
 0x366   :  { %5842 = vmatpush.bf16.msra.mxu1 %v8759_v12  ;;  %v5150_v24 = vpop.f32.mrf.mxu3  ;;  %v8828_v12 = vld [vmem:[#allocation11 + $0x118] sm:$0xf0]  ;;  %v5177_v46 = vadd.f32 %v5176_v47, %v5163_v41  ;;  %v9712_v41 = vld [vmem:[#allocation11 + $0x1c4] sm:$0xf] }
 0x367   :  { %v5364_v2 = vmax.f32 %v5135_v31, 0.0  ;;  %5797 = vmatpush.bf16.msrb.mxu2 %v8843_v53  ;;  %v5151_v29 = vadd.f32 %v5150_v24, %v3629_v50  ;;  %v8831_v33 = vor.u32 %v9690_v39, %v8828_v12  ;;  %v8823_v31 = vor.u32 %v9688_v1, %v8820_v26  ;;  %v8890_v24 = vld [vmem:[#allocation11 + $0x190] sm:$0xf]  ;;  %v9707_v50 = vld [vmem:[#allocation11 + $0x194] sm:$0xf0] }
 0x368   :  { %v8891_v5 = vor.u32 %v9707_v50, %v8890_v24  ;;  %v8908_v1 = vld [vmem:[#allocation11 + $0x1b8] sm:$0xf0] }
 0x369   :  { %v5165_v22 = vadd.f32 %v5164_v15, %v5151_v29  ;;  %v5218_v59 = vpop.f32.mrf.mxu1  ;;  %v8943_v15 = vor.u32 %v9718_v48, %v8940_v8  ;;  %v9714_v29 = vld [vmem:[#allocation11 + $0x1d4] sm:$0xf]  ;;  %v9723_v48 = vld [vmem:[#allocation14 + $0x18] sm:$0xff] }
 0x36a   :  { %v9735_v8 = vld [vmem:[#allocation14 + $0x78] sm:$0xff] }
 0x36b   :  { %5798 = vmatpush.bf16.msrb.mxu2 %v8835_v36  ;;  %v8922_v36 = vld [vmem:[#allocation11 + $0x1d0] sm:$0xf] }
 0x36c   :  { %v5136_v38 = vpop.f32.mrf.mxu0  ;;  %v5178_v6 = vpop.f32.mrf.mxu2 }
 0x36d   :  { %v5137_v52 = vadd.f32 %v5136_v38, %v5123_v58  ;;  %v5179_v0 = vadd.f32 %v5178_v6, %v5165_v22  ;;  %v8938_v58 = vld [vmem:[#allocation11 + $0x1f0] sm:$0xf]  ;;  %v9719_v38 = vld [vmem:[#allocation11 + $0x1f4] sm:$0xf0] }
 0x36e   :  { %v5204_v43 = vpop.f32.mrf.mxu3  ;;  %v8939_v61 = vor.u32 %v9719_v38, %v8938_v58  ;;  %v9708_v58 = vld [vmem:[#allocation11 + $0x1a4] sm:$0xf]  ;;  %v8900_v38 = vld [vmem:[#allocation11 + $0x1a8] sm:$0xf0] }
 0x36f   :  { %v5368_v54 = vmax.f32 %v5137_v52, 0.0  ;;  %5799 = vmatpush.bf16.msrb.mxu2 %v8827_v45  ;;  %v8923_v45 = vor.u32 %v9715_v37, %v8922_v36  ;;  %v8884_v36 = vld [vmem:[#allocation11 + $0x188] sm:$0xf0] }
 0x370   :  { %5807 = vmatpush.bf16.msrb.mxu0 %v8939_v61  ;;  %v8903_v61 = vor.u32 %v9708_v58, %v8900_v38 }
 0x371   :  { %v5372_v21 = vpack.c.bf16 %v5368_v54, %v5364_v2  ;;  %v8930_v54 = vld [vmem:[#allocation11 + $0x1e0] sm:$0xf]  ;;  %v5220_v20 = vpop.f32.mrf.mxu1 }
 0x373   :  { %5787 = vmatmul.bf16.vlgmr.msrb.gmra.mxu1 %v5372_v21  ;;  %5800 = vmatpush.bf16.msrb.mxu2 %v8819_v51  ;;  %v8914_v51 = vld [vmem:[#allocation11 + $0x1c0] sm:$0xf] }
 0x374   :  { %v8915_v13 = vor.u32 %v9713_v7, %v8914_v51  ;;  %6029 = vmatpush.bf16.msrb.mxu1 %v9735_v8 }
 0x376   :  { %v5206_v2 = vpop.f32.mrf.mxu3 }
 0x377   :  { %5849 = vmatpush.bf16.msra.mxu2 %v8879_v57 }
 0x379   :  { %v5274_v6 = vpop.f32.mrf.mxu1 }
 0x37b   :  { %5850 = vmatpush.bf16.msra.mxu2 %v8871_v34  ;;  %v5232_v52 = vpop.f32.mrf.mxu2  ;;  %v9711_v34 = vld [vmem:[#allocation11 + $0x1b4] sm:$0xf0] }
 0x37c   :  { %v8907_v9 = vor.u32 %v9711_v34, %v8906_v56 }
 0x37f   :  { %5851 = vmatpush.bf16.msra.mxu2 %v8863_v27  ;;  %v9709_v27 = vld [vmem:[#allocation11 + $0x1a4] sm:$0xf0] }
 0x380   :  { %v5190_v4 = vpop.f32.mrf.mxu0 }
 0x381   :  { %v5191_v49 = vadd.f32 %v5190_v4, %v5177_v46  ;;  %v9705_v4 = vld [vmem:[#allocation11 + $0x184] sm:$0xf0]  ;;  %v8916_v46 = vld [vmem:[#allocation11 + $0x1c8] sm:$0xf0] }
 0x382   :  { %v5260_v39 = vpop.f32.mrf.mxu3 }
 0x383   :  { %5843 = vmatmul.bf16.vlgmr.msra.gmra.mxu1 %v5372_v21  ;;  %5852 = vmatpush.bf16.msra.mxu2 %v8855_v11  ;;  %v5205_v17 = vadd.f32 %v5204_v43, %v5191_v49  ;;  %v8931_v21 = vor.u32 %v9717_v19, %v8930_v54  ;;  %v5234_v30 = vpop.f32.mrf.mxu2  ;;  %v8899_v11 = vor.u32 %v9709_v27, %v8898_v3  ;;  %v8924_v43 = vld [vmem:[#allocation11 + $0x1d8] sm:$0xf0]  ;;  %v9710_v49 = vld [vmem:[#allocation11 + $0x1b4] sm:$0xf] }
 0x385   :  { %v5219_v14 = vadd.f32 %v5218_v59, %v5205_v17  ;;  %5808 = vmatpush.bf16.msrb.mxu0 %v8931_v21  ;;  %v8919_v59 = vor.u32 %v9712_v41, %v8916_v46  ;;  %v8892_v21 = vld [vmem:[#allocation11 + $0x198] sm:$0xf0] }
 0x387   :  { %5853 = vmatpush.bf16.msra.mxu2 %v8847_v60  ;;  %v5233_v16 = vadd.f32 %v5232_v52, %v5219_v14  ;;  %v8883_v60 = vor.u32 %v9705_v4, %v8882_v55  ;;  %v9726_v55 = vld [vmem:[#allocation14 + $0x30] sm:$0xff]  ;;  %v9725_v4 = vld [vmem:[#allocation14 + $0x28] sm:$0xff] }
 0x388   :  { %v5192_v40 = vpop.f32.mrf.mxu0 }
 0x389   :  { %v5193_v28 = vadd.f32 %v5192_v40, %v5179_v0  ;;  %5809 = vmatpush.bf16.msrb.mxu0 %v8923_v45  ;;  %v3630_v0 = vperm.slane %v10469_v18, 3 }
 0x38a   :  { %v5262_v40 = vpop.f32.mrf.mxu3 }
 0x38b   :  { %5854 = vmatpush.bf16.msra.mxu2 %v8839_v25  ;;  %v5207_v35 = vadd.f32 %v5206_v2, %v5193_v28  ;;  %v9716_v25 = vld [vmem:[#allocation11 + $0x1e4] sm:$0xf]  ;;  %v5276_v28 = vpop.f32.mrf.mxu1  ;;  %v5261_v52 = vadd.f32 %v5260_v39, %v3630_v0  ;;  %v5263_v17 = vadd.f32 %v5262_v40, %v3630_v0  ;;  %v9733_v39 = vld [vmem:[#allocation14 + $0x68] sm:$0xff] }
 0x38c   :  { %v8935_v12 = vor.u32 %v9716_v25, %v8932_v32  ;;  %v9734_v25 = vld [vmem:[#allocation14 + $0x70] sm:$0xff]  ;;  %v9721_v32 = vld [vmem:[#allocation14 + $0x8] sm:$0xff]  ;;  %v9728_v40 = vld [vmem:[#allocation14 + $0x40] sm:$0xff] }
 0x38d   :  { %v5221_v63 = vadd.f32 %v5220_v20, %v5207_v35  ;;  %5810 = vmatpush.bf16.msrb.mxu0 %v8915_v13  ;;  %v5275_v19 = vadd.f32 %v5274_v6, %v5261_v52  ;;  %v9706_v35 = vld [vmem:[#allocation11 + $0x194] sm:$0xf]  ;;  %v5277_v18 = vadd.f32 %v5276_v28, %v5263_v17  ;;  %v9704_v20 = vld [vmem:[#allocation11 + $0x184] sm:$0xf]  ;;  %6030 = vmatpush.bf16.msrb.mxu1 %v9734_v25 }
 0x38e   :  { %v8887_v45 = vor.u32 %v9704_v20, %v8884_v36 }
 0x38f   :  { %5855 = vmatpush.bf16.msra.mxu2 %v8831_v33  ;;  %v5235_v57 = vadd.f32 %v5234_v30, %v5221_v63  ;;  %v8927_v33 = vor.u32 %v9714_v29, %v8924_v43  ;;  %v9732_v29 = vld [vmem:[#allocation14 + $0x60] sm:$0xff]  ;;  %v9731_v43 = vld [vmem:[#allocation14 + $0x58] sm:$0xff] }
 0x391   :  { %5811 = vmatpush.bf16.msrb.mxu0 %v8907_v9  ;;  %6031 = vmatpush.bf16.msrb.mxu1 %v9733_v39 }
 0x393   :  { %5856 = vmatpush.bf16.msra.mxu2 %v8823_v31  ;;  %v8911_v31 = vor.u32 %v9710_v49, %v8908_v1 }
 0x395   :  { %5812 = vmatpush.bf16.msrb.mxu0 %v8899_v11  ;;  %6032 = vmatpush.bf16.msrb.mxu1 %v9732_v29 }
 0x399   :  { %5813 = vmatpush.bf16.msrb.mxu0 %v8891_v5  ;;  %v5330_v37 = vpop.f32.mrf.mxu1  ;;  %v9727_v5 = vld [vmem:[#allocation14 + $0x38] sm:$0xff]  ;;  %6033 = vmatpush.bf16.msrb.mxu1 %v9731_v43 }
 0x39a   :  { %6015 = vmatpush.bf16.msrb.mxu3 %v9727_v5 }
 0x39d   :  { %5814 = vmatpush.bf16.msrb.mxu0 %v8883_v60  ;;  %v9724_v60 = vld [vmem:[#allocation14 + $0x20] sm:$0xff] }
 0x39e   :  { %v5246_v53 = vpop.f32.mrf.mxu0  ;;  %6016 = vmatpush.bf16.msrb.mxu3 %v9726_v55 }
 0x39f   :  { %v5247_v44 = vadd.f32 %v5246_v53, %v5233_v16  ;;  %v8895_v53 = vor.u32 %v9706_v35, %v8892_v21 }
 0x3a1   :  { %v5365_v23 = vmax.f32 %v5247_v44, 0.0  ;;  %5863 = vmatpush.bf16.msra.mxu0 %v8943_v15  ;;  %v5288_v22 = vpop.f32.mrf.mxu2  ;;  %v5332_v34 = vpop.f32.mrf.mxu1  ;;  %v9722_v15 = vld [vmem:[#allocation14 + $0x10] sm:$0xff] }
 0x3a2   :  { %v5316_v2 = vpop.f32.mrf.mxu3  ;;  %v5289_v14 = vadd.f32 %v5288_v22, %v5275_v19  ;;  %6017 = vmatpush.bf16.msrb.mxu3 %v9725_v4  ;;  %v9729_v22 = vld [vmem:[#allocation14 + $0x48] sm:$0xff] }
 0x3a5   :  { %5864 = vmatpush.bf16.msra.mxu0 %v8935_v12  ;;  %v9720_v12 = vld [vmem:[#allocation14] sm:$0xff] }
 0x3a6   :  { %v5248_v42 = vpop.f32.mrf.mxu0  ;;  %6018 = vmatpush.bf16.msrb.mxu3 %v9724_v60 }
 0x3a7   :  { %v5249_v62 = vadd.f32 %v5248_v42, %v5235_v57 }
 0x3a9   :  { %v5369_v10 = vmax.f32 %v5249_v62, 0.0  ;;  %5865 = vmatpush.bf16.msra.mxu0 %v8927_v33  ;;  %v5290_v54 = vpop.f32.mrf.mxu2  ;;  %v9730_v33 = vld [vmem:[#allocation14 + $0x50] sm:$0xff] }
 0x3aa   :  { %v5291_v16 = vadd.f32 %v5290_v54, %v5277_v18  ;;  %v5318_v57 = vpop.f32.mrf.mxu3  ;;  %6019 = vmatpush.bf16.msrb.mxu3 %v9723_v48  ;;  %6034 = vmatpush.bf16.msrb.mxu1 %v9730_v33 }
 0x3ab   :  { %v5373_v47 = vpack.c.bf16 %v5369_v10, %v5365_v23 }
 0x3ad   :  { %5801 = vmatmul.bf16.vlgmr.msrb.gmra.mxu2 %v5373_v47  ;;  %5866 = vmatpush.bf16.msra.mxu0 %v8919_v59  ;;  %v5439_v59 = vld [vmem:[#allocation13] sm:$0x3] }
 0x3ae   :  { %6020 = vmatpush.bf16.msrb.mxu3 %v9722_v15  ;;  %6035 = vmatpush.bf16.msrb.mxu1 %v9729_v22  ;;  %v5441_v49 = vperm.slane %v5439_v59, 0  ;;  %v5442_v20 = vperm.slane %v5439_v59, 1 }
 0x3b1   :  { %5867 = vmatpush.bf16.msra.mxu0 %v8911_v31 }
 0x3b2   :  { %6021 = vmatpush.bf16.msrb.mxu3 %v9721_v32  ;;  %6036 = vmatpush.bf16.msrb.mxu1 %v9728_v40 }
 0x3b5   :  { %5868 = vmatpush.bf16.msra.mxu0 %v8903_v61 }
 0x3b6   :  { %6022 = vmatpush.bf16.msrb.mxu3 %v9720_v12 }
 0x3b9   :  { %5869 = vmatpush.bf16.msra.mxu0 %v8895_v53 }
 0x3bd   :  { %5857 = vmatmul.bf16.vlgmr.msra.gmra.mxu2 %v5373_v47  ;;  %5870 = vmatpush.bf16.msra.mxu0 %v8887_v45 }
 0x3be   :  { %v5302_v26 = vpop.f32.mrf.mxu0 }
 0x3bf   :  { %v5303_v30 = vadd.f32 %v5302_v26, %v5289_v14  ;;  %v5344_v7 = vpop.f32.mrf.mxu2 }
 0x3c1   :  { %v5317_v44 = vadd.f32 %v5316_v2, %v5303_v30 }
 0x3c3   :  { %v5331_v56 = vadd.f32 %v5330_v37, %v5317_v44 }
 0x3c5   :  { %v5345_v9 = vadd.f32 %v5344_v7, %v5331_v56 }
 0x3c6   :  { %v5304_v63 = vpop.f32.mrf.mxu0 }
 0x3c7   :  { %v5305_v51 = vadd.f32 %v5304_v63, %v5291_v16  ;;  %v5346_v3 = vpop.f32.mrf.mxu2 }
 0x3c9   :  { %v5319_v13 = vadd.f32 %v5318_v57, %v5305_v51 }
 0x3cb   :  { %v5333_v62 = vadd.f32 %v5332_v34, %v5319_v13 }
 0x3cd   :  { %v5347_v23 = vadd.f32 %v5346_v3, %v5333_v62 }
 0x3d6   :  { %v5774_v6 = vpop.f32.mrf.mxu3 }
 0x3d7   :  { %v5775_v58 = vadd.f32 %v5774_v6, %v5441_v49 }
 0x3de   :  { %v5358_v42 = vpop.f32.mrf.mxu0  ;;  %v5776_v0 = vpop.f32.mrf.mxu3 }
 0x3df   :  { %v5359_v27 = vadd.f32 %v5358_v42, %v5345_v9  ;;  %v5777_v38 = vadd.f32 %v5776_v0, %v5441_v49 }
 0x3e1   :  { %v5366_v11 = vmax.f32 %v5359_v27, 0.0 }
 0x3e6   :  { %v5360_v10 = vpop.f32.mrf.mxu0  ;;  %v5830_v17 = vpop.f32.mrf.mxu3 }
 0x3e7   :  { %v5361_v47 = vadd.f32 %v5360_v10, %v5347_v23  ;;  %v5831_v45 = vadd.f32 %v5830_v17, %v5442_v20  ;;  %v9756_v23 = vld [vmem:[#allocation16] ss:$0 sm:$0xff] }
 0x3e9   :  { %v5370_v24 = vmax.f32 %v5361_v47, 0.0 }
 0x3eb   :  { %v5374_v50 = vpack.c.bf16 %v5370_v24, %v5366_v11 }
 0x3ed   :  { %5815 = vmatmul.bf16.vlgmr.msrb.gmra.mxu0 %v5374_v50 }
 0x3ee   :  { %v5832_v37 = vpop.f32.mrf.mxu3 }
 0x3ef   :  { %v5833_v30 = vadd.f32 %v5832_v37, %v5442_v20 }
 0x3f0   :  { %v5788_v41 = vpop.f32.mrf.mxu1 }
 0x3f1   :  { %v5789_v28 = vadd.f32 %v5788_v41, %v5775_v58 }
 0x3f8   :  { %v5790_v1 = vpop.f32.mrf.mxu1 }
 0x3f9   :  { %v5791_v61 = vadd.f32 %v5790_v1, %v5777_v38 }
 0x3fd   :  { %5871 = vmatmul.bf16.vlgmr.msra.gmra.mxu0 %v5374_v50 }
 0x400   :  { %v5844_v19 = vpop.f32.mrf.mxu1 }
 0x401   :  { %v5845_v51 = vadd.f32 %v5844_v19, %v5831_v45 }
 0x408   :  { %v5846_v16 = vpop.f32.mrf.mxu1 }
 0x409   :  { %v5847_v44 = vadd.f32 %v5846_v16, %v5833_v30 }
 0x430   :  { %v5802_v46 = vpop.f32.mrf.mxu2 }
 0x431   :  { %v5803_v52 = vadd.f32 %v5802_v46, %v5789_v28 }
 0x438   :  { %v5804_v26 = vpop.f32.mrf.mxu2 }
 0x439   :  { %v5805_v2 = vadd.f32 %v5804_v26, %v5791_v61 }
 0x440   :  { %v5858_v53 = vpop.f32.mrf.mxu2 }
 0x441   :  { %v5859_v57 = vadd.f32 %v5858_v53, %v5845_v51 }
 0x448   :  { %v5860_v7 = vpop.f32.mrf.mxu2 }
 0x449   :  { %v5861_v13 = vadd.f32 %v5860_v7, %v5847_v44 }
 0x46a   :  { %v5816_v31 = vpop.f32.mrf.mxu0 }
 0x46b   :  { %v5817_v54 = vadd.f32 %v5816_v31, %v5803_v52 }
 0x46d   :  { %v5877_v14 = vmax.f32 %v5817_v54, 0.0 }
 0x472   :  { %v5818_v35 = vpop.f32.mrf.mxu0 }
 0x473   :  { %v5819_v21 = vadd.f32 %v5818_v35, %v5805_v2 }
 0x475   :  { %v5879_v18 = vmax.f32 %v5819_v21, 0.0 }
 0x477   :  { %v5881_v36 = vpack.c.bf16 %v5879_v18, %v5877_v14 }
 0x479   :  { %6023 = vmatmul.bf16.vlgmr.msrb.gmra.mxu3 %v5881_v36 }
 0x47a   :  { %v5872_v63 = vpop.f32.mrf.mxu0 }
 0x47b   :  { %v5873_v42 = vadd.f32 %v5872_v63, %v5859_v57 }
 0x47d   :  { %v5878_v62 = vmax.f32 %v5873_v42, 0.0 }
 0x482   :  { %v5874_v56 = vpop.f32.mrf.mxu0 }
 0x483   :  { %v5875_v34 = vadd.f32 %v5874_v56, %v5861_v13 }
 0x485   :  { %v5880_v9 = vmax.f32 %v5875_v34, 0.0 }
 0x487   :  { %v5882_v3 = vpack.c.bf16 %v5880_v9, %v5878_v62 }
 0x489   :  { %6037 = vmatmul.bf16.vlgmr.msrb.gmra.mxu1 %v5882_v3 }
 0x4fc   :  { %v6024_v27 = vpop.f32.mrf.mxu3 }
 0x4fd   :  { %v6025_v10 = vadd.f32 %v9756_v23, %v6024_v27 }
 0x504   :  { %v6026_v24 = vpop.f32.mrf.mxu3 }
 0x505   :  { %v6027_v50 = vadd.f32 %v9756_v23, %v6026_v24 }
 0x506   :  { %v6038_v47 = vpop.f32.mrf.mxu1 }
 0x507   :  { %v6039_v11 = vadd.f32 %v6038_v47, %v6025_v10 }
 0x509   :  { %6043 = vmax.xlane.f32.xlu0 %v6039_v11 }
 0x50e   :  { %v6040_v5 = vpop.f32.mrf.mxu1 }
 0x50f   :  { %v6041_v55 = vadd.f32 %v6040_v5, %v6027_v50 }
 0x511   :  { %6045 = vmax.xlane.f32.xlu0 %v6041_v55 }
 0x57c   :  { %v6044_v4 = vpop.xlane.xlu0 %6043 }
 0x57d   :  { %v6047_v60 = vsub.f32 %v6039_v11, %v6044_v4 }
 0x57f   :  { %v6049_v48 = vmul.f32 1.442695, %v6047_v60 }
 0x581   :  { %9757 = vpow2.f32 %v6049_v48 }
 0x584   :  { %v6046_v8 = vpop.xlane.xlu0 %6045 }
 0x585   :  { %v6048_v15 = vsub.f32 %v6041_v55, %v6046_v8 }
 0x587   :  { %v9758_v25 = vpop.eup %9757  ;;  %v6051_v32 = vmul.f32 1.442695, %v6048_v15 }
 0x588   :  { %6053 = vadd.xlane.f32.xlu1 %v9758_v25 }
 0x589   :  { %9759 = vpow2.f32 %v6051_v32 }
 0x58f   :  { %v9760_v39 = vpop.eup %9759 }
 0x590   :  { %6055 = vadd.xlane.f32.xlu1 %v9760_v39 }
 0x5fb   :  { %v6054_v12 = vpop.xlane.xlu1 %6053 }
 0x5fc   :  { %9761 = vlog2.f32 %v6054_v12 }
 0x602   :  { %v9762_v29 = vpop.eup %9761 }
 0x603   :  { %v6058_v43 = vmul.f32 0.6931472, %v9762_v29  ;;  %v6056_v6 = vpop.xlane.xlu1 %6055 }
 0x604   :  { %9763 = vlog2.f32 %v6056_v6 }
 0x605   :  { %v6061_v33 = vsub.f32 %v6047_v60, %v6058_v43 }
 0x607   :  { %6063 = vst [vmem:[#allocation17] sm:$0xff] %v6061_v33 }
 0x60a   :  { %v9764_v41 = vpop.eup %9763 }
 0x60b   :  { %v6060_v46 = vmul.f32 0.6931472, %v9764_v41 }
 0x60d   :  { %v6062_v22 = vsub.f32 %v6048_v15, %v6060_v46 }
 0x60f   :  { %6064 = vst [vmem:[#allocation17 + $0x8] sm:$0xff] %v6062_v22 }
 0x610   :  { %6077 = dma.vmem_to_hbm [thread:$0]  %s6070_s8, 256, %s6072_s16, [#allocation4], %s10026_s29, %s10026_s29, %s10027_s30  }
 0x611   :  { %10017 = dma.done.wait [#allocation4], 256  }
 0x612   :  { %10018 = vsyncadd [#allocation4], 4294967040 }
 0x613   :  { %6082 = vsyncpa [#allocation3], 1 }
 0x614   :  { %6083 = vsyncpa [#allocation6], 1 }
 0x615   :  { %6084 = vsyncpa [#allocation9], 1 }
 0x616   :  { %6085 = vsyncpa [#allocation12], 1 }
 0x617   :  { %6086 = vsyncpa [#allocation15], 1 }
 0x618   :  { %6087 = vsyncpa [#allocation4], 1 }

</bundles_post_ra>
